<compile_context>
chip_gen: v6e
topology: v6e:2x2x1
jax: 0.10.0
libtpu: 0.0.40
codegen_flags: <defaults>
</compile_context>

<pallas_src>
import jax
import jax.numpy as jnp
from jax import lax
from jax.experimental import pallas as pl
from jax.experimental.pallas import tpu as pltpu

TH = 0.025  # ensemble threshold from the PyTorch module


# ---------------------------------------------------------------------------
# Tile-size helpers (VMEM-budget aware, divisor-of-extent, hardware-aligned)
# ---------------------------------------------------------------------------
def _largest_divisor_tile(n, multiple, bytes_per_unit, budget_bytes, cap=None):
    """Largest divisor of n that is a multiple of `multiple`, fits the byte budget,
    and is <= cap.  Falls back to the full extent n (always a legal block)."""
    best = None
    hi = n if cap is None else min(n, cap)
    for t in range(multiple, hi + 1, multiple):
        if n % t == 0 and t * bytes_per_unit <= budget_bytes:
            best = t
    return best if best is not None else n


# ---------------------------------------------------------------------------
# Kernel 1: maximum-intensity projections  (torch.max(pet_vol, dim=0/1)[0])
#   grid = (B, H // row_tile); per step the block is (1, row_tile, W, D) f32.
#   mipy (max over W, axis=1)  -> written per H-tile (XLU sublane reduce)
#   mipx (max over H, axis=0)  -> resident accumulator, running jnp.maximum (VPU)
# ---------------------------------------------------------------------------
def _mip_kernel(vol_ref, mipx_ref, mipy_ref):
    h = pl.program_id(1)
    v = vol_ref[0]                                  # (row_tile, W, D) f32
    mipy_ref[0] = jnp.max(v, axis=1)                # (row_tile, D): max over W
    tile_max = jnp.max(v, axis=0)                   # (W, D): partial max over H

    @pl.when(h == 0)
    def _():
        mipx_ref[0] = tile_max

    @pl.when(h > 0)
    def _():
        mipx_ref[0] = jnp.maximum(mipx_ref[0], tile_max)


def mip_pallas(vol, row_tile):
    B, H, W, D = vol.shape
    return pl.pallas_call(
        _mip_kernel,
        out_shape=(jax.ShapeDtypeStruct((B, W, D), vol.dtype),   # max over H
                   jax.ShapeDtypeStruct((B, H, D), vol.dtype)),  # max over W
        grid_spec=pltpu.PrefetchScalarGridSpec(
            num_scalar_prefetch=0,
            grid=(B, H // row_tile),
            in_specs=[pl.BlockSpec((1, row_tile, W, D), lambda b, h: (b, h, 0, 0))],
            out_specs=[pl.BlockSpec((1, W, D), lambda b, h: (b, 0, 0)),
                       pl.BlockSpec((1, row_tile, D), lambda b, h: (b, h, 0))]),
        compiler_params=pltpu.CompilerParams(
            dimension_semantics=("parallel", "arbitrary")),
    )(vol)


# ---------------------------------------------------------------------------
# Kernel 2: bicubic resize along the last axis as a matmul with a fixed
# interpolation matrix (nnf.interpolate(..., mode='bicubic', align_corners=False)).
# Both MIPs are resized in one call (two inputs, one (2, rows, S) output) so no
# stacked (2,B,S,D) intermediate ever touches HBM.  f32 in, f32 MXU accumulation.
# ---------------------------------------------------------------------------
def _resize_kernel(mx_ref, my_ref, w_ref, o_ref):
    w = w_ref[...]
    o_ref[0] = jnp.dot(mx_ref[...], w, preferred_element_type=jnp.float32)
    o_ref[1] = jnp.dot(my_ref[...], w, preferred_element_type=jnp.float32)


def bicubic_resize_pallas(mipx2d, mipy2d, wmat, row_tile):
    rows, D = mipx2d.shape
    S = wmat.shape[1]
    return pl.pallas_call(
        _resize_kernel,
        out_shape=jax.ShapeDtypeStruct((2, rows, S), jnp.float32),
        grid_spec=pltpu.PrefetchScalarGridSpec(
            num_scalar_prefetch=0,
            grid=(rows // row_tile,),
            in_specs=[pl.BlockSpec((row_tile, D), lambda r: (r, 0)),
                      pl.BlockSpec((row_tile, D), lambda r: (r, 0)),
                      pl.BlockSpec((D, S), lambda r: (0, 0))],     # resident weights
            out_specs=pl.BlockSpec((2, row_tile, S), lambda r: (0, r, 0))),
        compiler_params=pltpu.CompilerParams(dimension_semantics=("parallel",)),
    )(mipx2d, mipy2d, wmat)


def build_bicubic_matrix(in_size, out_size, a=-0.75):
    """(in_size, out_size) weight matrix reproducing PyTorch bicubic (a=-0.75),
    align_corners=False, border clamping."""
    def cubic(x):
        ax = jnp.abs(x)
        return jnp.where(
            ax <= 1.0,
            (a + 2.0) * ax ** 3 - (a + 3.0) * ax ** 2 + 1.0,
            jnp.where(ax < 2.0,
                      a * ax ** 3 - 5.0 * a * ax ** 2 + 8.0 * a * ax - 4.0 * a,
                      0.0))

    j = jnp.arange(out_size, dtype=jnp.float32)
    src = (j + 0.5) * (in_size / out_size) - 0.5
    fl = jnp.floor(src)
    t = src - fl
    M = jnp.zeros((in_size, out_size), dtype=jnp.float32)
    cols = jnp.arange(out_size)
    for k in range(-1, 3):
        idx = jnp.clip(fl + k, 0, in_size - 1).astype(jnp.int32)
        w = cubic(t - k)
        M = M.at[idx, cols].add(w)
    return M


# ---------------------------------------------------------------------------
# Kernel 3: fused 8-head classifier + ensemble vote.
#   For each MIP input i in {x, y}:
#     raw heads   : logits_r = feat           . w_raw[i]^T + b_raw[i]   (2 heads)
#     debrain hds : logits_d = clip(feat,0,1) . w_db[i]^T  + b_db[i]    (2 heads)
#       (w_db already has the transpose permutation and *255 scale folded in,
#        so no separate debrain image / transpose / concat is materialized)
#   preds = (sum over 8 heads of (logit > 0.025)) > 0   -> {0., 1.}
#   Weights are lane-major (input, head, K): heads on sublanes, K on lanes ->
#   dense DMA, no 64x lane-padding bloat.  grid = (input, K-tile); K-tiling is
#   collapsed (k_tile = SS when it fits VMEM) so the grid is only a few steps.
# ---------------------------------------------------------------------------
def _ensemble_kernel(feat_ref, wr_ref, wd_ref, br_ref, bd_ref, o_ref,
                     lr_acc, ld_acc, vote_acc):
    i = pl.program_id(0)
    k = pl.program_id(1)
    ni = pl.num_programs(0)
    nk = pl.num_programs(1)

    @pl.when(jnp.logical_and(i == 0, k == 0))
    def _():
        vote_acc[...] = jnp.zeros_like(vote_acc)

    @pl.when(k == 0)
    def _():
        lr_acc[...] = jnp.zeros_like(lr_acc)
        ld_acc[...] = jnp.zeros_like(ld_acc)

    f = feat_ref[0]                                       # (B, k_tile) f32
    wr = wr_ref[0]                                        # (2, k_tile) heads-major
    wd = wd_ref[0]                                        # (2, k_tile)
    dn = (((1,), (1,)), ((), ()))                         # contract K with K
    lr_acc[...] += lax.dot_general(f, wr, dn,
                                   preferred_element_type=jnp.float32)   # (B, 2)
    ld_acc[...] += lax.dot_general(jnp.clip(f, 0.0, 1.0), wd, dn,
                                   preferred_element_type=jnp.float32)   # (B, 2)

    @pl.when(k == nk - 1)
    def _():
        lr = lr_acc[...] + br_ref[0]                      # (B, 2)
        ld = ld_acc[...] + bd_ref[0]                      # (B, 2)
        votes = (jnp.sum((lr > TH).astype(jnp.float32), axis=1, keepdims=True)
                 + jnp.sum((ld > TH).astype(jnp.float32), axis=1, keepdims=True))
        vote_acc[...] += votes

    @pl.when(jnp.logical_and(i == ni - 1, k == nk - 1))
    def _():
        o_ref[...] = (vote_acc[...] > 0.0).astype(jnp.float32)


def ensemble_pallas(feats, w_raw, w_db, b_raw, b_db, k_tile):
    n_inp, B, SS = feats.shape
    return pl.pallas_call(
        _ensemble_kernel,
        out_shape=jax.ShapeDtypeStruct((B, 1), jnp.float32),
        grid_spec=pltpu.PrefetchScalarGridSpec(
            num_scalar_prefetch=0,
            grid=(n_inp, SS // k_tile),
            in_specs=[pl.BlockSpec((1, B, k_tile), lambda i, k: (i, 0, k)),
                      pl.BlockSpec((1, 2, k_tile), lambda i, k: (i, 0, k)),
                      pl.BlockSpec((1, 2, k_tile), lambda i, k: (i, 0, k)),
                      pl.BlockSpec((1, 1, 2), lambda i, k: (i, 0, 0)),
                      pl.BlockSpec((1, 1, 2), lambda i, k: (i, 0, 0))],
            out_specs=pl.BlockSpec((B, 1), lambda i, k: (0, 0)),
            scratch_shapes=[pltpu.VMEM((B, 2), jnp.float32),
                            pltpu.VMEM((B, 2), jnp.float32),
                            pltpu.VMEM((B, 1), jnp.float32)]),
        compiler_params=pltpu.CompilerParams(
            dimension_semantics=("arbitrary", "arbitrary")),
    )(feats, w_raw, w_db, b_raw, b_db)


# ---------------------------------------------------------------------------
# Weight preparation: fold the debrain transpose (rotate90CCW + flip(0) ==
# transpose for square images) and the *255 scale into the debrain head weights.
# Lane-major packing: (input, head, K) -> heads on sublanes, K on lanes.
# Model order: [r18_x, r18_y, r50_x, r50_y, r18_x_db, r18_y_db, r50_x_db, r50_y_db]
# Input 0 = mip_x feeds heads (0, 2) raw and (4, 6) debrain;
# Input 1 = mip_y feeds heads (1, 3) raw and (5, 7) debrain.
# ---------------------------------------------------------------------------
def pack_ensemble_weights(w8, b8, S):
    SS = S * S

    def fold_db(w):
        # logit_db = clip(m,0,1)·255 applied to m^T; fold 255 & transpose into W
        return 255.0 * w.reshape(S, S).T.reshape(SS)

    w_raw = jnp.stack([jnp.stack([w8[0], w8[2]], axis=0),
                       jnp.stack([w8[1], w8[3]], axis=0)], axis=0)          # (2, 2, SS)
    w_db = jnp.stack([jnp.stack([fold_db(w8[4]), fold_db(w8[6])], axis=0),
                      jnp.stack([fold_db(w8[5]), fold_db(w8[7])], axis=0)], axis=0)
    b_raw = jnp.stack([jnp.stack([b8[0], b8[2]]),
                       jnp.stack([b8[1], b8[3]])], axis=0).reshape(2, 1, 2)
    b_db = jnp.stack([jnp.stack([b8[4], b8[6]]),
                      jnp.stack([b8[5], b8[7]])], axis=0).reshape(2, 1, 2)
    return w_raw, w_db, b_raw, b_db


# ---------------------------------------------------------------------------
# Full forward pass
# ---------------------------------------------------------------------------
def ensemble_forward(x, wmat, w_raw, w_db, b_raw, b_db):
    B = x.shape[0]
    vol = x[:, 0]                                    # (B, H, W, D) f32, NO cast
    _, H, W, D = vol.shape
    S = wmat.shape[1]
    # square-MIP requirement: rotate90CCW+flip == transpose fold and the bicubic
    # identity on the first spatial axis both rely on H == W and H == S.
    assert H == W and S == H

    # 1) tiled MIP reduction, f32 straight from HBM.
    #    Budget: double-buffered input block <= ~20 MiB -> fits default scoped VMEM
    #    on v5e (16 MiB would clip this, so keep a cap), v6e (32 MiB), v7x (32 MiB).
    mip_row_tile = _largest_divisor_tile(
        H, multiple=8, bytes_per_unit=2 * W * D * 4,        # double-buffered f32 rows
        budget_bytes=20 * 1024 * 1024)
    mip_x_raw, mip_y_raw = mip_pallas(vol, mip_row_tile)     # (B, S, D) f32 each

    # 2) one resize call for both MIPs (no stack): (B*S, D) @ (D, S) twice per step
    rows = B * S
    rs_row_tile = _largest_divisor_tile(
        rows, multiple=8,
        bytes_per_unit=2 * (2 * D * 4 + 2 * S * 4),          # 2 inputs + (2,·,S) out, x2 buf
        budget_bytes=16 * 1024 * 1024, cap=512)
    resized = bicubic_resize_pallas(mip_x_raw.reshape(rows, D),
                                    mip_y_raw.reshape(rows, D),
                                    wmat, rs_row_tile)        # (2, B*S, S) f32
    feats = resized.reshape(2, B, S * S)                      # contiguous, free reshape

    # 3) fused 8-head classifier + vote (clip / transpose / *255 folded in).
    #    Collapse K-tiling: full SS per step when it fits (~7.7 MB at production).
    SS = S * S
    k_tile = _largest_divisor_tile(
        SS, multiple=128,
        bytes_per_unit=2 * (B + 2 + 2) * 4,                   # feat + 2 weight blocks, x2 buf
        budget_bytes=12 * 1024 * 1024)
    return ensemble_pallas(feats, w_raw, w_db, b_raw, b_db, k_tile)   # (B, 1)


if __name__ == "__main__":
    # Small shapes consistent with the module: volume (B, 1, H, W, D), MIPs (B, S, S)
    B, H, W, D = 2, 64, 64, 32
    S = H            # output MIP spatial size (original: 400x400 from 400x400x128)
    SS = S * S

    key = jax.random.PRNGKey(0)
    kx, kw, kb = jax.random.split(key, 3)

    x = jax.random.uniform(kx, (B, 1, H, W, D), dtype=jnp.float32)

    # Fixed bicubic interpolation matrix (D -> S along the last axis)
    wmat = build_bicubic_matrix(D, S)

    # Deterministic synthetic weights for the 8 classifier heads
    w8 = jax.random.normal(kw, (8, SS), dtype=jnp.float32) * (1.0 / SS)
    b8 = jax.random.normal(kb, (8,), dtype=jnp.float32) * 0.01
    w_raw, w_db, b_raw, b_db = pack_ensemble_weights(w8, b8, S)

    preds = ensemble_forward(x, wmat, w_raw, w_db, b_raw, b_db)
    preds = jax.block_until_ready(preds)
    assert preds.shape == (B, 1)
    assert bool(jnp.all((preds == 0.0) | (preds == 1.0)))
    print("KERNEL_OK")
</pallas_src>

<mosaic_0001>
module attributes {stable_mosaic.version = 11 : i64} {
  func.func @_mip_kernel(%arg0: i32, %arg1: i32, %arg2: memref<1x64x64x32xf32, #tpu.memory_space<vmem>>, %arg3: memref<1x64x32xf32, #tpu.memory_space<vmem>>, %arg4: memref<1x64x32xf32, #tpu.memory_space<vmem>>) attributes {dimension_semantics = [#tpu.dimension_semantics<parallel>, #tpu.dimension_semantics<arbitrary>], iteration_bounds = array<i64: 2, 1>, scalar_prefetch = 0 : i64, scratch_operands = 0 : i64, tpu.core_type = #tpu.core_type<tc>, window_params = [{transform_indices = @transform_0, window_bounds = array<i64: 1, 64, 64, 32>}, {transform_indices = @transform_1, window_bounds = array<i64: 1, 64, 32>}, {transform_indices = @transform_2, window_bounds = array<i64: 1, 64, 32>}]} {
    %c0 = arith.constant 0 : index
    %c0_0 = arith.constant 0 : index
    %c0_1 = arith.constant 0 : index
    %c0_2 = arith.constant 0 : index
    %0 = vector.load %arg2[%c0, %c0_0, %c0_1, %c0_2] : memref<1x64x64x32xf32, #tpu.memory_space<vmem>>, vector<1x64x64x32xf32>
    %1 = vector.shape_cast %0 : vector<1x64x64x32xf32> to vector<64x64x32xf32>
    %cst = arith.constant dense<0xFF800000> : vector<64x32xf32>
    %2 = vector.multi_reduction <maximumf>, %1, %cst [1] : vector<64x64x32xf32> to vector<64x32xf32>
    %c0_3 = arith.constant 0 : index
    %c0_4 = arith.constant 0 : index
    %c0_5 = arith.constant 0 : index
    %3 = vector.load %arg4[%c0_3, %c0_4, %c0_5] : memref<1x64x32xf32, #tpu.memory_space<vmem>>, vector<1x64x32xf32>
    %4 = vector.shape_cast %3 : vector<1x64x32xf32> to vector<64x32xf32>
    %5 = vector.shape_cast %2 : vector<64x32xf32> to vector<1x64x32xf32>
    tpu.vector_store %arg4[%c0_3, %c0_4, %c0_5], %5 {strides = array<i32>} : memref<1x64x32xf32, #tpu.memory_space<vmem>>, vector<1x64x32xf32>,
    %cst_6 = arith.constant dense<0xFF800000> : vector<64x32xf32>
    %6 = vector.multi_reduction <maximumf>, %1, %cst_6 [0] : vector<64x64x32xf32> to vector<64x32xf32>
    %c0_i32 = arith.constant 0 : i32
    %7 = arith.cmpi eq, %arg1, %c0_i32 : i32
    %8 = arith.extui %7 : i1 to i32
    %c0_i32_7 = arith.constant 0 : i32
    %9 = arith.cmpi ne, %8, %c0_i32_7 : i32
    scf.if %9 {
      %c0_10 = arith.constant 0 : index
      %c0_11 = arith.constant 0 : index
      %c0_12 = arith.constant 0 : index
      %13 = vector.load %arg3[%c0_10, %c0_11, %c0_12] : memref<1x64x32xf32, #tpu.memory_space<vmem>>, vector<1x64x32xf32>
      %14 = vector.shape_cast %13 : vector<1x64x32xf32> to vector<64x32xf32>
      %15 = vector.shape_cast %6 : vector<64x32xf32> to vector<1x64x32xf32>
      tpu.vector_store %arg3[%c0_10, %c0_11, %c0_12], %15 {strides = array<i32>} : memref<1x64x32xf32, #tpu.memory_space<vmem>>, vector<1x64x32xf32>,
    } else {
    }
    %c0_i32_8 = arith.constant 0 : i32
    %10 = arith.cmpi sgt, %arg1, %c0_i32_8 : i32
    %11 = arith.extui %10 : i1 to i32
    %c0_i32_9 = arith.constant 0 : i32
    %12 = arith.cmpi ne, %11, %c0_i32_9 : i32
    scf.if %12 {
      %c0_10 = arith.constant 0 : index
      %c0_11 = arith.constant 0 : index
      %c0_12 = arith.constant 0 : index
      %13 = vector.load %arg3[%c0_10, %c0_11, %c0_12] : memref<1x64x32xf32, #tpu.memory_space<vmem>>, vector<1x64x32xf32>
      %14 = vector.shape_cast %13 : vector<1x64x32xf32> to vector<64x32xf32>
      %15 = arith.maximumf %14, %6 : vector<64x32xf32>
      %c0_13 = arith.constant 0 : index
      %c0_14 = arith.constant 0 : index
      %c0_15 = arith.constant 0 : index
      %16 = vector.load %arg3[%c0_13, %c0_14, %c0_15] : memref<1x64x32xf32, #tpu.memory_space<vmem>>, vector<1x64x32xf32>
      %17 = vector.shape_cast %16 : vector<1x64x32xf32> to vector<64x32xf32>
      %18 = vector.shape_cast %15 : vector<64x32xf32> to vector<1x64x32xf32>
      tpu.vector_store %arg3[%c0_13, %c0_14, %c0_15], %18 {strides = array<i32>} : memref<1x64x32xf32, #tpu.memory_space<vmem>>, vector<1x64x32xf32>,
    } else {
    }
    return
  }
  func.func @transform_0(%arg0: i32, %arg1: i32) -> (i32, i32, i32, i32) {
    %c0_i32 = arith.constant 0 : i32
    %c0_i32_0 = arith.constant 0 : i32
    %c0_i32_1 = arith.constant 0 : i32
    return %arg0, %arg1, %c0_i32, %c0_i32_0 : i32, i32, i32, i32
  }
  func.func @transform_1(%arg0: i32, %arg1: i32) -> (i32, i32, i32) {
    %c0_i32 = arith.constant 0 : i32
    %c0_i32_0 = arith.constant 0 : i32
    %c0_i32_1 = arith.constant 0 : i32
    return %arg0, %c0_i32, %c0_i32_0 : i32, i32, i32
  }
  func.func @transform_2(%arg0: i32, %arg1: i32) -> (i32, i32, i32) {
    %c0_i32 = arith.constant 0 : i32
    %c0_i32_0 = arith.constant 0 : i32
    return %arg0, %arg1, %c0_i32 : i32, i32, i32
  }
}

</mosaic_0001>

<bundles_post_ra>
// kernel: tpu_custom_call.1
= control target key start
LH: loop header
LB: loop body
LE: loop exit
PB: predicated region body
PF: predicated region fallthrough
CT: control target
= control target key end

     0   :  { %s2945_s9 = smov 0   ;;  %s2947_s10 = smov 0   ;;  %s5321_s0 = inlined_call_operand.vmem [shape: f32[2,64,64,32], index: 0, kind: input, shape index: {}]   ;;  %s5322_s1 = inlined_call_operand.vmem [shape: f32[2,64,32], index: 1, kind: output, shape index: {0}]   ;;  %s5323_s2 = inlined_call_operand.vmem [shape: f32[2,64,32], index: 2, kind: output, shape index: {1}]  }
   0x1   :  { %s2949_s11 = smov 0  }
   0x2 LB: > { %s25_s12 = sadd.s32 1, %s2924_s10  ;;  %p2870_p0 = scmp.ge.s32.totalorder %s2928_s11, 1  ;;  %s2928_s11 = sphi %s2949_s11, %s13_s11   ;;  %s2924_s10 = sphi %s2947_s10, %s5499_s10   ;;  %s2920_s9 = sphi %s2945_s9, %s5498_s9  }
   0x3   : > { %p27_p1 = scmp.ge.s32.totalorder %s25_s12, 2  ;;  %p137_p2 = scmp.lt.s32.totalorder %s2928_s11, 3 }
   0x5   : > { %s5501_s12 = smov (%p27_p1, %s25_s12), 0  ;;  %p138_p3 = pnand %p2870_p0, %p137_p2 }
   0x7   : > { %141 = sbr.rel (%p138_p3) target bundleno = 499 (0x1f3), region = 24 }
   0xc   : > { %p174_p4 = scmp.lt.s32.totalorder %s2920_s9, 1  ;;  %vm711_vm0 = vcmask 261120   ;;  %vm2120_vm1 = vcmask 1041409   ;;  %vm2122_vm2 = vcmask 1042434   ;;  %vm2124_vm3 = vcmask 1043459  }
   0xd   : > { %vm2126_vm4 = vcmask 1044484   ;;  %vm2128_vm5 = vcmask 1045509   ;;  %vm2130_vm6 = vcmask 1046534   ;;  %vm2132_vm7 = vcmask 1047559  }
   0xe   : > { %s5503_s9 = smov (!%p174_p4, %s2920_s9), 1 }
   0xf   : > { %s2879_s13 = sshll.u32 %s5503_s9, 12  ;;  %s2880_s17 = sshll.u32 %s5503_s9, 6 }
  0x10   : > { %s2969_s16 = scalar_lea.vmem %s5321_s0, %s2879_s13  ;;  %s5134_s20 = scalar_lea.vmem %s5323_s2, %s2880_s17 }
  0x11   : > { %v215_v0 = vld [vmem:[%s2969_s16 + $0x80] sm:$0xff]  ;;  %v216_v1 = vld [vmem:[%s2969_s16 + $0x88] sm:$0xff]  ;;  %v217_v2 = vld [vmem:[%s2969_s16 + $0x90] sm:$0xff]  ;;  %s188_s23 = scalar_lea.vmem %s5322_s1, %s2880_s17 }
  0x12   : > { %v218_v3 = vld [vmem:[%s2969_s16 + $0x98] sm:$0xff]  ;;  %v219_v4 = vld [vmem:[%s2969_s16 + $0xa0] sm:$0xff]  ;;  %v2977_v5 = vsel %vm711_vm0, %v215_v0, -inf  ;;  %v220_v6 = vld [vmem:[%s2969_s16 + $0xa8] sm:$0xff]  ;;  %v2983_v9 = vsel %vm711_vm0, %v216_v1, -inf  ;;  %v2986_v10 = vsel %vm711_vm0, %v217_v2, -inf }
  0x13   : > { %v221_v7 = vld [vmem:[%s2969_s16 + $0xb0] sm:$0xff]  ;;  %v222_v8 = vld [vmem:[%s2969_s16 + $0xb8] sm:$0xff]  ;;  %v2989_v11 = vsel %vm711_vm0, %v218_v3, -inf  ;;  %v223_v12 = vld [vmem:[%s2969_s16 + $0xc0] sm:$0xff]  ;;  %v2995_v15 = vsel %vm711_vm0, %v219_v4, -inf  ;;  %v2998_v16 = vsel %vm711_vm0, %v220_v6, -inf }
  0x14   : > { %v224_v13 = vld [vmem:[%s2969_s16 + $0xc8] sm:$0xff]  ;;  %v225_v14 = vld [vmem:[%s2969_s16 + $0xd0] sm:$0xff]  ;;  %v3001_v17 = vsel %vm711_vm0, %v221_v7, -inf  ;;  %v226_v18 = vld [vmem:[%s2969_s16 + $0xd8] sm:$0xff]  ;;  %v3007_v21 = vsel %vm711_vm0, %v223_v12, -inf  ;;  %v3019_v27 = vsel %vm711_vm0, %v222_v8, -inf }
  0x15   : > { %v227_v19 = vld [vmem:[%s2969_s16 + $0xe0] sm:$0xff]  ;;  %v228_v20 = vld [vmem:[%s2969_s16 + $0xe8] sm:$0xff]  ;;  %v3010_v22 = vsel %vm711_vm0, %v224_v13, -inf  ;;  %v3013_v23 = vsel %vm711_vm0, %v225_v14, -inf  ;;  %v229_v24 = vld [vmem:[%s2969_s16 + $0xf0] sm:$0xff]  ;;  %v2200_v28 = vmax.f32 %v3007_v21, %v2977_v5  ;;  %v3026_v30 = vsel %vm711_vm0, %v226_v18, -inf }
  0x16   : > { %v230_v25 = vld [vmem:[%s2969_s16 + $0xf8] sm:$0xff]  ;;  %v231_v26 = vld [vmem:[%s2969_s16 + $0x100] sm:$0xff]  ;;  %v2263_v29 = vmax.f32 %v3010_v22, %v2983_v9  ;;  %v232_v31 = vld [vmem:[%s2969_s16 + $0x108] sm:$0xff]  ;;  %v2326_v34 = vmax.f32 %v3013_v23, %v2986_v10  ;;  %v3034_v35 = vsel %vm711_vm0, %v227_v19, -inf  ;;  %v3037_v36 = vsel %vm711_vm0, %v228_v20, -inf }
  0x17   : > { %v233_v32 = vld [vmem:[%s2969_s16 + $0x110] sm:$0xff]  ;;  %v234_v33 = vld [vmem:[%s2969_s16 + $0x118] sm:$0xff]  ;;  %v3040_v37 = vsel %vm711_vm0, %v229_v24, -inf  ;;  %v235_v38 = vld [vmem:[%s2969_s16 + $0x120] sm:$0xff]  ;;  %v2389_v41 = vmax.f32 %v3026_v30, %v2989_v11  ;;  %v2452_v42 = vmax.f32 %v3034_v35, %v2995_v15  ;;  %v2515_v43 = vmax.f32 %v3037_v36, %v2998_v16 }
  0x18   : > { %v236_v39 = vld [vmem:[%s2969_s16 + $0x128] sm:$0xff]  ;;  %v237_v40 = vld [vmem:[%s2969_s16 + $0x130] sm:$0xff]  ;;  %v3052_v44 = vsel %vm711_vm0, %v230_v25, -inf  ;;  %v238_v45 = vld [vmem:[%s2969_s16 + $0x138] sm:$0xff]  ;;  %v2578_v46 = vmax.f32 %v3040_v37, %v3001_v17  ;;  %v3058_v47 = vsel %vm711_vm0, %v231_v26, -inf  ;;  %v3061_v48 = vsel %vm711_vm0, %v232_v31, -inf }
  0x19   : > { %5359 = vst [vmem:[#allocation2_spill] sm:$0xff] %v3052_v44  ;;  %v3064_v49 = vsel %vm711_vm0, %v233_v32, -inf  ;;  %v239_v50 = vld [vmem:[%s2969_s16 + $0x140] sm:$0xff]  ;;  %v240_v51 = vld [vmem:[%s2969_s16 + $0x148] sm:$0xff]  ;;  %v241_v52 = vld [vmem:[%s2969_s16 + $0x150] sm:$0xff]  ;;  %v2641_v53 = vmax.f32 %v3052_v44, %v3019_v27  ;;  %v2201_v54 = vmax.f32 %v2200_v28, %v3058_v47  ;;  %v2264_v55 = vmax.f32 %v2263_v29, %v3061_v48 }
  0x1a   : > { %v3074_v56 = vsel %vm711_vm0, %v234_v33, -inf  ;;  %v242_v57 = vld [vmem:[%s2969_s16 + $0x158] sm:$0xff]  ;;  %v2327_v58 = vmax.f32 %v2326_v34, %v3064_v49  ;;  %v3079_v59 = vsel %vm711_vm0, %v235_v38, -inf  ;;  %v3082_v60 = vsel %vm711_vm0, %v236_v39, -inf  ;;  %v243_v62 = vld [vmem:[%s2969_s16 + $0x160] sm:$0xff]  ;;  %v244_v63 = vld [vmem:[%s2969_s16 + $0x168] sm:$0xff] }
  0x1b   : > { %v3085_v61 = vsel %vm711_vm0, %v237_v40, -inf  ;;  %v245_v0 = vld [vmem:[%s2969_s16 + $0x170] sm:$0xff]  ;;  %v2390_v1 = vmax.f32 %v2389_v41, %v3074_v56  ;;  %v2453_v2 = vmax.f32 %v2452_v42, %v3079_v59  ;;  %v2516_v3 = vmax.f32 %v2515_v43, %v3082_v60  ;;  %v246_v6 = vld [vmem:[%s2969_s16 + $0x178] sm:$0xff]  ;;  %v247_v14 = vld [vmem:[%s2969_s16 + $0x180] sm:$0xff] }
  0x1c   : > { %5360 = vst [vmem:[#allocation3_spill] sm:$0xff] %v3085_v61  ;;  %v3094_v4 = vsel %vm711_vm0, %v238_v45, -inf  ;;  %v2579_v7 = vmax.f32 %v2578_v46, %v3085_v61  ;;  %v3099_v8 = vsel %vm711_vm0, %v239_v50, -inf  ;;  %v3102_v12 = vsel %vm711_vm0, %v240_v51, -inf  ;;  %v248_v18 = vld [vmem:[%s2969_s16 + $0x188] sm:$0xff]  ;;  %v249_v19 = vld [vmem:[%s2969_s16 + $0x190] sm:$0xff] }
  0x1d   : > { %5361 = vst [vmem:[#allocation4_spill] sm:$0xff] %v3094_v4  ;;  %v3105_v13 = vsel %vm711_vm0, %v241_v52, -inf  ;;  %v2642_v20 = vmax.f32 %v2641_v53, %v3094_v4  ;;  %v2202_v24 = vmax.f32 %v2201_v54, %v3099_v8  ;;  %v2265_v25 = vmax.f32 %v2264_v55, %v3102_v12  ;;  %v250_v28 = vld [vmem:[%s2969_s16 + $0x198] sm:$0xff]  ;;  %v251_v34 = vld [vmem:[%s2969_s16 + $0x1a0] sm:$0xff]  ;;  %v252_v38 = vld [vmem:[%s2969_s16 + $0x1a8] sm:$0xff] }
  0x1e   : > { %v3114_v26 = vsel %vm711_vm0, %v242_v57, -inf  ;;  %v2328_v29 = vmax.f32 %v2327_v58, %v3105_v13  ;;  %v3119_v31 = vsel %vm711_vm0, %v243_v62, -inf  ;;  %v3122_v32 = vsel %vm711_vm0, %v244_v63, -inf  ;;  %v253_v39 = vld [vmem:[%s2969_s16 + $0x1b0] sm:$0xff]  ;;  %v254_v45 = vld [vmem:[%s2969_s16 + $0x1b8] sm:$0xff]  ;;  %v255_v53 = vld [vmem:[%s2969_s16 + $0x1c0] sm:$0xff] }
  0x1f   : > { %5362 = vst [vmem:[#allocation5_spill] sm:$0xff] %v3122_v32  ;;  %v3125_v33 = vsel %vm711_vm0, %v245_v0, -inf  ;;  %v2391_v40 = vmax.f32 %v2390_v1, %v3114_v26  ;;  %v2454_v41 = vmax.f32 %v2453_v2, %v3119_v31  ;;  %v2517_v42 = vmax.f32 %v2516_v3, %v3122_v32  ;;  %v256_v54 = vld [vmem:[%s2969_s16 + $0x1c8] sm:$0xff]  ;;  %v257_v55 = vld [vmem:[%s2969_s16 + $0x1d0] sm:$0xff]  ;;  %v258_v0 = vld [vmem:[%s2969_s16 + $0x1d8] sm:$0xff] }
  0x20   : > { %5363 = vst [vmem:[#allocation6_spill] sm:$0xff] %v3125_v33  ;;  %v3134_v43 = vsel %vm711_vm0, %v246_v6, -inf  ;;  %v2580_v46 = vmax.f32 %v2579_v7, %v3125_v33  ;;  %v3139_v50 = vsel %vm711_vm0, %v247_v14, -inf  ;;  %v3142_v51 = vsel %vm711_vm0, %v248_v18, -inf  ;;  %v259_v7 = vld [vmem:[%s2969_s16 + $0x1e0] sm:$0xff]  ;;  %v260_v14 = vld [vmem:[%s2969_s16 + $0x1e8] sm:$0xff] }
  0x21   : > { %5364 = vst [vmem:[#allocation7_spill] sm:$0xff] %v3134_v43  ;;  %v3145_v52 = vsel %vm711_vm0, %v249_v19, -inf  ;;  %v2643_v57 = vmax.f32 %v2642_v20, %v3134_v43  ;;  %v2203_v58 = vmax.f32 %v2202_v24, %v3139_v50  ;;  %v2266_v62 = vmax.f32 %v2265_v25, %v3142_v51  ;;  %v261_v18 = vld [vmem:[%s2969_s16 + $0x1f0] sm:$0xff]  ;;  %v266_v43 = vld [vmem:[%s2969_s16 + $0x218] sm:$0xff]  ;;  %v271_v44 = vld [vmem:[%s2969_s16 + $0x240] sm:$0xff] }
  0x22   : > { %v3154_v63 = vsel %vm711_vm0, %v250_v28, -inf  ;;  %v2329_v1 = vmax.f32 %v2328_v29, %v3145_v52  ;;  %v3159_v2 = vsel %vm711_vm0, %v251_v34, -inf  ;;  %v3162_v3 = vsel %vm711_vm0, %v252_v38, -inf  ;;  %v262_v28 = vld [vmem:[%s2969_s16 + $0x1f8] sm:$0xff] }
  0x23   : > { %5365 = vst [vmem:[#allocation8_spill] sm:$0xff] %v3159_v2  ;;  %5366 = vst [vmem:[#allocation9_spill] sm:$0xff] %v3162_v3  ;;  %v3165_v6 = vsel %vm711_vm0, %v253_v39, -inf  ;;  %v2392_v19 = vmax.f32 %v2391_v40, %v3154_v63  ;;  %v2455_v20 = vmax.f32 %v2454_v41, %v3159_v2  ;;  %v2518_v24 = vmax.f32 %v2517_v42, %v3162_v3  ;;  %v263_v40 = vld [vmem:[%s2969_s16 + $0x200] sm:$0xff]  ;;  %v264_v41 = vld [vmem:[%s2969_s16 + $0x208] sm:$0xff] }
  0x24   : > { %5367 = vst [vmem:[#allocation10_spill] sm:$0xff] %v3165_v6  ;;  %v3174_v25 = vsel %vm711_vm0, %v254_v45, -inf  ;;  %v2581_v29 = vmax.f32 %v2580_v46, %v3165_v6  ;;  %v3179_v34 = vsel %vm711_vm0, %v255_v53, -inf  ;;  %v3182_v38 = vsel %vm711_vm0, %v256_v54, -inf  ;;  %v265_v42 = vld [vmem:[%s2969_s16 + $0x210] sm:$0xff]  ;;  %v270_v33 = vld [vmem:[%s2969_s16 + $0x238] sm:$0xff] }
  0x25   : > { %5368 = vst [vmem:[#allocation11_spill] sm:$0xff] %v3174_v25  ;;  %v3185_v39 = vsel %vm711_vm0, %v257_v55, -inf  ;;  %v2644_v45 = vmax.f32 %v2643_v57, %v3174_v25  ;;  %v2204_v46 = vmax.f32 %v2203_v58, %v3179_v34  ;;  %v2267_v6 = vmax.f32 %v2266_v62, %v3182_v38  ;;  %v267_v58 = vld [vmem:[%s2969_s16 + $0x220] sm:$0xff]  ;;  %v268_v25 = vld [vmem:[%s2969_s16 + $0x228] sm:$0xff]  ;;  %v269_v62 = vld [vmem:[%s2969_s16 + $0x230] sm:$0xff] }
  0x26   : > { %v3194_v53 = vsel %vm711_vm0, %v258_v0, -inf  ;;  %v2330_v54 = vmax.f32 %v2329_v1, %v3185_v39  ;;  %v3199_v55 = vsel %vm711_vm0, %v259_v7, -inf  ;;  %v3202_v4 = vsel %vm711_vm0, %v260_v14, -inf  ;;  %v272_v2 = vld [vmem:[%s2969_s16 + $0x248] sm:$0xff] }
  0x27   : > { %5369 = vst [vmem:[#allocation12_spill] sm:$0xff] %v3199_v55  ;;  %5370 = vst [vmem:[#allocation13_spill] sm:$0xff] %v3202_v4  ;;  %v3205_v57 = vsel %vm711_vm0, %v261_v18, -inf  ;;  %v2393_v0 = vmax.f32 %v2392_v19, %v3194_v53  ;;  %v2456_v1 = vmax.f32 %v2455_v20, %v3199_v55  ;;  %v2519_v3 = vmax.f32 %v2518_v24, %v3202_v4 }
  0x28   : > { %5371 = vst [vmem:[#allocation14_spill] sm:$0xff] %v3205_v57  ;;  %v3214_v7 = vsel %vm711_vm0, %v262_v28, -inf  ;;  %v2582_v14 = vmax.f32 %v2581_v29, %v3205_v57  ;;  %v880_v18 = vsel %vm711_vm0, %v263_v40, -inf  ;;  %v881_v61 = vsel %vm711_vm0, %v264_v41, -inf  ;;  %v199_v29 = vld [vmem:[%s2969_s16] sm:$0xff]  ;;  %v273_v57 = vld [vmem:[%s2969_s16 + $0x250] sm:$0xff] }
  0x29   : > { %5372 = vst [vmem:[#allocation15_spill] sm:$0xff] %v3214_v7  ;;  %v883_v19 = vsel %vm711_vm0, %v265_v42, -inf  ;;  %v2645_v20 = vmax.f32 %v2644_v45, %v3214_v7  ;;  %v3224_v24 = vmax.f32 %v2204_v46, %v880_v18  ;;  %v3226_v28 = vmax.f32 %v2267_v6, %v881_v61  ;;  %v200_v45 = vld [vmem:[%s2969_s16 + $0x8] sm:$0xff]  ;;  %v207_v46 = vld [vmem:[%s2969_s16 + $0x40] sm:$0xff]  ;;  %v274_v6 = vld [vmem:[%s2969_s16 + $0x258] sm:$0xff] }
  0x2a   : > { %v3229_v4 = vsel %vm711_vm0, %v266_v43, -inf  ;;  %v3234_v40 = vsel %vm711_vm0, %v267_v58, -inf  ;;  %v3237_v41 = vsel %vm711_vm0, %v268_v25, -inf  ;;  %v3240_v42 = vsel %vm711_vm0, %v269_v62, -inf  ;;  %v208_v25 = vld [vmem:[%s2969_s16 + $0x48] sm:$0xff] }
  0x2b   : > { %5373 = vst [vmem:[#allocation16_spill] sm:$0xff] %v3224_v24  ;;  %5374 = vst [vmem:[#allocation17_spill] sm:$0xff] %v3226_v28  ;;  %v3245_v7 = vmax.f32 %v2330_v54, %v883_v19  ;;  %v3248_v43 = vmax.f32 %v2393_v0, %v3229_v4  ;;  %v3251_v55 = vmax.f32 %v2456_v1, %v3234_v40  ;;  %v3254_v58 = vsel %vm711_vm0, %v270_v33, -inf  ;;  %v201_v1 = vld [vmem:[%s2969_s16 + $0x10] sm:$0xff] }
  0x2c   : > { %5375 = vst [vmem:[#allocation18_spill] sm:$0xff] %v3234_v40  ;;  %v3258_v62 = vmax.f32 %v2519_v3, %v3237_v41  ;;  %v3261_v32 = vmax.f32 %v2582_v14, %v3240_v42  ;;  %v3264_v54 = vsel %vm711_vm0, %v271_v44, -inf  ;;  %v3267_v0 = vsel %vm711_vm0, %v272_v2, -inf  ;;  %v202_v40 = vld [vmem:[%s2969_s16 + $0x18] sm:$0xff] }
  0x2d   : > { %5376 = vst [vmem:[#allocation19_spill] sm:$0xff] %v3251_v55  ;;  %5377 = vst [vmem:[#allocation20_spill] sm:$0xff] %v3264_v54  ;;  %v209_v55 = vld [vmem:[%s2969_s16 + $0x50] sm:$0xff]  ;;  %v3272_v33 = vmax.f32 %v2645_v20, %v3254_v58  ;;  %v3279_v14 = vsel %vm711_vm0, %v273_v57, -inf  ;;  %v3282_v44 = vsel %vm711_vm0, %v199_v29, -inf  ;;  %v3285_v2 = vsel %vm711_vm0, %v200_v45, -inf }
  0x2e   : > { %5378 = vst [vmem:[#allocation21_spill] sm:$0xff] %v3267_v0  ;;  %5380 = vst [vmem:[#allocation23_spill] sm:$0xff] %v3282_v44  ;;  %v3288_v20 = vsel %vm711_vm0, %v207_v46, -inf  ;;  %v210_v3 = vld [vmem:[%s2969_s16 + $0x58] sm:$0xff]  ;;  %v714_v57 = vmax.f32 %v3282_v44, %v3285_v2  ;;  %v3298_v29 = vsel %vm711_vm0, %v208_v25, -inf  ;;  %v882_v28 = vmax.f32 %v880_v18, %v881_v61  ;;  %v203_v25 = vld [vmem:[%s2969_s16 + $0x20] sm:$0xff] }
  0x2f   : > { %5379 = vst [vmem:[#allocation22_spill] sm:$0xff] %v3272_v33  ;;  %5381 = vst [vmem:[#allocation24_spill] sm:$0xff] %v3285_v2  ;;  %v3291_v33 = vsel %vm711_vm0, %v274_v6, -inf  ;;  %v903_v45 = vmax.f32 %v3264_v54, %v3267_v0  ;;  %v3303_v46 = vsel %vm711_vm0, %v201_v1, -inf  ;;  %v735_v6 = vmax.f32 %v3288_v20, %v3298_v29  ;;  %v211_v61 = vld [vmem:[%s2969_s16 + $0x60] sm:$0xff]  ;;  %v206_v0 = vld [vmem:[%s2969_s16 + $0x38] sm:$0xff] }
  0x30   : > { %5382 = vst [vmem:[#allocation25_spill] sm:$0xff] %v3288_v20  ;;  %5383 = vst [vmem:[#allocation26_spill] sm:$0xff] %v3298_v29  ;;  %v3308_v24 = vsel %vm711_vm0, %v209_v55, -inf  ;;  %v756_v2 = vmax.f32 %v2977_v5, %v2983_v9  ;;  %v716_v18 = vmax.f32 %v714_v57, %v3303_v46  ;;  %v777_v1 = vmax.f32 %v3007_v21, %v3010_v22  ;;  %v204_v20 = vld [vmem:[%s2969_s16 + $0x28] sm:$0xff]  ;;  %v205_v55 = vld [vmem:[%s2969_s16 + $0x30] sm:$0xff] }
  0x31   : > { %5384 = vst [vmem:[#allocation27_spill] sm:$0xff] %v3303_v46  ;;  %5385 = vst [vmem:[#allocation28_spill] sm:$0xff] %v3308_v24  ;;  %v3317_v44 = vmax.f32 %v882_v28, %v883_v19  ;;  %v3320_v29 = vmax.f32 %v903_v45, %v3279_v14  ;;  %v3326_v54 = vsel %vm711_vm0, %v202_v40, -inf  ;;  %v737_v5 = vmax.f32 %v735_v6, %v3308_v24  ;;  %v212_v46 = vld [vmem:[%s2969_s16 + $0x68] sm:$0xff]  ;;  %v213_v21 = vld [vmem:[%s2969_s16 + $0x70] sm:$0xff] }
  0x32   : > { %5386 = vst [vmem:[#allocation29_spill] sm:$0xff] %v3326_v54  ;;  %v3330_v9 = vsel %vm711_vm0, %v210_v3, -inf  ;;  %v758_v57 = vmax.f32 %v756_v2, %v2986_v10  ;;  %v214_v22 = vld [vmem:[%s2969_s16 + $0x78] sm:$0xff]  ;;  %v718_v19 = vmax.f32 %v716_v18, %v3326_v54  ;;  %v779_v28 = vmax.f32 %v777_v1, %v3013_v23 }
  0x33   : > { %5387 = vst [vmem:[#allocation30_spill] sm:$0xff] %v3330_v9  ;;  %v798_v45 = vmax.f32 %v3058_v47, %v3061_v48  ;;  %v819_v40 = vmax.f32 %v3099_v8, %v3102_v12  ;;  %v3343_v6 = vsel %vm711_vm0, %v203_v25, -inf  ;;  %v739_v3 = vmax.f32 %v737_v5, %v3330_v9 }
  0x34   : > { %5388 = vst [vmem:[#allocation31_spill] sm:$0xff] %v3343_v6  ;;  %v3347_v10 = vsel %vm711_vm0, %v211_v61, -inf  ;;  %v760_v2 = vmax.f32 %v758_v57, %v2989_v11  ;;  %v720_v18 = vmax.f32 %v718_v19, %v3343_v6  ;;  %v3352_v23 = vsel %vm711_vm0, %v204_v20, -inf }
  0x35   : > { %5389 = vst [vmem:[#allocation32_spill] sm:$0xff] %v3347_v10  ;;  %5390 = vst [vmem:[#allocation33_spill] sm:$0xff] %v3352_v23  ;;  %v3355_v47 = vsel %vm711_vm0, %v205_v55, -inf  ;;  %v3358_v48 = vsel %vm711_vm0, %v206_v0, -inf  ;;  %v741_v8 = vmax.f32 %v739_v3, %v3347_v10  ;;  %v3362_v12 = vsel %vm711_vm0, %v212_v46, -inf  ;;  %v5396_v3 = vld [vmem:[#allocation5_spill] sm:$0xff] }
  0x36   : > { %5391 = vst [vmem:[#allocation34_spill] sm:$0xff] %v3355_v47  ;;  %5392 = vst [vmem:[#allocation35_spill] sm:$0xff] %v3358_v48  ;;  %v3365_v25 = vsel %vm711_vm0, %v213_v21, -inf  ;;  %v3368_v11 = vsel %vm711_vm0, %v214_v22, -inf  ;;  %v722_v20 = vmax.f32 %v720_v18, %v3352_v23  ;;  %v762_v61 = vmax.f32 %v760_v2, %v2995_v15  ;;  %v5397_v2 = vld [vmem:[#allocation8_spill] sm:$0xff] }
  0x37   : > { %5393 = vst [vmem:[#allocation36_spill] sm:$0xff] %v3362_v12  ;;  %5394 = vst [vmem:[#allocation37_spill] sm:$0xff] %v3365_v25  ;;  %v781_v1 = vmax.f32 %v779_v28, %v3026_v30  ;;  %v800_v0 = vmax.f32 %v798_v45, %v3064_v49  ;;  %v743_v55 = vmax.f32 %v741_v8, %v3362_v12  ;;  %v5398_v18 = vld [vmem:[#allocation12_spill] sm:$0xff] }
  0x38   : > { %5395 = vst [vmem:[#allocation38_spill] sm:$0xff] %v3368_v11  ;;  %v821_v5 = vmax.f32 %v819_v40, %v3105_v13  ;;  %v840_v46 = vmax.f32 %v3139_v50, %v3142_v51  ;;  %v861_v57 = vmax.f32 %v3179_v34, %v3182_v38  ;;  %v724_v21 = vmax.f32 %v722_v20, %v3355_v47 }
  0x39   : > { %v764_v22 = vmax.f32 %v762_v61, %v2998_v16  ;;  %v783_v15 = vmax.f32 %v781_v1, %v3034_v35  ;;  %v802_v30 = vmax.f32 %v800_v0, %v3074_v56  ;;  %v745_v49 = vmax.f32 %v743_v55, %v3365_v25  ;;  %v5399_v61 = vld [vmem:[#allocation2_spill] sm:$0xff]  ;;  %v5400_v1 = vld [vmem:[#allocation3_spill] sm:$0xff] }
  0x3a   : > { %v823_v19 = vmax.f32 %v821_v5, %v3114_v26  ;;  %v842_v13 = vmax.f32 %v840_v46, %v3145_v52  ;;  %v863_v28 = vmax.f32 %v861_v57, %v3185_v39  ;;  %v726_v50 = vmax.f32 %v724_v21, %v3358_v48  ;;  %v5401_v55 = vld [vmem:[#allocation6_spill] sm:$0xff]  ;;  %v5402_v5 = vld [vmem:[#allocation9_spill] sm:$0xff] }
  0x3b   : > { %v766_v51 = vmax.f32 %v764_v22, %v3001_v17  ;;  %v785_v34 = vmax.f32 %v783_v15, %v3037_v36  ;;  %v804_v16 = vmax.f32 %v802_v30, %v3079_v59  ;;  %v747_v35 = vmax.f32 %v745_v49, %v3368_v11  ;;  %v5403_v46 = vld [vmem:[#allocation13_spill] sm:$0xff]  ;;  %v5404_v15 = vld [vmem:[#allocation4_spill] sm:$0xff] }
  0x3c   : > { %v825_v56 = vmax.f32 %v823_v19, %v3119_v31  ;;  %v844_v38 = vmax.f32 %v842_v13, %v3154_v63  ;;  %v865_v26 = vmax.f32 %v863_v28, %v3194_v53  ;;  %v727_v45 = vrot.slane %v726_v50, 4  ;;  %v5405_v19 = vld [vmem:[#allocation7_spill] sm:$0xff]  ;;  %v5406_v28 = vld [vmem:[#allocation10_spill] sm:$0xff]  ;;  %v394_v11 = vld [vmem:[%s2969_s16 + $0x618] sm:$0xff] }
  0x3d   : > { %v768_v52 = vmax.f32 %v766_v51, %v3019_v27  ;;  %v787_v39 = vmax.f32 %v785_v34, %v3040_v37  ;;  %v806_v40 = vmax.f32 %v804_v16, %v3082_v60  ;;  %v748_v17 = vrot.slane %v747_v35, 4  ;;  %v5407_v51 = vld [vmem:[#allocation14_spill] sm:$0xff] }
  0x3e   : > { %v827_v36 = vmax.f32 %v825_v56, %v5396_v3  ;;  %v846_v59 = vmax.f32 %v844_v38, %v5397_v2  ;;  %v867_v8 = vmax.f32 %v865_v26, %v5398_v18  ;;  %v728_v20 = vmax.f32 %v726_v50, %v727_v45 }
  0x3f   : > { %v769_v31 = vrot.slane %v768_v52, 4  ;;  %v789_v63 = vmax.f32 %v787_v39, %v5399_v61  ;;  %v808_v53 = vmax.f32 %v806_v40, %v5400_v1  ;;  %v749_v0 = vmax.f32 %v747_v35, %v748_v17  ;;  %v5408_v39 = vld [vmem:[#allocation11_spill] sm:$0xff] }
  0x40   : > { %v829_v27 = vmax.f32 %v827_v36, %v5401_v55  ;;  %v848_v37 = vmax.f32 %v846_v59, %v5402_v5  ;;  %v869_v60 = vmax.f32 %v867_v8, %v5403_v46  ;;  %v729_v57 = vrot.slane %v728_v20, 2 }
  0x41   : > { %v770_v21 = vmax.f32 %v768_v52, %v769_v31  ;;  %v790_v22 = vrot.slane %v789_v63, 4  ;;  %v810_v30 = vmax.f32 %v808_v53, %v5404_v15  ;;  %v750_v49 = vrot.slane %v749_v0, 2  ;;  %v5409_v52 = vld [vmem:[#allocation15_spill] sm:$0xff] }
  0x42   : > { %v831_v13 = vmax.f32 %v829_v27, %v5405_v19  ;;  %v850_v50 = vmax.f32 %v848_v37, %v5406_v28  ;;  %v871_v34 = vmax.f32 %v869_v60, %v5407_v51  ;;  %v730_v16 = vmax.f32 %v728_v20, %v729_v57 }
  0x43   : > { %v771_v35 = vrot.slane %v770_v21, 2  ;;  %v791_v56 = vmax.f32 %v789_v63, %v790_v22  ;;  %v811_v38 = vrot.slane %v810_v30, 4  ;;  %v751_v26 = vmax.f32 %v749_v0, %v750_v49  ;;  %v275_v0 = vld [vmem:[%s2969_s16 + $0x260] sm:$0xff]  ;;  %v276_v22 = vld [vmem:[%s2969_s16 + $0x268] sm:$0xff] }
  0x44   : > { %v832_v45 = vrot.slane %v831_v13, 4  ;;  %v852_v40 = vmax.f32 %v850_v50, %v5408_v39  ;;  %v873_v17 = vmax.f32 %v871_v34, %v5409_v52  ;;  %v731_v3 = vrot.slane %v730_v16, 1  ;;  %v5410_v50 = vld [vmem:[#allocation18_spill] sm:$0xff]  ;;  %v280_v52 = vld [vmem:[%s2969_s16 + $0x288] sm:$0xff] }
  0x45   : > { %v772_v36 = vmax.f32 %v770_v21, %v771_v35  ;;  %v792_v2 = vrot.slane %v791_v56, 2  ;;  %v812_v59 = vmax.f32 %v810_v30, %v811_v38  ;;  %v2332_v20 = vmax.f32 %v3245_v7, %v3279_v14  ;;  %v278_v35 = vld [vmem:[%s2969_s16 + $0x278] sm:$0xff] }
  0x46   : > { %v833_v18 = vmax.f32 %v831_v13, %v832_v45  ;;  %v853_v8 = vrot.slane %v852_v40, 4  ;;  %v874_v31 = vrot.slane %v873_v17, 4  ;;  %v752_v61 = vrot.slane %v751_v26, 1 }
  0x47   : > { %v793_v63 = vmax.f32 %v791_v56, %v792_v2  ;;  %v813_v1 = vrot.slane %v812_v59, 2  ;;  %v2395_v53 = vmax.f32 %v3248_v43, %v3291_v33  ;;  %v773_v55 = vrot.slane %v772_v36, 1  ;;  %v5411_v2 = vld [vmem:[#allocation19_spill] sm:$0xff] }
  0x48   : > { %v834_v27 = vrot.slane %v833_v18, 2  ;;  %v854_v5 = vmax.f32 %v852_v40, %v853_v8  ;;  %v875_v37 = vmax.f32 %v873_v17, %v874_v31  ;;  %v3418_v46 = vmax.f32 %v730_v16, %v731_v3  ;;  %v277_v16 = vld [vmem:[%s2969_s16 + $0x270] sm:$0xff]  ;;  %v279_v40 = vld [vmem:[%s2969_s16 + $0x280] sm:$0xff] }
  0x49   : > { %v794_v60 = vrot.slane %v793_v63, 1  ;;  %v814_v57 = vmax.f32 %v812_v59, %v813_v1  ;;  %v886_v21 = vmax.f32 %v3317_v44, %v3229_v4  ;;  %v907_v19 = vmax.f32 %v3320_v29, %v3291_v33 }
  0x4a   : > { %v835_v15 = vmax.f32 %v833_v18, %v834_v27  ;;  %v855_v30 = vrot.slane %v854_v5, 2  ;;  %v876_v49 = vrot.slane %v875_v37, 2  ;;  %v3425_v13 = vmax.f32 %v751_v26, %v752_v61  ;;  %v281_v18 = vld [vmem:[%s2969_s16 + $0x290] sm:$0xff] }
  0x4b   : > { %v815_v28 = vrot.slane %v814_v57, 1  ;;  %v888_v51 = vmax.f32 %v886_v21, %v5410_v50  ;;  %v908_v34 = vsel %vm711_vm0, %v275_v0, -inf  ;;  %v3431_v4 = vmax.f32 %v772_v36, %v773_v55 }
  0x4c   : > { %v836_v44 = vrot.slane %v835_v15, 1  ;;  %v856_v56 = vmax.f32 %v854_v5, %v855_v30  ;;  %v877_v38 = vmax.f32 %v875_v37, %v876_v49  ;;  %v3433_v45 = vmax.f32 %v793_v63, %v794_v60  ;;  %v282_v63 = vld [vmem:[%s2969_s16 + $0x298] sm:$0xff]  ;;  %v283_v5 = vld [vmem:[%s2969_s16 + $0x2a0] sm:$0xff]  ;;  %v284_v37 = vld [vmem:[%s2969_s16 + $0x2a8] sm:$0xff] }
  0x4d   : > { %v890_v29 = vmax.f32 %v888_v51, %v3237_v41  ;;  %v909_v26 = vmax.f32 %v907_v19, %v908_v34  ;;  %v910_v39 = vsel %vm711_vm0, %v276_v22, -inf  ;;  %v3439_v17 = vmax.f32 %v814_v57, %v815_v28  ;;  %v285_v28 = vld [vmem:[%s2969_s16 + $0x2b0] sm:$0xff] }
  0x4e   : > { %v857_v3 = vrot.slane %v856_v56, 1  ;;  %v878_v36 = vrot.slane %v877_v38, 1  ;;  %v2458_v59 = vmax.f32 %v5411_v2, %v908_v34  ;;  %v912_v61 = vsel %vm711_vm0, %v277_v16, -inf  ;;  %v5413_v34 = vld [vmem:[#allocation16_spill] sm:$0xff] }
  0x4f   : > { %v892_v8 = vmax.f32 %v890_v29, %v3240_v42  ;;  %v911_v31 = vmax.f32 %v909_v26, %v910_v39  ;;  %v914_v41 = vsel %vm711_vm0, %v278_v35, -inf  ;;  %v3447_v1 = vmax.f32 %v835_v15, %v836_v44  ;;  %v5412_v15 = vld [vmem:[#allocation22_spill] sm:$0xff] }
  0x50   : > { %v3449_v0 = vmax.f32 %v856_v56, %v857_v3  ;;  %v3451_v55 = vmax.f32 %v877_v38, %v878_v36  ;;  %v2521_v27 = vmax.f32 %v3258_v62, %v910_v39  ;;  %v922_v57 = vsel %vm711_vm0, %v279_v40, -inf  ;;  %v286_v62 = vld [vmem:[%s2969_s16 + $0x2b8] sm:$0xff]  ;;  %v287_v56 = vld [vmem:[%s2969_s16 + $0x2c0] sm:$0xff]  ;;  %v288_v3 = vld [vmem:[%s2969_s16 + $0x2c8] sm:$0xff] }
  0x51   : > { %v894_v42 = vmax.f32 %v892_v8, %v3254_v58  ;;  %v913_v60 = vmax.f32 %v911_v31, %v912_v61  ;;  %v923_v21 = vsel %vm711_vm0, %v280_v52, -inf  ;;  %v2584_v22 = vmax.f32 %v3261_v32, %v912_v61  ;;  %v5414_v58 = vld [vmem:[#allocation20_spill] sm:$0xff]  ;;  %v5416_v32 = vld [vmem:[#allocation17_spill] sm:$0xff] }
  0x52   : > { %v2647_v30 = vmax.f32 %v5412_v15, %v914_v41  ;;  %v924_v49 = vmax.f32 %v922_v57, %v923_v21  ;;  %v925_v19 = vsel %vm711_vm0, %v281_v18, -inf  ;;  %v5415_v16 = vmax.f32 %v5413_v34, %v5414_v58  ;;  %v5417_v38 = vld [vmem:[#allocation21_spill] sm:$0xff]  ;;  %v289_v31 = vld [vmem:[%s2969_s16 + $0x2d0] sm:$0xff] }
  0x53   : > { %v895_v50 = vrot.slane %v894_v42, 4  ;;  %v915_v51 = vmax.f32 %v913_v60, %v914_v41  ;;  %v927_v44 = vsel %vm711_vm0, %v282_v63, -inf  ;;  %v5418_v29 = vmax.f32 %v5416_v32, %v5417_v38 }
  0x54   : > { %v3467_v35 = vmax.f32 %v5415_v16, %v922_v57  ;;  %v926_v39 = vmax.f32 %v924_v49, %v925_v19  ;;  %v929_v40 = vsel %vm711_vm0, %v283_v5, -inf  ;;  %v931_v52 = vsel %vm711_vm0, %v284_v37, -inf  ;;  %v290_v37 = vld [vmem:[%s2969_s16 + $0x2d8] sm:$0xff]  ;;  %v292_v57 = vld [vmem:[%s2969_s16 + $0x2e8] sm:$0xff] }
  0x55   : > { %v3474_v26 = vmax.f32 %v5418_v29, %v923_v21  ;;  %v896_v36 = vmax.f32 %v894_v42, %v895_v50  ;;  %v916_v2 = vrot.slane %v915_v51, 4  ;;  %v3482_v18 = vmax.f32 %v2332_v20, %v925_v19  ;;  %v291_v42 = vld [vmem:[%s2969_s16 + $0x2e0] sm:$0xff]  ;;  %v293_v21 = vld [vmem:[%s2969_s16 + $0x2f0] sm:$0xff]  ;;  %v296_v29 = vld [vmem:[%s2969_s16 + $0x308] sm:$0xff] }
  0x56   : > { %v3487_v8 = vmax.f32 %v2395_v53, %v927_v44  ;;  %v928_v61 = vmax.f32 %v926_v39, %v927_v44  ;;  %v3490_v41 = vmax.f32 %v2458_v59, %v929_v40  ;;  %v933_v63 = vsel %vm711_vm0, %v285_v28, -inf  ;;  %v297_v39 = vld [vmem:[%s2969_s16 + $0x310] sm:$0xff] }
  0x57   : > { %v935_v5 = vsel %vm711_vm0, %v286_v62, -inf  ;;  %v897_v7 = vrot.slane %v896_v36, 2  ;;  %v917_v14 = vmax.f32 %v915_v51, %v916_v2  ;;  %v3496_v20 = vmax.f32 %v2521_v27, %v931_v52  ;;  %v295_v51 = vld [vmem:[%s2969_s16 + $0x300] sm:$0xff] }
  0x58   : > { %v943_v43 = vsel %vm711_vm0, %v287_v56, -inf  ;;  %v930_v33 = vmax.f32 %v928_v61, %v929_v40  ;;  %v3499_v53 = vmax.f32 %v2584_v22, %v933_v63  ;;  %v3501_v60 = vmax.f32 %v2647_v30, %v935_v5  ;;  %v294_v30 = vld [vmem:[%s2969_s16 + $0x2f8] sm:$0xff] }
  0x59   : > { %v944_v59 = vsel %vm711_vm0, %v288_v3, -inf  ;;  %v898_v15 = vmax.f32 %v896_v36, %v897_v7  ;;  %v918_v49 = vrot.slane %v917_v14, 2  ;;  %v946_v27 = vsel %vm711_vm0, %v289_v31, -inf  ;;  %v298_v61 = vld [vmem:[%s2969_s16 + $0x318] sm:$0xff] }
  0x5a   : > { %v945_v19 = vmax.f32 %v943_v43, %v944_v59  ;;  %v932_v28 = vmax.f32 %v930_v33, %v931_v52  ;;  %v2208_v62 = vmax.f32 %v3467_v35, %v943_v43  ;;  %v948_v50 = vsel %vm711_vm0, %v290_v37, -inf  ;;  %v300_v37 = vld [vmem:[%s2969_s16 + $0x328] sm:$0xff] }
  0x5b   : > { %v950_v22 = vsel %vm711_vm0, %v291_v42, -inf  ;;  %v899_v34 = vrot.slane %v898_v15, 1  ;;  %v919_v58 = vmax.f32 %v917_v14, %v918_v49  ;;  %v2271_v16 = vmax.f32 %v3474_v26, %v944_v59  ;;  %v301_v59 = vld [vmem:[%s2969_s16 + $0x330] sm:$0xff] }
  0x5c   : > { %v947_v44 = vmax.f32 %v945_v19, %v946_v27  ;;  %v934_v56 = vmax.f32 %v932_v28, %v933_v63  ;;  %v2334_v32 = vmax.f32 %v3482_v18, %v946_v27  ;;  %v952_v38 = vsel %vm711_vm0, %v292_v57, -inf  ;;  %v299_v63 = vld [vmem:[%s2969_s16 + $0x320] sm:$0xff]  ;;  %v302_v57 = vld [vmem:[%s2969_s16 + $0x338] sm:$0xff] }
  0x5d   : > { %v954_v35 = vsel %vm711_vm0, %v293_v21, -inf  ;;  %v920_v40 = vrot.slane %v919_v58, 1  ;;  %v2397_v52 = vmax.f32 %v3487_v8, %v948_v50  ;;  %v2460_v36 = vmax.f32 %v3490_v41, %v950_v22  ;;  %v303_v28 = vld [vmem:[%s2969_s16 + $0x340] sm:$0xff] }
  0x5e   : > { %v949_v3 = vmax.f32 %v947_v44, %v948_v50  ;;  %v3520_v26 = vmax.f32 %v898_v15, %v899_v34  ;;  %v936_v2 = vmax.f32 %v934_v56, %v935_v5  ;;  %v956_v31 = vsel %vm711_vm0, %v294_v30, -inf  ;;  %v304_v50 = vld [vmem:[%s2969_s16 + $0x348] sm:$0xff] }
  0x5f   : > { %v964_v18 = vsel %vm711_vm0, %v295_v51, -inf  ;;  %v3527_v42 = vmax.f32 %v919_v58, %v920_v40  ;;  %v2523_v8 = vmax.f32 %v3496_v20, %v952_v38  ;;  %v2586_v41 = vmax.f32 %v3499_v53, %v954_v35 }
  0x60   : > { %v951_v7 = vmax.f32 %v949_v3, %v950_v22  ;;  %v937_v14 = vrot.slane %v936_v2, 4  ;;  %v2649_v5 = vmax.f32 %v3501_v60, %v956_v31  ;;  %v965_v43 = vsel %vm711_vm0, %v296_v29, -inf  ;;  %v305_v22 = vld [vmem:[%s2969_s16 + $0x350] sm:$0xff] }
  0x61   : > { %v967_v33 = vsel %vm711_vm0, %v297_v39, -inf  ;;  %v3536_v15 = vmax.f32 %v2208_v62, %v964_v18  ;;  %v3538_v49 = vmax.f32 %v2271_v16, %v965_v43  ;;  %v966_v20 = vmax.f32 %v964_v18, %v965_v43  ;;  %v308_v18 = vld [vmem:[%s2969_s16 + $0x368] sm:$0xff] }
  0x62   : > { %v953_v21 = vmax.f32 %v951_v7, %v952_v38  ;;  %v938_v19 = vmax.f32 %v936_v2, %v937_v14  ;;  %v969_v53 = vsel %vm711_vm0, %v298_v61, -inf  ;;  %v971_v27 = vsel %vm711_vm0, %v299_v63, -inf  ;;  %v306_v38 = vld [vmem:[%s2969_s16 + $0x358] sm:$0xff]  ;;  %v309_v7 = vld [vmem:[%s2969_s16 + $0x370] sm:$0xff] }
  0x63   : > { %v973_v60 = vsel %vm711_vm0, %v300_v37, -inf  ;;  %v3546_v51 = vmax.f32 %v2334_v32, %v967_v33  ;;  %v968_v62 = vmax.f32 %v966_v20, %v967_v33  ;;  %v3548_v34 = vmax.f32 %v2397_v52, %v969_v53  ;;  %v307_v32 = vld [vmem:[%s2969_s16 + $0x360] sm:$0xff]  ;;  %v310_v33 = vld [vmem:[%s2969_s16 + $0x378] sm:$0xff] }
  0x64   : > { %v955_v30 = vmax.f32 %v953_v21, %v954_v35  ;;  %v939_v58 = vrot.slane %v938_v19, 2  ;;  %v3550_v16 = vmax.f32 %v2460_v36, %v971_v27  ;;  %v975_v44 = vsel %vm711_vm0, %v301_v59, -inf  ;;  %v311_v59 = vld [vmem:[%s2969_s16 + $0x380] sm:$0xff] }
  0x65   : > { %v977_v56 = vsel %vm711_vm0, %v302_v57, -inf  ;;  %v970_v39 = vmax.f32 %v968_v62, %v969_v53  ;;  %v3555_v40 = vmax.f32 %v2523_v8, %v973_v60  ;;  %v3557_v35 = vmax.f32 %v2586_v41, %v975_v44 }
  0x66   : > { %v957_v29 = vmax.f32 %v955_v30, %v956_v31  ;;  %v940_v52 = vmax.f32 %v938_v19, %v939_v58  ;;  %v985_v3 = vsel %vm711_vm0, %v303_v28, -inf  ;;  %v986_v36 = vsel %vm711_vm0, %v304_v50, -inf  ;;  %v313_v28 = vld [vmem:[%s2969_s16 + $0x390] sm:$0xff]  ;;  %v314_v50 = vld [vmem:[%s2969_s16 + $0x398] sm:$0xff] }
  0x67   : > { %v988_v2 = vsel %vm711_vm0, %v305_v22, -inf  ;;  %v972_v63 = vmax.f32 %v970_v39, %v971_v27  ;;  %v3564_v37 = vmax.f32 %v2649_v5, %v977_v56  ;;  %v2210_v31 = vmax.f32 %v3536_v15, %v985_v3 }
  0x68   : > { %v958_v61 = vrot.slane %v957_v29, 4  ;;  %v941_v8 = vrot.slane %v940_v52, 1  ;;  %v2273_v41 = vmax.f32 %v3538_v49, %v986_v36  ;;  %v987_v14 = vmax.f32 %v985_v3, %v986_v36  ;;  %v312_v49 = vld [vmem:[%s2969_s16 + $0x388] sm:$0xff] }
  0x69   : > { %v990_v43 = vsel %vm711_vm0, %v306_v38, -inf  ;;  %v974_v21 = vmax.f32 %v972_v63, %v973_v60  ;;  %v2336_v20 = vmax.f32 %v3546_v51, %v988_v2  ;;  %v992_v5 = vsel %vm711_vm0, %v307_v32, -inf }
  0x6a   : > { %v959_v57 = vmax.f32 %v957_v29, %v958_v61  ;;  %v3574_v15 = vmax.f32 %v940_v52, %v941_v8  ;;  %v989_v19 = vmax.f32 %v987_v14, %v988_v2  ;;  %v2399_v53 = vmax.f32 %v3548_v34, %v990_v43  ;;  %v315_v29 = vld [vmem:[%s2969_s16 + $0x3a0] sm:$0xff]  ;;  %v316_v2 = vld [vmem:[%s2969_s16 + $0x3a8] sm:$0xff]  ;;  %v318_v61 = vld [vmem:[%s2969_s16 + $0x3b8] sm:$0xff] }
  0x6b   : > { %v994_v27 = vsel %vm711_vm0, %v308_v18, -inf  ;;  %v976_v30 = vmax.f32 %v974_v21, %v975_v44  ;;  %v2462_v60 = vmax.f32 %v3550_v16, %v992_v5  ;;  %v996_v51 = vsel %vm711_vm0, %v309_v7, -inf  ;;  %v317_v18 = vld [vmem:[%s2969_s16 + $0x3b0] sm:$0xff] }
  0x6c   : > { %v960_v22 = vrot.slane %v959_v57, 2  ;;  %v991_v62 = vmax.f32 %v989_v19, %v990_v43  ;;  %v2525_v58 = vmax.f32 %v3555_v40, %v994_v27  ;;  %v998_v38 = vsel %vm711_vm0, %v310_v33, -inf  ;;  %v319_v33 = vld [vmem:[%s2969_s16 + $0x3c0] sm:$0xff] }
  0x6d   : > { %v1006_v34 = vsel %vm711_vm0, %v311_v59, -inf  ;;  %v978_v32 = vmax.f32 %v976_v30, %v977_v56  ;;  %v2588_v52 = vmax.f32 %v3557_v35, %v996_v51  ;;  %v2651_v44 = vmax.f32 %v3564_v37, %v998_v38  ;;  %v320_v59 = vld [vmem:[%s2969_s16 + $0x3c8] sm:$0xff] }
  0x6e   : > { %v961_v39 = vmax.f32 %v959_v57, %v960_v22  ;;  %v993_v16 = vmax.f32 %v991_v62, %v992_v5  ;;  %v1007_v3 = vsel %vm711_vm0, %v312_v49, -inf  ;;  %v1009_v36 = vsel %vm711_vm0, %v313_v28, -inf  ;;  %v322_v28 = vld [vmem:[%s2969_s16 + $0x3d8] sm:$0xff] }
  0x6f   : > { %v1011_v40 = vsel %vm711_vm0, %v314_v50, -inf  ;;  %v979_v7 = vrot.slane %v978_v32, 4  ;;  %v3595_v8 = vmax.f32 %v2210_v31, %v1006_v34  ;;  %v1008_v56 = vmax.f32 %v1006_v34, %v1007_v3 }
  0x70   : > { %v962_v63 = vrot.slane %v961_v39, 1  ;;  %v995_v35 = vmax.f32 %v993_v16, %v994_v27  ;;  %v3597_v37 = vmax.f32 %v2273_v41, %v1007_v3  ;;  %v3599_v14 = vmax.f32 %v2336_v20, %v1009_v36  ;;  %v321_v27 = vld [vmem:[%s2969_s16 + $0x3d0] sm:$0xff] }
  0x71   : > { %v1013_v43 = vsel %vm711_vm0, %v315_v29, -inf  ;;  %v980_v21 = vmax.f32 %v978_v32, %v979_v7  ;;  %v1010_v5 = vmax.f32 %v1008_v56, %v1009_v36  ;;  %v3606_v19 = vmax.f32 %v2399_v53, %v1011_v40  ;;  %v324_v32 = vld [vmem:[%s2969_s16 + $0x3e8] sm:$0xff] }
  0x72   : > { %v3604_v57 = vmax.f32 %v961_v39, %v962_v63  ;;  %v997_v31 = vmax.f32 %v995_v35, %v996_v51  ;;  %v1015_v49 = vsel %vm711_vm0, %v316_v2, -inf  ;;  %v1017_v41 = vsel %vm711_vm0, %v317_v18, -inf  ;;  %v323_v39 = vld [vmem:[%s2969_s16 + $0x3e0] sm:$0xff]  ;;  %v325_v2 = vld [vmem:[%s2969_s16 + $0x3f0] sm:$0xff]  ;;  %v326_v18 = vld [vmem:[%s2969_s16 + $0x3f8] sm:$0xff] }
  0x73   : > { %v1019_v20 = vsel %vm711_vm0, %v318_v61, -inf  ;;  %v981_v50 = vrot.slane %v980_v21, 2  ;;  %v1012_v22 = vmax.f32 %v1010_v5, %v1011_v40  ;;  %v3613_v30 = vmax.f32 %v2462_v60, %v1013_v43 }
  0x74   : > { %v3615_v62 = vmax.f32 %v2525_v58, %v1015_v49  ;;  %v999_v53 = vmax.f32 %v997_v31, %v998_v38  ;;  %v3617_v34 = vmax.f32 %v2588_v52, %v1017_v41  ;;  %v1027_v51 = vsel %vm711_vm0, %v319_v33, -inf }
  0x75   : > { %v1028_v29 = vsel %vm711_vm0, %v320_v59, -inf  ;;  %v982_v16 = vmax.f32 %v980_v21, %v981_v50  ;;  %v1014_v3 = vmax.f32 %v1012_v22, %v1013_v43  ;;  %v3623_v36 = vmax.f32 %v2651_v44, %v1019_v20  ;;  %v327_v44 = vld [vmem:[%s2969_s16 + $0x400] sm:$0xff]  ;;  %v328_v59 = vld [vmem:[%s2969_s16 + $0x408] sm:$0xff]  ;;  %v330_v22 = vld [vmem:[%s2969_s16 + $0x418] sm:$0xff] }
  0x76   : > { %v2212_v60 = vmax.f32 %v3595_v8, %v1027_v51  ;;  %v1000_v58 = vrot.slane %v999_v53, 4  ;;  %v1029_v40 = vmax.f32 %v1027_v51, %v1028_v29  ;;  %v1030_v38 = vsel %vm711_vm0, %v321_v27, -inf }
  0x77   : > { %v1032_v52 = vsel %vm711_vm0, %v322_v28, -inf  ;;  %v983_v61 = vrot.slane %v982_v16, 1  ;;  %v1016_v63 = vmax.f32 %v1014_v3, %v1015_v49  ;;  %v2275_v7 = vmax.f32 %v3597_v37, %v1028_v29  ;;  %v329_v37 = vld [vmem:[%s2969_s16 + $0x410] sm:$0xff]  ;;  %v332_v3 = vld [vmem:[%s2969_s16 + $0x428] sm:$0xff] }
  0x78   : > { %v2338_v56 = vmax.f32 %v3599_v14, %v1030_v38  ;;  %v1001_v35 = vmax.f32 %v999_v53, %v1000_v58  ;;  %v1031_v8 = vmax.f32 %v1029_v40, %v1030_v38  ;;  %v1034_v43 = vsel %vm711_vm0, %v323_v39, -inf }
  0x79   : > { %v1036_v33 = vsel %vm711_vm0, %v324_v32, -inf  ;;  %v3636_v21 = vmax.f32 %v982_v16, %v983_v61  ;;  %v1018_v5 = vmax.f32 %v1016_v63, %v1017_v41  ;;  %v2401_v31 = vmax.f32 %v3606_v19, %v1032_v52  ;;  %v331_v19 = vld [vmem:[%s2969_s16 + $0x420] sm:$0xff]  ;;  %v334_v61 = vld [vmem:[%s2969_s16 + $0x438] sm:$0xff] }
  0x7a   : > { %v2464_v49 = vmax.f32 %v3613_v30, %v1034_v43  ;;  %v1002_v14 = vrot.slane %v1001_v35, 2  ;;  %v1033_v27 = vmax.f32 %v1031_v8, %v1032_v52  ;;  %v1038_v28 = vsel %vm711_vm0, %v325_v2, -inf }
  0x7b   : > { %v1040_v50 = vsel %vm711_vm0, %v326_v18, -inf  ;;  %v1020_v53 = vmax.f32 %v1018_v5, %v1019_v20  ;;  %v2527_v51 = vmax.f32 %v3615_v62, %v1036_v33  ;;  %v2590_v29 = vmax.f32 %v3617_v34, %v1038_v28  ;;  %v333_v34 = vld [vmem:[%s2969_s16 + $0x430] sm:$0xff] }
  0x7c   : > { %v1048_v41 = vsel %vm711_vm0, %v327_v44, -inf  ;;  %v1003_v30 = vmax.f32 %v1001_v35, %v1002_v14  ;;  %v1035_v39 = vmax.f32 %v1033_v27, %v1034_v43  ;;  %v2653_v32 = vmax.f32 %v3623_v36, %v1040_v50  ;;  %v335_v36 = vld [vmem:[%s2969_s16 + $0x440] sm:$0xff]  ;;  %v337_v5 = vld [vmem:[%s2969_s16 + $0x450] sm:$0xff] }
  0x7d   : > { %v1049_v16 = vsel %vm711_vm0, %v328_v59, -inf  ;;  %v1021_v58 = vrot.slane %v1020_v53, 4  ;;  %v3651_v40 = vmax.f32 %v2212_v60, %v1048_v41  ;;  %v1051_v62 = vsel %vm711_vm0, %v329_v37, -inf }
  0x7e   : > { %v1050_v20 = vmax.f32 %v1048_v41, %v1049_v16  ;;  %v1004_v38 = vrot.slane %v1003_v30, 1  ;;  %v1037_v52 = vmax.f32 %v1035_v39, %v1036_v33  ;;  %v3655_v2 = vmax.f32 %v2275_v7, %v1049_v16  ;;  %v336_v33 = vld [vmem:[%s2969_s16 + $0x448] sm:$0xff] }
  0x7f   : > { %v1053_v18 = vsel %vm711_vm0, %v330_v22, -inf  ;;  %v1022_v63 = vmax.f32 %v1020_v53, %v1021_v58  ;;  %v3660_v44 = vmax.f32 %v2338_v56, %v1051_v62  ;;  %v1055_v60 = vsel %vm711_vm0, %v331_v19, -inf  ;;  %v339_v19 = vld [vmem:[%s2969_s16 + $0x460] sm:$0xff] }
  0x80   : > { %v1052_v35 = vmax.f32 %v1050_v20, %v1051_v62  ;;  %v3663_v8 = vmax.f32 %v1003_v30, %v1004_v38  ;;  %v1039_v43 = vmax.f32 %v1037_v52, %v1038_v28  ;;  %v3665_v59 = vmax.f32 %v2401_v31, %v1053_v18  ;;  %v338_v28 = vld [vmem:[%s2969_s16 + $0x458] sm:$0xff]  ;;  %v340_v20 = vld [vmem:[%s2969_s16 + $0x468] sm:$0xff]  ;;  %v341_v62 = vld [vmem:[%s2969_s16 + $0x470] sm:$0xff] }
  0x81   : > { %v1057_v7 = vsel %vm711_vm0, %v332_v3, -inf  ;;  %v1023_v37 = vrot.slane %v1022_v63, 2  ;;  %v3670_v27 = vmax.f32 %v2464_v49, %v1055_v60  ;;  %v1059_v56 = vsel %vm711_vm0, %v333_v34, -inf }
  0x82   : > { %v1054_v14 = vmax.f32 %v1052_v35, %v1053_v18  ;;  %v1041_v22 = vmax.f32 %v1039_v43, %v1040_v50  ;;  %v3673_v53 = vmax.f32 %v2527_v51, %v1057_v7  ;;  %v1061_v41 = vsel %vm711_vm0, %v334_v61, -inf  ;;  %v344_v35 = vld [vmem:[%s2969_s16 + $0x488] sm:$0xff] }
  0x83   : > { %v1069_v31 = vsel %vm711_vm0, %v335_v36, -inf  ;;  %v1024_v30 = vmax.f32 %v1022_v63, %v1023_v37  ;;  %v3679_v16 = vmax.f32 %v2590_v29, %v1059_v56  ;;  %v3681_v49 = vmax.f32 %v2653_v32, %v1061_v41  ;;  %v343_v63 = vld [vmem:[%s2969_s16 + $0x480] sm:$0xff] }
  0x84   : > { %v1056_v39 = vmax.f32 %v1054_v14, %v1055_v60  ;;  %v1042_v3 = vrot.slane %v1041_v22, 4  ;;  %v2214_v50 = vmax.f32 %v3651_v40, %v1069_v31  ;;  %v1070_v51 = vsel %vm711_vm0, %v336_v33, -inf  ;;  %v342_v40 = vld [vmem:[%s2969_s16 + $0x478] sm:$0xff]  ;;  %v345_v14 = vld [vmem:[%s2969_s16 + $0x490] sm:$0xff] }
  0x85   : > { %v1072_v58 = vsel %vm711_vm0, %v337_v5, -inf  ;;  %v1025_v34 = vrot.slane %v1024_v30, 1  ;;  %v2277_v52 = vmax.f32 %v3655_v2, %v1070_v51  ;;  %v1071_v29 = vmax.f32 %v1069_v31, %v1070_v51 }
  0x86   : > { %v1058_v38 = vmax.f32 %v1056_v39, %v1057_v7  ;;  %v1043_v18 = vmax.f32 %v1041_v22, %v1042_v3  ;;  %v2340_v32 = vmax.f32 %v3660_v44, %v1072_v58  ;;  %v1074_v61 = vsel %vm711_vm0, %v338_v28, -inf  ;;  %v347_v3 = vld [vmem:[%s2969_s16 + $0x4a0] sm:$0xff] }
  0x87   : > { %v1076_v36 = vsel %vm711_vm0, %v339_v19, -inf  ;;  %v3695_v60 = vmax.f32 %v1024_v30, %v1025_v34  ;;  %v1073_v33 = vmax.f32 %v1071_v29, %v1072_v58  ;;  %v2403_v2 = vmax.f32 %v3665_v59, %v1074_v61  ;;  %v349_v29 = vld [vmem:[%s2969_s16 + $0x4b0] sm:$0xff] }
  0x88   : > { %v1060_v43 = vmax.f32 %v1058_v38, %v1059_v56  ;;  %v1044_v7 = vrot.slane %v1043_v18, 2  ;;  %v2466_v5 = vmax.f32 %v3670_v27, %v1076_v36  ;;  %v1078_v44 = vsel %vm711_vm0, %v340_v20, -inf  ;;  %v346_v56 = vld [vmem:[%s2969_s16 + $0x498] sm:$0xff] }
  0x89   : > { %v1080_v37 = vsel %vm711_vm0, %v341_v62, -inf  ;;  %v1075_v31 = vmax.f32 %v1073_v33, %v1074_v61  ;;  %v2529_v28 = vmax.f32 %v3673_v53, %v1078_v44  ;;  %v1082_v59 = vsel %vm711_vm0, %v342_v40, -inf  ;;  %v348_v53 = vld [vmem:[%s2969_s16 + $0x4a8] sm:$0xff] }
  0x8a   : > { %v1062_v22 = vmax.f32 %v1060_v43, %v1061_v41  ;;  %v2592_v19 = vmax.f32 %v3679_v16, %v1080_v37  ;;  %v1045_v30 = vmax.f32 %v1043_v18, %v1044_v7  ;;  %v1090_v27 = vsel %vm711_vm0, %v343_v63, -inf  ;;  %v350_v18 = vld [vmem:[%s2969_s16 + $0x4b8] sm:$0xff]  ;;  %v351_v43 = vld [vmem:[%s2969_s16 + $0x4c0] sm:$0xff]  ;;  %v352_v33 = vld [vmem:[%s2969_s16 + $0x4c8] sm:$0xff] }
  0x8b   : > { %v1091_v39 = vsel %vm711_vm0, %v344_v35, -inf  ;;  %v1077_v58 = vmax.f32 %v1075_v31, %v1076_v36  ;;  %v2655_v41 = vmax.f32 %v3681_v49, %v1082_v59  ;;  %v3710_v20 = vmax.f32 %v2214_v50, %v1090_v27  ;;  %v353_v7 = vld [vmem:[%s2969_s16 + $0x4d0] sm:$0xff] }
  0x8c   : > { %v1063_v51 = vrot.slane %v1062_v22, 4  ;;  %v1046_v16 = vrot.slane %v1045_v30, 1  ;;  %v3713_v62 = vmax.f32 %v2277_v52, %v1091_v39  ;;  %v1092_v34 = vmax.f32 %v1090_v27, %v1091_v39  ;;  %v354_v27 = vld [vmem:[%s2969_s16 + $0x4d8] sm:$0xff] }
  0x8d   : > { %v1093_v38 = vsel %vm711_vm0, %v345_v14, -inf  ;;  %v1079_v40 = vmax.f32 %v1077_v58, %v1078_v44  ;;  %v1095_v49 = vsel %vm711_vm0, %v346_v56, -inf  ;;  %v1097_v52 = vsel %vm711_vm0, %v347_v3, -inf }
  0x8e   : > { %v1064_v61 = vmax.f32 %v1062_v22, %v1063_v51  ;;  %v3718_v63 = vmax.f32 %v2340_v32, %v1093_v38  ;;  %v3721_v50 = vmax.f32 %v1045_v30, %v1046_v16  ;;  %v1094_v36 = vmax.f32 %v1092_v34, %v1093_v38  ;;  %v356_v34 = vld [vmem:[%s2969_s16 + $0x4e8] sm:$0xff] }
  0x8f   : > { %v3723_v35 = vmax.f32 %v2403_v2, %v1095_v49  ;;  %v1081_v31 = vmax.f32 %v1079_v40, %v1080_v37  ;;  %v3729_v22 = vmax.f32 %v2466_v5, %v1097_v52  ;;  %v1099_v32 = vsel %vm711_vm0, %v348_v53, -inf  ;;  %v355_v5 = vld [vmem:[%s2969_s16 + $0x4e0] sm:$0xff] }
  0x90   : > { %v1065_v14 = vrot.slane %v1064_v61, 2  ;;  %v1096_v44 = vmax.f32 %v1094_v36, %v1095_v49  ;;  %v3732_v56 = vmax.f32 %v2529_v28, %v1099_v32  ;;  %v1101_v30 = vsel %vm711_vm0, %v349_v29, -inf }
  0x91   : > { %v1103_v2 = vsel %vm711_vm0, %v350_v18, -inf  ;;  %v1083_v3 = vmax.f32 %v1081_v31, %v1082_v59  ;;  %v3737_v51 = vmax.f32 %v2592_v19, %v1101_v30  ;;  %v1111_v53 = vsel %vm711_vm0, %v351_v43, -inf  ;;  %v358_v18 = vld [vmem:[%s2969_s16 + $0x4f8] sm:$0xff] }
  0x92   : > { %v1066_v39 = vmax.f32 %v1064_v61, %v1065_v14  ;;  %v3739_v37 = vmax.f32 %v2655_v41, %v1103_v2  ;;  %v1098_v58 = vmax.f32 %v1096_v44, %v1097_v52  ;;  %v1112_v28 = vsel %vm711_vm0, %v352_v33, -inf  ;;  %v357_v41 = vld [vmem:[%s2969_s16 + $0x4f0] sm:$0xff]  ;;  %v359_v14 = vld [vmem:[%s2969_s16 + $0x500] sm:$0xff] }
  0x93   : > { %v1114_v16 = vsel %vm711_vm0, %v353_v7, -inf  ;;  %v1084_v29 = vrot.slane %v1083_v3, 4  ;;  %v2216_v59 = vmax.f32 %v3710_v20, %v1111_v53  ;;  %v2279_v19 = vmax.f32 %v3713_v62, %v1112_v28  ;;  %v360_v20 = vld [vmem:[%s2969_s16 + $0x508] sm:$0xff]  ;;  %v361_v62 = vld [vmem:[%s2969_s16 + $0x510] sm:$0xff] }
  0x94   : > { %v1067_v38 = vrot.slane %v1066_v39, 1  ;;  %v1100_v61 = vmax.f32 %v1098_v58, %v1099_v32  ;;  %v1113_v40 = vmax.f32 %v1111_v53, %v1112_v28  ;;  %v2342_v49 = vmax.f32 %v3718_v63, %v1114_v16 }
  0x95   : > { %v1116_v36 = vsel %vm711_vm0, %v354_v27, -inf  ;;  %v1085_v43 = vmax.f32 %v1083_v3, %v1084_v29  ;;  %v1118_v7 = vsel %vm711_vm0, %v355_v5, -inf  ;;  %v1120_v63 = vsel %vm711_vm0, %v356_v34, -inf  ;;  %v362_v5 = vld [vmem:[%s2969_s16 + $0x518] sm:$0xff]  ;;  %v364_v29 = vld [vmem:[%s2969_s16 + $0x528] sm:$0xff] }
  0x96   : > { %v3752_v52 = vmax.f32 %v1066_v39, %v1067_v38  ;;  %v2405_v33 = vmax.f32 %v3723_v35, %v1116_v36  ;;  %v1102_v31 = vmax.f32 %v1100_v61, %v1101_v30  ;;  %v1115_v44 = vmax.f32 %v1113_v40, %v1114_v16 }
  0x97   : > { %v2468_v32 = vmax.f32 %v3729_v22, %v1118_v7  ;;  %v1086_v27 = vrot.slane %v1085_v43, 2  ;;  %v2531_v39 = vmax.f32 %v3732_v56, %v1120_v63  ;;  %v1122_v3 = vsel %vm711_vm0, %v357_v41, -inf  ;;  %v363_v22 = vld [vmem:[%s2969_s16 + $0x520] sm:$0xff] }
  0x98   : > { %v1124_v35 = vsel %vm711_vm0, %v358_v18, -inf  ;;  %v1104_v58 = vmax.f32 %v1102_v31, %v1103_v2  ;;  %v1117_v53 = vmax.f32 %v1115_v44, %v1116_v36  ;;  %v2594_v28 = vmax.f32 %v3737_v51, %v1122_v3  ;;  %v365_v51 = vld [vmem:[%s2969_s16 + $0x530] sm:$0xff] }
  0x99   : > { %v2657_v30 = vmax.f32 %v3739_v37, %v1124_v35  ;;  %v1087_v16 = vmax.f32 %v1085_v43, %v1086_v27  ;;  %v1132_v34 = vsel %vm711_vm0, %v359_v14, -inf  ;;  %v1133_v56 = vsel %vm711_vm0, %v360_v20, -inf  ;;  %v366_v14 = vld [vmem:[%s2969_s16 + $0x538] sm:$0xff]  ;;  %v367_v20 = vld [vmem:[%s2969_s16 + $0x540] sm:$0xff] }
  0x9a   : > { %v1135_v38 = vsel %vm711_vm0, %v361_v62, -inf  ;;  %v1105_v41 = vrot.slane %v1104_v58, 4  ;;  %v1119_v18 = vmax.f32 %v1117_v53, %v1118_v7  ;;  %v3772_v61 = vmax.f32 %v2216_v59, %v1132_v34 }
  0x9b   : > { %v3774_v2 = vmax.f32 %v2279_v19, %v1133_v56  ;;  %v1088_v37 = vrot.slane %v1087_v16, 1  ;;  %v1134_v40 = vmax.f32 %v1132_v34, %v1133_v56  ;;  %v3777_v36 = vmax.f32 %v2342_v49, %v1135_v38  ;;  %v368_v49 = vld [vmem:[%s2969_s16 + $0x548] sm:$0xff]  ;;  %v369_v34 = vld [vmem:[%s2969_s16 + $0x550] sm:$0xff]  ;;  %v370_v56 = vld [vmem:[%s2969_s16 + $0x558] sm:$0xff] }
  0x9c   : > { %v1137_v43 = vsel %vm711_vm0, %v362_v5, -inf  ;;  %v1106_v62 = vmax.f32 %v1104_v58, %v1105_v41  ;;  %v1121_v31 = vmax.f32 %v1119_v18, %v1120_v63  ;;  %v1139_v59 = vsel %vm711_vm0, %v363_v22, -inf }
  0x9d   : > { %v3782_v44 = vmax.f32 %v2405_v33, %v1137_v43  ;;  %v3785_v19 = vmax.f32 %v1087_v16, %v1088_v37  ;;  %v1136_v7 = vmax.f32 %v1134_v40, %v1135_v38  ;;  %v3787_v27 = vmax.f32 %v2468_v32, %v1139_v59  ;;  %v371_v38 = vld [vmem:[%s2969_s16 + $0x560] sm:$0xff]  ;;  %v372_v40 = vld [vmem:[%s2969_s16 + $0x568] sm:$0xff] }
  0x9e   : > { %v1141_v53 = vsel %vm711_vm0, %v364_v29, -inf  ;;  %v1107_v5 = vrot.slane %v1106_v62, 2  ;;  %v1123_v48 = vmax.f32 %v1121_v31, %v1122_v3  ;;  %v1143_v33 = vsel %vm711_vm0, %v365_v51, -inf }
  0x9f   : > { %v3793_v58 = vmax.f32 %v2531_v39, %v1141_v53  ;;  %v1138_v63 = vmax.f32 %v1136_v7, %v1137_v43  ;;  %v3796_v22 = vmax.f32 %v2594_v28, %v1143_v33  ;;  %v1145_v32 = vsel %vm711_vm0, %v366_v14, -inf  ;;  %v373_v43 = vld [vmem:[%s2969_s16 + $0x570] sm:$0xff]  ;;  %v374_v14 = vld [vmem:[%s2969_s16 + $0x578] sm:$0xff]  ;;  %v375_v7 = vld [vmem:[%s2969_s16 + $0x580] sm:$0xff] }
  0xa0   : > { %v1153_v16 = vsel %vm711_vm0, %v367_v20, -inf  ;;  %v1108_v29 = vmax.f32 %v1106_v62, %v1107_v5  ;;  %v1125_v41 = vmax.f32 %v1123_v48, %v1124_v35  ;;  %v3801_v18 = vmax.f32 %v2657_v30, %v1145_v32 }
  0xa1   : > { %v2218_v3 = vmax.f32 %v3772_v61, %v1153_v16  ;;  %v1140_v39 = vmax.f32 %v1138_v63, %v1139_v59  ;;  %v1154_v51 = vsel %vm711_vm0, %v368_v49, -inf  ;;  %v1156_v37 = vsel %vm711_vm0, %v369_v34, -inf  ;;  %v376_v49 = vld [vmem:[%s2969_s16 + $0x588] sm:$0xff] }
  0xa2   : > { %v1158_v28 = vsel %vm711_vm0, %v370_v56, -inf  ;;  %v1109_v20 = vrot.slane %v1108_v29, 1  ;;  %v1126_v31 = vrot.slane %v1125_v41, 4  ;;  %v2281_v48 = vmax.f32 %v3774_v2, %v1154_v51 }
  0xa3   : > { %v1155_v35 = vmax.f32 %v1153_v16, %v1154_v51  ;;  %v1142_v30 = vmax.f32 %v1140_v39, %v1141_v53  ;;  %v2344_v61 = vmax.f32 %v3777_v36, %v1156_v37  ;;  %v2407_v62 = vmax.f32 %v3782_v44, %v1158_v28  ;;  %v377_v44 = vld [vmem:[%s2969_s16 + $0x590] sm:$0xff]  ;;  %v378_v39 = vld [vmem:[%s2969_s16 + $0x598] sm:$0xff] }
  0xa4   : > { %v1160_v59 = vsel %vm711_vm0, %v371_v38, -inf  ;;  %v3816_v34 = vmax.f32 %v1108_v29, %v1109_v20  ;;  %v1127_v56 = vmax.f32 %v1125_v41, %v1126_v31  ;;  %v1162_v16 = vsel %vm711_vm0, %v372_v40, -inf }
  0xa5   : > { %v1157_v5 = vmax.f32 %v1155_v35, %v1156_v37  ;;  %v2470_v63 = vmax.f32 %v3787_v27, %v1160_v59  ;;  %v1144_v2 = vmax.f32 %v1142_v30, %v1143_v33  ;;  %v1164_v53 = vsel %vm711_vm0, %v373_v43, -inf  ;;  %v379_v43 = vld [vmem:[%s2969_s16 + $0x5a0] sm:$0xff]  ;;  %v381_v30 = vld [vmem:[%s2969_s16 + $0x5b0] sm:$0xff] }
  0xa6   : > { %v1166_v36 = vsel %vm711_vm0, %v374_v14, -inf  ;;  %v1128_v38 = vrot.slane %v1127_v56, 2  ;;  %v2533_v29 = vmax.f32 %v3793_v58, %v1162_v16  ;;  %v2596_v41 = vmax.f32 %v3796_v22, %v1164_v53  ;;  %v380_v14 = vld [vmem:[%s2969_s16 + $0x5a8] sm:$0xff] }
  0xa7   : > { %v1159_v51 = vmax.f32 %v1157_v5, %v1158_v28  ;;  %v1146_v37 = vmax.f32 %v1144_v2, %v1145_v32  ;;  %v2659_v27 = vmax.f32 %v3801_v18, %v1166_v36  ;;  %v1174_v33 = vsel %vm711_vm0, %v375_v7, -inf  ;;  %v382_v7 = vld [vmem:[%s2969_s16 + $0x5b8] sm:$0xff] }
  0xa8   : > { %v1175_v40 = vsel %vm711_vm0, %v376_v49, -inf  ;;  %v1129_v20 = vmax.f32 %v1127_v56, %v1128_v38  ;;  %v3831_v35 = vmax.f32 %v2218_v3, %v1174_v33  ;;  %v1177_v32 = vsel %vm711_vm0, %v377_v44, -inf  ;;  %v383_v3 = vld [vmem:[%s2969_s16 + $0x5c0] sm:$0xff]  ;;  %v384_v44 = vld [vmem:[%s2969_s16 + $0x5c8] sm:$0xff] }
  0xa9   : > { %v1161_v31 = vmax.f32 %v1159_v51, %v1160_v59  ;;  %v3833_v28 = vmax.f32 %v2281_v48, %v1175_v40  ;;  %v1147_v58 = vrot.slane %v1146_v37, 4  ;;  %v1176_v22 = vmax.f32 %v1174_v33, %v1175_v40 }
  0xaa   : > { %v1179_v18 = vsel %vm711_vm0, %v378_v39, -inf  ;;  %v1130_v49 = vrot.slane %v1129_v20, 1  ;;  %v3839_v2 = vmax.f32 %v2344_v61, %v1177_v32  ;;  %v1181_v38 = vsel %vm711_vm0, %v379_v43, -inf  ;;  %v385_v61 = vld [vmem:[%s2969_s16 + $0x5d0] sm:$0xff]  ;;  %v386_v43 = vld [vmem:[%s2969_s16 + $0x5d8] sm:$0xff] }
  0xab   : > { %v1163_v5 = vmax.f32 %v1161_v31, %v1162_v16  ;;  %v3841_v56 = vmax.f32 %v2407_v62, %v1179_v18  ;;  %v1148_v48 = vmax.f32 %v1146_v37, %v1147_v58  ;;  %v1178_v59 = vmax.f32 %v1176_v22, %v1177_v32 }
  0xac   : > { %v1183_v51 = vsel %vm711_vm0, %v380_v14, -inf  ;;  %v3847_v39 = vmax.f32 %v1129_v20, %v1130_v49  ;;  %v3849_v40 = vmax.f32 %v2470_v63, %v1181_v38  ;;  %v1185_v37 = vsel %vm711_vm0, %v381_v30, -inf  ;;  %v388_v49 = vld [vmem:[%s2969_s16 + $0x5e8] sm:$0xff] }
  0xad   : > { %v1165_v33 = vmax.f32 %v1163_v5, %v1164_v53  ;;  %v3851_v16 = vmax.f32 %v2533_v29, %v1183_v51  ;;  %v1149_v62 = vrot.slane %v1148_v48, 2  ;;  %v1180_v31 = vmax.f32 %v1178_v59, %v1179_v18  ;;  %v387_v53 = vld [vmem:[%s2969_s16 + $0x5e0] sm:$0xff] }
  0xae   : > { %v1187_v58 = vsel %vm711_vm0, %v382_v7, -inf  ;;  %v3857_v22 = vmax.f32 %v2596_v41, %v1185_v37  ;;  %v1195_v63 = vsel %vm711_vm0, %v383_v3, -inf  ;;  %v1196_v30 = vsel %vm711_vm0, %v384_v44, -inf }
  0xaf   : > { %v1167_v14 = vmax.f32 %v1165_v33, %v1166_v36  ;;  %v3859_v20 = vmax.f32 %v2659_v27, %v1187_v58  ;;  %v1150_v29 = vmax.f32 %v1148_v48, %v1149_v62  ;;  %v1182_v32 = vmax.f32 %v1180_v31, %v1181_v38  ;;  %v389_v27 = vld [vmem:[%s2969_s16 + $0x5f0] sm:$0xff]  ;;  %v391_v33 = vld [vmem:[%s2969_s16 + $0x600] sm:$0xff] }
  0xb0   : > { %v2220_v18 = vmax.f32 %v3831_v35, %v1195_v63  ;;  %v2283_v5 = vmax.f32 %v3833_v28, %v1196_v30  ;;  %v1197_v36 = vmax.f32 %v1195_v63, %v1196_v30  ;;  %v1198_v41 = vsel %vm711_vm0, %v385_v61, -inf  ;;  %v390_v35 = vld [vmem:[%s2969_s16 + $0x5f8] sm:$0xff] }
  0xb1   : > { %v1168_v7 = vrot.slane %v1167_v14, 4  ;;  %v1151_v3 = vrot.slane %v1150_v29, 1  ;;  %v1184_v59 = vmax.f32 %v1182_v32, %v1183_v51  ;;  %v2346_v48 = vmax.f32 %v3839_v2, %v1198_v41  ;;  %v392_v32 = vld [vmem:[%s2969_s16 + $0x608] sm:$0xff]  ;;  %v393_v2 = vld [vmem:[%s2969_s16 + $0x610] sm:$0xff] }
  0xb2   : > { %v1200_v38 = vsel %vm711_vm0, %v386_v43, -inf  ;;  %v1199_v62 = vmax.f32 %v1197_v36, %v1198_v41  ;;  %v1202_v28 = vsel %vm711_vm0, %v387_v53, -inf  ;;  %v1204_v51 = vsel %vm711_vm0, %v388_v49, -inf  ;;  %v395_v49 = vld [vmem:[%s2969_s16 + $0x620] sm:$0xff] }
  0xb3   : > { %v1169_v44 = vmax.f32 %v1167_v14, %v1168_v7  ;;  %v2409_v31 = vmax.f32 %v3841_v56, %v1200_v38  ;;  %v3875_v61 = vmax.f32 %v1150_v29, %v1151_v3  ;;  %v1186_v63 = vmax.f32 %v1184_v59, %v1185_v37  ;;  %v396_v59 = vld [vmem:[%s2969_s16 + $0x628] sm:$0xff] }
  0xb4   : > { %v2472_v30 = vmax.f32 %v3849_v40, %v1202_v28  ;;  %v1201_v47 = vmax.f32 %v1199_v62, %v1200_v38  ;;  %v2535_v14 = vmax.f32 %v3851_v16, %v1204_v51  ;;  %v1206_v56 = vsel %vm711_vm0, %v389_v27, -inf  ;;  %v397_v38 = vld [vmem:[%s2969_s16 + $0x630] sm:$0xff] }
  0xb5   : > { %v1170_v43 = vrot.slane %v1169_v44, 2  ;;  %v1188_v53 = vmax.f32 %v1186_v63, %v1187_v58  ;;  %v2598_v29 = vmax.f32 %v3857_v22, %v1206_v56  ;;  %v1208_v37 = vsel %vm711_vm0, %v390_v35, -inf  ;;  %v398_v35 = vld [vmem:[%s2969_s16 + $0x638] sm:$0xff] }
  0xb6   : > { %v1216_v40 = vsel %vm711_vm0, %v391_v33, -inf  ;;  %v1203_v36 = vmax.f32 %v1201_v47, %v1202_v28  ;;  %v2661_v41 = vmax.f32 %v3859_v20, %v1208_v37  ;;  %v1217_v27 = vsel %vm711_vm0, %v392_v32, -inf  ;;  %v399_v32 = vld [vmem:[%s2969_s16 + $0x640] sm:$0xff] }
  0xb7   : > { %v1171_v7 = vmax.f32 %v1169_v44, %v1170_v43  ;;  %v3889_v3 = vmax.f32 %v2220_v18, %v1216_v40  ;;  %v1189_v16 = vrot.slane %v1188_v53, 4  ;;  %v1219_v58 = vsel %vm711_vm0, %v393_v2, -inf  ;;  %v400_v2 = vld [vmem:[%s2969_s16 + $0x648] sm:$0xff] }
  0xb8   : > { %v1221_v22 = vsel %vm711_vm0, %v394_v11, -inf  ;;  %v1205_v62 = vmax.f32 %v1203_v36, %v1204_v51  ;;  %v3897_v44 = vmax.f32 %v2283_v5, %v1217_v27  ;;  %v1218_v47 = vmax.f32 %v1216_v40, %v1217_v27  ;;  %v402_v36 = vld [vmem:[%s2969_s16 + $0x658] sm:$0xff] }
  0xb9   : > { %v1172_v33 = vrot.slane %v1171_v7, 1  ;;  %v1190_v20 = vmax.f32 %v1188_v53, %v1189_v16  ;;  %v3899_v18 = vmax.f32 %v2346_v48, %v1219_v58  ;;  %v3901_v28 = vmax.f32 %v2409_v31, %v1221_v22  ;;  %v401_v53 = vld [vmem:[%s2969_s16 + $0x650] sm:$0xff] }
  0xba   : > { %v1223_v63 = vsel %vm711_vm0, %v395_v49, -inf  ;;  %v1207_v43 = vmax.f32 %v1205_v62, %v1206_v56  ;;  %v1220_v25 = vmax.f32 %v1218_v47, %v1219_v58  ;;  %v1225_v40 = vsel %vm711_vm0, %v396_v59, -inf  ;;  %v405_v47 = vld [vmem:[%s2969_s16 + $0x670] sm:$0xff] }
  0xbb   : > { %v3906_v11 = vmax.f32 %v1171_v7, %v1172_v33  ;;  %v3908_v51 = vmax.f32 %v2472_v30, %v1223_v63  ;;  %v1191_v5 = vrot.slane %v1190_v20, 2  ;;  %v1227_v48 = vsel %vm711_vm0, %v397_v38, -inf  ;;  %v403_v38 = vld [vmem:[%s2969_s16 + $0x660] sm:$0xff] }
  0xbc   : > { %v1229_v31 = vsel %vm711_vm0, %v398_v35, -inf  ;;  %v1209_v49 = vmax.f32 %v1207_v43, %v1208_v37  ;;  %v1222_v16 = vmax.f32 %v1220_v25, %v1221_v22  ;;  %v3915_v27 = vmax.f32 %v2535_v14, %v1225_v40  ;;  %v404_v35 = vld [vmem:[%s2969_s16 + $0x668] sm:$0xff] }
  0xbd   : > { %v3917_v56 = vmax.f32 %v2598_v29, %v1227_v48  ;;  %v1192_v30 = vmax.f32 %v1190_v20, %v1191_v5  ;;  %v3919_v7 = vmax.f32 %v2661_v41, %v1229_v31  ;;  %v1237_v58 = vsel %vm711_vm0, %v399_v32, -inf  ;;  %v406_v20 = vld [vmem:[%s2969_s16 + $0x678] sm:$0xff]  ;;  %v407_v32 = vld [vmem:[%s2969_s16 + $0x680] sm:$0xff] }
  0xbe   : > { %v1238_v59 = vsel %vm711_vm0, %v400_v2, -inf  ;;  %v1210_v33 = vrot.slane %v1209_v49, 4  ;;  %v1224_v62 = vmax.f32 %v1222_v16, %v1223_v63  ;;  %v2222_v25 = vmax.f32 %v3889_v3, %v1237_v58 }
  0xbf   : > { %v2285_v14 = vmax.f32 %v3897_v44, %v1238_v59  ;;  %v1193_v29 = vrot.slane %v1192_v30, 1  ;;  %v1239_v37 = vmax.f32 %v1237_v58, %v1238_v59  ;;  %v1240_v22 = vsel %vm711_vm0, %v401_v53, -inf  ;;  %v408_v58 = vld [vmem:[%s2969_s16 + $0x688] sm:$0xff] }
  0xc0   : > { %v1242_v41 = vsel %vm711_vm0, %v402_v36, -inf  ;;  %v1211_v2 = vmax.f32 %v1209_v49, %v1210_v33  ;;  %v1226_v43 = vmax.f32 %v1224_v62, %v1225_v40  ;;  %v2348_v5 = vmax.f32 %v3899_v18, %v1240_v22  ;;  %v409_v36 = vld [vmem:[%s2969_s16 + $0x690] sm:$0xff]  ;;  %v411_v62 = vld [vmem:[%s2969_s16 + $0x6a0] sm:$0xff] }
  0xc1   : > { %v2411_v3 = vmax.f32 %v3901_v28, %v1242_v41  ;;  %v3934_v44 = vmax.f32 %v1192_v30, %v1193_v29  ;;  %v1241_v63 = vmax.f32 %v1239_v37, %v1240_v22  ;;  %v1244_v16 = vsel %vm711_vm0, %v403_v38, -inf  ;;  %v410_v38 = vld [vmem:[%s2969_s16 + $0x698] sm:$0xff] }
  0xc2   : > { %v1246_v53 = vsel %vm711_vm0, %v404_v35, -inf  ;;  %v1212_v59 = vrot.slane %v1211_v2, 2  ;;  %v1228_v23 = vmax.f32 %v1226_v43, %v1227_v48  ;;  %v2474_v49 = vmax.f32 %v3908_v51, %v1244_v16 }
  0xc3   : > { %v2537_v18 = vmax.f32 %v3915_v27, %v1246_v53  ;;  %v1243_v40 = vmax.f32 %v1241_v63, %v1242_v41  ;;  %v1248_v28 = vsel %vm711_vm0, %v405_v47, -inf  ;;  %v1250_v30 = vsel %vm711_vm0, %v406_v20, -inf  ;;  %v412_v47 = vld [vmem:[%s2969_s16 + $0x6a8] sm:$0xff]  ;;  %v413_v20 = vld [vmem:[%s2969_s16 + $0x6b0] sm:$0xff]  ;;  %v414_v63 = vld [vmem:[%s2969_s16 + $0x6b8] sm:$0xff] }
  0xc4   : > { %v1258_v33 = vsel %vm711_vm0, %v407_v32, -inf  ;;  %v1213_v35 = vmax.f32 %v1211_v2, %v1212_v59  ;;  %v1230_v29 = vmax.f32 %v1228_v23, %v1229_v31  ;;  %v2600_v37 = vmax.f32 %v3917_v56, %v1248_v28 }
  0xc5   : > { %v2663_v51 = vmax.f32 %v3919_v7, %v1250_v30  ;;  %v1245_v48 = vmax.f32 %v1243_v40, %v1244_v16  ;;  %v3949_v27 = vmax.f32 %v2222_v25, %v1258_v33  ;;  %v1259_v22 = vsel %vm711_vm0, %v408_v58, -inf  ;;  %v415_v16 = vld [vmem:[%s2969_s16 + $0x6c0] sm:$0xff]  ;;  %v416_v58 = vld [vmem:[%s2969_s16 + $0x6c8] sm:$0xff] }
  0xc6   : > { %v1261_v41 = vsel %vm711_vm0, %v409_v36, -inf  ;;  %v1214_v32 = vrot.slane %v1213_v35, 1  ;;  %v1231_v43 = vrot.slane %v1230_v29, 4  ;;  %v3955_v2 = vmax.f32 %v2285_v14, %v1259_v22 }
  0xc7   : > { %v1260_v23 = vmax.f32 %v1258_v33, %v1259_v22  ;;  %v1247_v31 = vmax.f32 %v1245_v48, %v1246_v53  ;;  %v3957_v56 = vmax.f32 %v2348_v5, %v1261_v41  ;;  %v1263_v7 = vsel %vm711_vm0, %v410_v38, -inf  ;;  %v417_v38 = vld [vmem:[%s2969_s16 + $0x6d0] sm:$0xff] }
  0xc8   : > { %v1265_v25 = vsel %vm711_vm0, %v411_v62, -inf  ;;  %v3964_v36 = vmax.f32 %v1213_v35, %v1214_v32  ;;  %v1232_v59 = vmax.f32 %v1230_v29, %v1231_v43  ;;  %v3966_v14 = vmax.f32 %v2411_v3, %v1263_v7  ;;  %v418_v29 = vld [vmem:[%s2969_s16 + $0x6d8] sm:$0xff] }
  0xc9   : > { %v1262_v40 = vmax.f32 %v1260_v23, %v1261_v41  ;;  %v1249_v33 = vmax.f32 %v1247_v31, %v1248_v28  ;;  %v3968_v22 = vmax.f32 %v2474_v49, %v1265_v25  ;;  %v1267_v5 = vsel %vm711_vm0, %v412_v47, -inf  ;;  %v419_v47 = vld [vmem:[%s2969_s16 + $0x6e0] sm:$0xff] }
  0xca   : > { %v1269_v53 = vsel %vm711_vm0, %v413_v20, -inf  ;;  %v1233_v62 = vrot.slane %v1232_v59, 2  ;;  %v3973_v12 = vmax.f32 %v2537_v18, %v1267_v5  ;;  %v1271_v3 = vsel %vm711_vm0, %v414_v63, -inf  ;;  %v421_v63 = vld [vmem:[%s2969_s16 + $0x6f0] sm:$0xff] }
  0xcb   : > { %v1264_v48 = vmax.f32 %v1262_v40, %v1263_v7  ;;  %v3975_v35 = vmax.f32 %v2600_v37, %v1269_v53  ;;  %v1251_v41 = vmax.f32 %v1249_v33, %v1250_v30  ;;  %v1279_v49 = vsel %vm711_vm0, %v415_v16, -inf  ;;  %v420_v37 = vld [vmem:[%s2969_s16 + $0x6e8] sm:$0xff]  ;;  %v423_v40 = vld [vmem:[%s2969_s16 + $0x700] sm:$0xff] }
  0xcc   : > { %v1280_v28 = vsel %vm711_vm0, %v416_v58, -inf  ;;  %v1234_v20 = vmax.f32 %v1232_v59, %v1233_v62  ;;  %v3982_v43 = vmax.f32 %v2663_v51, %v1271_v3  ;;  %v2224_v18 = vmax.f32 %v3949_v27, %v1279_v49 }
  0xcd   : > { %v1266_v32 = vmax.f32 %v1264_v48, %v1265_v25  ;;  %v1252_v23 = vrot.slane %v1251_v41, 4  ;;  %v2287_v31 = vmax.f32 %v3955_v2, %v1280_v28  ;;  %v1281_v30 = vmax.f32 %v1279_v49, %v1280_v28  ;;  %v422_v25 = vld [vmem:[%s2969_s16 + $0x6f8] sm:$0xff]  ;;  %v424_v28 = vld [vmem:[%s2969_s16 + $0x708] sm:$0xff] }
  0xce   : > { %v1282_v7 = vsel %vm711_vm0, %v417_v38, -inf  ;;  %v1235_v16 = vrot.slane %v1234_v20, 1  ;;  %v1284_v51 = vsel %vm711_vm0, %v418_v29, -inf  ;;  %v1286_v2 = vsel %vm711_vm0, %v419_v47, -inf }
  0xcf   : > { %v1268_v58 = vmax.f32 %v1266_v32, %v1267_v5  ;;  %v2350_v59 = vmax.f32 %v3957_v56, %v1282_v7  ;;  %v1253_v27 = vmax.f32 %v1251_v41, %v1252_v23  ;;  %v1283_v33 = vmax.f32 %v1281_v30, %v1282_v7  ;;  %v425_v56 = vld [vmem:[%s2969_s16 + $0x710] sm:$0xff]  ;;  %v426_v32 = vld [vmem:[%s2969_s16 + $0x718] sm:$0xff] }
  0xd0   : > { %v2413_v62 = vmax.f32 %v3966_v14, %v1284_v51  ;;  %v3995_v38 = vmax.f32 %v1234_v20, %v1235_v16  ;;  %v2476_v49 = vmax.f32 %v3968_v22, %v1286_v2  ;;  %v1288_v5 = vsel %vm711_vm0, %v420_v37, -inf  ;;  %v427_v37 = vld [vmem:[%s2969_s16 + $0x720] sm:$0xff] }
  0xd1   : > { %v1270_v48 = vmax.f32 %v1268_v58, %v1269_v53  ;;  %v1254_v29 = vrot.slane %v1253_v27, 2  ;;  %v1285_v6 = vmax.f32 %v1283_v33, %v1284_v51  ;;  %v2539_v41 = vmax.f32 %v3973_v12, %v1288_v5  ;;  %v428_v58 = vld [vmem:[%s2969_s16 + $0x728] sm:$0xff]  ;;  %v429_v51 = vld [vmem:[%s2969_s16 + $0x730] sm:$0xff] }
  0xd2   : > { %v1290_v14 = vsel %vm711_vm0, %v421_v63, -inf  ;;  %v1292_v53 = vsel %vm711_vm0, %v422_v25, -inf  ;;  %v1300_v22 = vsel %vm711_vm0, %v423_v40, -inf  ;;  %v1301_v63 = vsel %vm711_vm0, %v424_v28, -inf  ;;  %v430_v25 = vld [vmem:[%s2969_s16 + $0x738] sm:$0xff]  ;;  %v431_v28 = vld [vmem:[%s2969_s16 + $0x740] sm:$0xff] }
  0xd3   : > { %v1272_v47 = vmax.f32 %v1270_v48, %v1271_v3  ;;  %v2602_v20 = vmax.f32 %v3975_v35, %v1290_v14  ;;  %v1255_v23 = vmax.f32 %v1253_v27, %v1254_v29  ;;  %v1287_v30 = vmax.f32 %v1285_v6, %v1286_v2 }
  0xd4   : > { %v2665_v7 = vmax.f32 %v3982_v43, %v1292_v53  ;;  %v4009_v16 = vmax.f32 %v2224_v18, %v1300_v22  ;;  %v1303_v3 = vsel %vm711_vm0, %v425_v56, -inf  ;;  %v1305_v35 = vsel %vm711_vm0, %v426_v32, -inf  ;;  %v432_v56 = vld [vmem:[%s2969_s16 + $0x748] sm:$0xff] }
  0xd5   : > { %v1273_v12 = vrot.slane %v1272_v47, 4  ;;  %v1256_v40 = vrot.slane %v1255_v23, 1  ;;  %v1289_v33 = vmax.f32 %v1287_v30, %v1288_v5  ;;  %v4017_v27 = vmax.f32 %v2287_v31, %v1301_v63  ;;  %v434_v30 = vld [vmem:[%s2969_s16 + $0x758] sm:$0xff] }
  0xd6   : > { %v1302_v6 = vmax.f32 %v1300_v22, %v1301_v63  ;;  %v4019_v18 = vmax.f32 %v2350_v59, %v1303_v3  ;;  %v4021_v2 = vmax.f32 %v2413_v62, %v1305_v35  ;;  %v1307_v48 = vsel %vm711_vm0, %v427_v37, -inf }
  0xd7   : > { %v1274_v43 = vmax.f32 %v1272_v47, %v1273_v12  ;;  %v4026_v32 = vmax.f32 %v1255_v23, %v1256_v40  ;;  %v1291_v29 = vmax.f32 %v1289_v33, %v1290_v14  ;;  %v4028_v5 = vmax.f32 %v2476_v49, %v1307_v48  ;;  %v433_v47 = vld [vmem:[%s2969_s16 + $0x750] sm:$0xff] }
  0xd8   : > { %v1304_v10 = vmax.f32 %v1302_v6, %v1303_v3  ;;  %v1309_v22 = vsel %vm711_vm0, %v428_v58, -inf  ;;  %v1311_v59 = vsel %vm711_vm0, %v429_v51, -inf  ;;  %v1313_v62 = vsel %vm711_vm0, %v430_v25, -inf  ;;  %v435_v51 = vld [vmem:[%s2969_s16 + $0x760] sm:$0xff]  ;;  %v436_v25 = vld [vmem:[%s2969_s16 + $0x768] sm:$0xff]  ;;  %v437_v6 = vld [vmem:[%s2969_s16 + $0x770] sm:$0xff] }
  0xd9   : > { %v1275_v31 = vrot.slane %v1274_v43, 2  ;;  %v1293_v37 = vmax.f32 %v1291_v29, %v1292_v53  ;;  %v4035_v63 = vmax.f32 %v2539_v41, %v1309_v22  ;;  %v4037_v14 = vmax.f32 %v2602_v20, %v1311_v59 }
  0xda   : > { %v1306_v12 = vmax.f32 %v1304_v10, %v1305_v35  ;;  %v4039_v23 = vmax.f32 %v2665_v7, %v1313_v62  ;;  %v1321_v3 = vsel %vm711_vm0, %v431_v28, -inf  ;;  %v1322_v58 = vsel %vm711_vm0, %v432_v56, -inf  ;;  %v439_v28 = vld [vmem:[%s2969_s16 + $0x780] sm:$0xff] }
  0xdb   : > { %v1276_v49 = vmax.f32 %v1274_v43, %v1275_v31  ;;  %v1294_v40 = vrot.slane %v1293_v37, 4  ;;  %v2226_v10 = vmax.f32 %v4009_v16, %v1321_v3  ;;  %v2289_v41 = vmax.f32 %v4017_v27, %v1322_v58  ;;  %v438_v43 = vld [vmem:[%s2969_s16 + $0x778] sm:$0xff] }
  0xdc   : > { %v1308_v33 = vmax.f32 %v1306_v12, %v1307_v48  ;;  %v1323_v53 = vmax.f32 %v1321_v3, %v1322_v58  ;;  %v1324_v35 = vsel %vm711_vm0, %v433_v47, -inf  ;;  %v1326_v7 = vsel %vm711_vm0, %v434_v30, -inf  ;;  %v440_v3 = vld [vmem:[%s2969_s16 + $0x788] sm:$0xff]  ;;  %v441_v30 = vld [vmem:[%s2969_s16 + $0x790] sm:$0xff] }
  0xdd   : > { %v1277_v20 = vrot.slane %v1276_v49, 1  ;;  %v1295_v56 = vmax.f32 %v1293_v37, %v1294_v40  ;;  %v2352_v31 = vmax.f32 %v4019_v18, %v1324_v35  ;;  %v2415_v16 = vmax.f32 %v4021_v2, %v1326_v7 }
  0xde   : > { %v1310_v29 = vmax.f32 %v1308_v33, %v1309_v22  ;;  %v1325_v48 = vmax.f32 %v1323_v53, %v1324_v35  ;;  %v1328_v12 = vsel %vm711_vm0, %v435_v51, -inf  ;;  %v1330_v47 = vsel %vm711_vm0, %v436_v25, -inf  ;;  %v442_v51 = vld [vmem:[%s2969_s16 + $0x798] sm:$0xff]  ;;  %v443_v33 = vld [vmem:[%s2969_s16 + $0x7a0] sm:$0xff] }
  0xdf   : > { %v4054_v27 = vmax.f32 %v1276_v49, %v1277_v20  ;;  %v1296_v58 = vrot.slane %v1295_v56, 2  ;;  %v2478_v37 = vmax.f32 %v4028_v5, %v1328_v12  ;;  %v2541_v18 = vmax.f32 %v4035_v63, %v1330_v47 }
  0xe0   : > { %v1312_v54 = vmax.f32 %v1310_v29, %v1311_v59  ;;  %v1327_v22 = vmax.f32 %v1325_v48, %v1326_v7  ;;  %v1332_v2 = vsel %vm711_vm0, %v437_v6, -inf  ;;  %v1334_v49 = vsel %vm711_vm0, %v438_v43, -inf  ;;  %v444_v6 = vld [vmem:[%s2969_s16 + $0x7a8] sm:$0xff]  ;;  %v445_v43 = vld [vmem:[%s2969_s16 + $0x7b0] sm:$0xff]  ;;  %v446_v48 = vld [vmem:[%s2969_s16 + $0x7b8] sm:$0xff] }
  0xe1   : > { %v1342_v40 = vsel %vm711_vm0, %v439_v28, -inf  ;;  %v1297_v25 = vmax.f32 %v1295_v56, %v1296_v58  ;;  %v2604_v53 = vmax.f32 %v4037_v14, %v1332_v2  ;;  %v2667_v5 = vmax.f32 %v4039_v23, %v1334_v49 }
  0xe2   : > { %v1314_v20 = vmax.f32 %v1312_v54, %v1313_v62  ;;  %v1329_v59 = vmax.f32 %v1327_v22, %v1328_v12  ;;  %v4069_v63 = vmax.f32 %v2226_v10, %v1342_v40  ;;  %v1343_v35 = vsel %vm711_vm0, %v440_v3, -inf  ;;  %v447_v12 = vld [vmem:[%s2969_s16 + $0x7c0] sm:$0xff]  ;;  %v448_v3 = vld [vmem:[%s2969_s16 + $0x7c8] sm:$0xff] }
  0xe3   : > { %v1345_v7 = vsel %vm711_vm0, %v441_v30, -inf  ;;  %v1298_v28 = vrot.slane %v1297_v25, 1  ;;  %v4075_v56 = vmax.f32 %v2289_v41, %v1343_v35  ;;  %v1344_v54 = vmax.f32 %v1342_v40, %v1343_v35 }
  0xe4   : > { %v1315_v29 = vrot.slane %v1314_v20, 4  ;;  %v1331_v62 = vmax.f32 %v1329_v59, %v1330_v47  ;;  %v4077_v14 = vmax.f32 %v2352_v31, %v1345_v7  ;;  %v1347_v23 = vsel %vm711_vm0, %v442_v51, -inf  ;;  %v449_v51 = vld [vmem:[%s2969_s16 + $0x7d0] sm:$0xff] }
  0xe5   : > { %v1349_v10 = vsel %vm711_vm0, %v443_v33, -inf  ;;  %v4084_v30 = vmax.f32 %v1297_v25, %v1298_v28  ;;  %v1346_v22 = vmax.f32 %v1344_v54, %v1345_v7  ;;  %v4086_v41 = vmax.f32 %v2415_v16, %v1347_v23 }
  0xe6   : > { %v1316_v58 = vmax.f32 %v1314_v20, %v1315_v29  ;;  %v1333_v40 = vmax.f32 %v1331_v62, %v1332_v2  ;;  %v4088_v35 = vmax.f32 %v2478_v37, %v1349_v10  ;;  %v1351_v31 = vsel %vm711_vm0, %v444_v6, -inf  ;;  %v450_v20 = vld [vmem:[%s2969_s16 + $0x7d8] sm:$0xff]  ;;  %v451_v6 = vld [vmem:[%s2969_s16 + $0x7e0] sm:$0xff] }
  0xe7   : > { %v1353_v47 = vsel %vm711_vm0, %v445_v43, -inf  ;;  %v1348_v59 = vmax.f32 %v1346_v22, %v1347_v23  ;;  %v4093_v9 = vmax.f32 %v2541_v18, %v1351_v31  ;;  %v1355_v16 = vsel %vm711_vm0, %v446_v48, -inf  ;;  %v453_v48 = vld [vmem:[%s2969_s16 + $0x7f0] sm:$0xff]  ;;  %v455_v22 = vld [vmem:[%s2969_s16 + $0x800] sm:$0xff] }
  0xe8   : > { %v1317_v33 = vrot.slane %v1316_v58, 2  ;;  %v4095_v25 = vmax.f32 %v2604_v53, %v1353_v47  ;;  %v1335_v7 = vmax.f32 %v1333_v40, %v1334_v49  ;;  %v1363_v37 = vsel %vm711_vm0, %v447_v12, -inf  ;;  %v452_v53 = vld [vmem:[%s2969_s16 + $0x7e8] sm:$0xff] }
  0xe9   : > { %v1364_v2 = vsel %vm711_vm0, %v448_v3, -inf  ;;  %v1350_v28 = vmax.f32 %v1348_v59, %v1349_v10  ;;  %v4102_v29 = vmax.f32 %v2667_v5, %v1355_v16  ;;  %v2228_v18 = vmax.f32 %v4069_v63, %v1363_v37  ;;  %v454_v10 = vld [vmem:[%s2969_s16 + $0x7f8] sm:$0xff] }
  0xea   : > { %v1318_v43 = vmax.f32 %v1316_v58, %v1317_v33  ;;  %v1336_v54 = vrot.slane %v1335_v7, 4  ;;  %v2291_v62 = vmax.f32 %v4075_v56, %v1364_v2  ;;  %v1365_v49 = vmax.f32 %v1363_v37, %v1364_v2  ;;  %v456_v2 = vld [vmem:[%s2969_s16 + $0x808] sm:$0xff] }
  0xeb   : > { %v1366_v23 = vsel %vm711_vm0, %v449_v51, -inf  ;;  %v1352_v3 = vmax.f32 %v1350_v28, %v1351_v31  ;;  %v1368_v5 = vsel %vm711_vm0, %v450_v20, -inf  ;;  %v1370_v56 = vsel %vm711_vm0, %v451_v6, -inf  ;;  %v458_v28 = vld [vmem:[%s2969_s16 + $0x818] sm:$0xff] }
  0xec   : > { %v1319_v12 = vrot.slane %v1318_v43, 1  ;;  %v2354_v58 = vmax.f32 %v4077_v14, %v1366_v23  ;;  %v1337_v63 = vmax.f32 %v1335_v7, %v1336_v54  ;;  %v1367_v40 = vmax.f32 %v1365_v49, %v1366_v23  ;;  %v457_v14 = vld [vmem:[%s2969_s16 + $0x810] sm:$0xff] }
  0xed   : > { %v2417_v33 = vmax.f32 %v4086_v41, %v1368_v5  ;;  %v1354_v59 = vmax.f32 %v1352_v3, %v1353_v47  ;;  %v2480_v37 = vmax.f32 %v4088_v35, %v1370_v56  ;;  %v1372_v31 = vsel %vm711_vm0, %v452_v53, -inf  ;;  %v459_v53 = vld [vmem:[%s2969_s16 + $0x820] sm:$0xff]  ;;  %v460_v3 = vld [vmem:[%s2969_s16 + $0x828] sm:$0xff] }
  0xee   : > { %v4115_v51 = vmax.f32 %v1318_v43, %v1319_v12  ;;  %v1338_v20 = vrot.slane %v1337_v63, 2  ;;  %v1369_v24 = vmax.f32 %v1367_v40, %v1368_v5  ;;  %v2543_v7 = vmax.f32 %v4093_v9, %v1372_v31  ;;  %v461_v5 = vld [vmem:[%s2969_s16 + $0x830] sm:$0xff] }
  0xef   : > { %v1374_v41 = vsel %vm711_vm0, %v453_v48, -inf  ;;  %v1356_v6 = vmax.f32 %v1354_v59, %v1355_v16  ;;  %v1376_v47 = vsel %vm711_vm0, %v454_v10, -inf  ;;  %v1384_v35 = vsel %vm711_vm0, %v455_v22, -inf  ;;  %v462_v10 = vld [vmem:[%s2969_s16 + $0x838] sm:$0xff] }
  0xf0   : > { %5419 = vst [vmem:[#allocation5_spill] sm:$0xff] %v4115_v51  ;;  %v2606_v43 = vmax.f32 %v4095_v25, %v1374_v41  ;;  %v1339_v54 = vmax.f32 %v1337_v63, %v1338_v20  ;;  %v1371_v49 = vmax.f32 %v1369_v24, %v1370_v56  ;;  %v2669_v23 = vmax.f32 %v4102_v29, %v1376_v47 }
  0xf1   : > { %v4129_v12 = vmax.f32 %v2228_v18, %v1384_v35  ;;  %v1357_v9 = vrot.slane %v1356_v6, 4  ;;  %v1385_v48 = vsel %vm711_vm0, %v456_v2, -inf  ;;  %v1387_v16 = vsel %vm711_vm0, %v457_v14, -inf  ;;  %v463_v2 = vld [vmem:[%s2969_s16 + $0x840] sm:$0xff]  ;;  %v464_v14 = vld [vmem:[%s2969_s16 + $0x848] sm:$0xff] }
  0xf2   : > { %v1389_v25 = vsel %vm711_vm0, %v458_v28, -inf  ;;  %v1340_v22 = vrot.slane %v1339_v54, 1  ;;  %v1373_v40 = vmax.f32 %v1371_v49, %v1372_v31  ;;  %v4137_v63 = vmax.f32 %v2291_v62, %v1385_v48  ;;  %v466_v49 = vld [vmem:[%s2969_s16 + $0x858] sm:$0xff] }
  0xf3   : > { %v1386_v24 = vmax.f32 %v1384_v35, %v1385_v48  ;;  %v1358_v29 = vmax.f32 %v1356_v6, %v1357_v9  ;;  %v4139_v18 = vmax.f32 %v2354_v58, %v1387_v16  ;;  %v4141_v56 = vmax.f32 %v2417_v33, %v1389_v25  ;;  %v465_v6 = vld [vmem:[%s2969_s16 + $0x850] sm:$0xff] }
  0xf4   : > { %v1391_v59 = vsel %vm711_vm0, %v459_v53, -inf  ;;  %v4146_v28 = vmax.f32 %v1339_v54, %v1340_v22  ;;  %v1375_v20 = vmax.f32 %v1373_v40, %v1374_v41  ;;  %v1393_v35 = vsel %vm711_vm0, %v460_v3, -inf }
  0xf5   : > { %v1388_v51 = vmax.f32 %v1386_v24, %v1387_v16  ;;  %v4148_v31 = vmax.f32 %v2480_v37, %v1391_v59  ;;  %v1359_v62 = vrot.slane %v1358_v29, 2  ;;  %v1395_v58 = vsel %vm711_vm0, %v461_v5, -inf  ;;  %v467_v5 = vld [vmem:[%s2969_s16 + $0x860] sm:$0xff]  ;;  %v469_v24 = vld [vmem:[%s2969_s16 + $0x870] sm:$0xff] }
  0xf6   : > { %5420 = vst [vmem:[#allocation8_spill] sm:$0xff] %v4146_v28  ;;  %v1397_v33 = vsel %vm711_vm0, %v462_v10, -inf  ;;  %v1377_v53 = vmax.f32 %v1375_v20, %v1376_v47  ;;  %v4155_v48 = vmax.f32 %v2543_v7, %v1393_v35  ;;  %v4157_v41 = vmax.f32 %v2606_v43, %v1395_v58  ;;  %v468_v10 = vld [vmem:[%s2969_s16 + $0x868] sm:$0xff] }
  0xf7   : > { %v1390_v9 = vmax.f32 %v1388_v51, %v1389_v25  ;;  %v1360_v37 = vmax.f32 %v1358_v29, %v1359_v62  ;;  %v4159_v54 = vmax.f32 %v2669_v23, %v1397_v33  ;;  %v1405_v16 = vsel %vm711_vm0, %v463_v2, -inf  ;;  %v470_v29 = vld [vmem:[%s2969_s16 + $0x878] sm:$0xff]  ;;  %v471_v2 = vld [vmem:[%s2969_s16 + $0x880] sm:$0xff] }
  0xf8   : > { %v1406_v3 = vsel %vm711_vm0, %v464_v14, -inf  ;;  %v1378_v22 = vrot.slane %v1377_v53, 4  ;;  %v2230_v51 = vmax.f32 %v4129_v12, %v1405_v16  ;;  %v1408_v25 = vsel %vm711_vm0, %v465_v6, -inf }
  0xf9   : > { %v1392_v40 = vmax.f32 %v1390_v9, %v1391_v59  ;;  %v2293_v7 = vmax.f32 %v4137_v63, %v1406_v3  ;;  %v1361_v43 = vrot.slane %v1360_v37, 1  ;;  %v1407_v47 = vmax.f32 %v1405_v16, %v1406_v3  ;;  %v472_v16 = vld [vmem:[%s2969_s16 + $0x888] sm:$0xff] }
  0xfa   : > { %v1410_v23 = vsel %vm711_vm0, %v466_v49, -inf  ;;  %v1379_v14 = vmax.f32 %v1377_v53, %v1378_v22  ;;  %v2356_v62 = vmax.f32 %v4139_v18, %v1408_v25  ;;  %v1412_v9 = vsel %vm711_vm0, %v467_v5, -inf  ;;  %v473_v49 = vld [vmem:[%s2969_s16 + $0x890] sm:$0xff]  ;;  %v474_v5 = vld [vmem:[%s2969_s16 + $0x898] sm:$0xff] }
  0xfb   : > { %v1394_v20 = vmax.f32 %v1392_v40, %v1393_v35  ;;  %v2419_v12 = vmax.f32 %v4141_v56, %v1410_v23  ;;  %v4174_v63 = vmax.f32 %v1360_v37, %v1361_v43  ;;  %v1409_v59 = vmax.f32 %v1407_v47, %v1408_v25  ;;  %v475_v40 = vld [vmem:[%s2969_s16 + $0x8a0] sm:$0xff] }
  0xfc   : > { %v1414_v6 = vsel %vm711_vm0, %v468_v10, -inf  ;;  %v1380_v3 = vrot.slane %v1379_v14, 2  ;;  %v2482_v53 = vmax.f32 %v4148_v31, %v1412_v9  ;;  %v1416_v56 = vsel %vm711_vm0, %v469_v24, -inf  ;;  %v476_v24 = vld [vmem:[%s2969_s16 + $0x8a8] sm:$0xff] }
  0xfd   : > { %5421 = vst [vmem:[#allocation12_spill] sm:$0xff] %v4174_v63  ;;  %v1396_v28 = vmax.f32 %v1394_v20, %v1395_v58  ;;  %v2545_v18 = vmax.f32 %v4155_v48, %v1414_v6  ;;  %v1411_v35 = vmax.f32 %v1409_v59, %v1410_v23  ;;  %v1418_v37 = vsel %vm711_vm0, %v470_v29, -inf  ;;  %v477_v29 = vld [vmem:[%s2969_s16 + $0x8b0] sm:$0xff]  ;;  %v478_v59 = vld [vmem:[%s2969_s16 + $0x8b8] sm:$0xff] }
  0xfe   : > { %v1426_v22 = vsel %vm711_vm0, %v471_v2, -inf  ;;  %v1381_v10 = vmax.f32 %v1379_v14, %v1380_v3  ;;  %v2608_v47 = vmax.f32 %v4157_v41, %v1416_v56  ;;  %v2671_v31 = vmax.f32 %v4159_v54, %v1418_v37 }
  0xff   : > { %v1398_v43 = vmax.f32 %v1396_v28, %v1397_v33  ;;  %v1413_v58 = vmax.f32 %v1411_v35, %v1412_v9  ;;  %v4189_v48 = vmax.f32 %v2230_v51, %v1426_v22  ;;  %v1427_v25 = vsel %vm711_vm0, %v472_v16, -inf  ;;  %v479_v9 = vld [vmem:[%s2969_s16 + $0x8c0] sm:$0xff]  ;;  %v480_v16 = vld [vmem:[%s2969_s16 + $0x8c8] sm:$0xff] }
 0x100   : > { %v1429_v23 = vsel %vm711_vm0, %v473_v49, -inf  ;;  %v1382_v2 = vrot.slane %v1381_v10, 1  ;;  %v4195_v14 = vmax.f32 %v2293_v7, %v1427_v25  ;;  %v1428_v28 = vmax.f32 %v1426_v22, %v1427_v25 }
 0x101   : > { %v1399_v20 = vrot.slane %v1398_v43, 4  ;;  %v1415_v33 = vmax.f32 %v1413_v58, %v1414_v6  ;;  %v4197_v41 = vmax.f32 %v2356_v62, %v1429_v23  ;;  %v1431_v54 = vsel %vm711_vm0, %v474_v5, -inf  ;;  %v481_v5 = vld [vmem:[%s2969_s16 + $0x8d0] sm:$0xff] }
 0x102   : > { %v1433_v51 = vsel %vm711_vm0, %v475_v40, -inf  ;;  %v4204_v49 = vmax.f32 %v1381_v10, %v1382_v2  ;;  %v1430_v35 = vmax.f32 %v1428_v28, %v1429_v23  ;;  %v4206_v7 = vmax.f32 %v2419_v12, %v1431_v54 }
 0x103   : > { %v1400_v3 = vmax.f32 %v1398_v43, %v1399_v20  ;;  %v1417_v22 = vmax.f32 %v1415_v33, %v1416_v56  ;;  %v4208_v25 = vmax.f32 %v2482_v53, %v1433_v51  ;;  %v1435_v62 = vsel %vm711_vm0, %v476_v24, -inf  ;;  %v482_v43 = vld [vmem:[%s2969_s16 + $0x8d8] sm:$0xff]  ;;  %v483_v24 = vld [vmem:[%s2969_s16 + $0x8e0] sm:$0xff] }
 0x104   : > { %5422 = vst [vmem:[#allocation2_spill] sm:$0xff] %v4204_v49  ;;  %v1437_v6 = vsel %vm711_vm0, %v477_v29, -inf  ;;  %v1432_v58 = vmax.f32 %v1430_v35, %v1431_v54  ;;  %v4213_v63 = vmax.f32 %v2545_v18, %v1435_v62  ;;  %v1439_v12 = vsel %vm711_vm0, %v478_v59, -inf  ;;  %v485_v59 = vld [vmem:[%s2969_s16 + $0x8f0] sm:$0xff]  ;;  %v487_v35 = vld [vmem:[%s2969_s16 + $0x900] sm:$0xff] }
 0x105   : > { %v1401_v40 = vrot.slane %v1400_v3, 2  ;;  %v4215_v10 = vmax.f32 %v2608_v47, %v1437_v6  ;;  %v1419_v23 = vmax.f32 %v1417_v22, %v1418_v37  ;;  %v1447_v53 = vsel %vm711_vm0, %v479_v9, -inf  ;;  %v484_v47 = vld [vmem:[%s2969_s16 + $0x8e8] sm:$0xff] }
 0x106   : > { %v1448_v56 = vsel %vm711_vm0, %v480_v16, -inf  ;;  %v1434_v2 = vmax.f32 %v1432_v58, %v1433_v51  ;;  %v4222_v20 = vmax.f32 %v2671_v31, %v1439_v12  ;;  %v2232_v18 = vmax.f32 %v4189_v48, %v1447_v53  ;;  %v486_v51 = vld [vmem:[%s2969_s16 + $0x8f8] sm:$0xff] }
 0x107   : > { %v1402_v29 = vmax.f32 %v1400_v3, %v1401_v40  ;;  %v1420_v28 = vrot.slane %v1419_v23, 4  ;;  %v2295_v33 = vmax.f32 %v4195_v14, %v1448_v56  ;;  %v1449_v37 = vmax.f32 %v1447_v53, %v1448_v56  ;;  %v488_v56 = vld [vmem:[%s2969_s16 + $0x908] sm:$0xff] }
 0x108   : > { %v1450_v54 = vsel %vm711_vm0, %v481_v5, -inf  ;;  %v1436_v16 = vmax.f32 %v1434_v2, %v1435_v62  ;;  %v1452_v31 = vsel %vm711_vm0, %v482_v43, -inf  ;;  %v1454_v14 = vsel %vm711_vm0, %v483_v24, -inf  ;;  %v490_v2 = vld [vmem:[%s2969_s16 + $0x918] sm:$0xff] }
 0x109   : > { %v1403_v9 = vrot.slane %v1402_v29, 1  ;;  %v2358_v3 = vmax.f32 %v4197_v41, %v1450_v54  ;;  %v1421_v48 = vmax.f32 %v1419_v23, %v1420_v28  ;;  %v1451_v22 = vmax.f32 %v1449_v37, %v1450_v54  ;;  %v489_v41 = vld [vmem:[%s2969_s16 + $0x910] sm:$0xff] }
 0x10a   : > { %v2421_v40 = vmax.f32 %v4206_v7, %v1452_v31  ;;  %v1438_v58 = vmax.f32 %v1436_v16, %v1437_v6  ;;  %v2484_v53 = vmax.f32 %v4208_v25, %v1454_v14  ;;  %v1456_v62 = vsel %vm711_vm0, %v484_v47, -inf  ;;  %v491_v47 = vld [vmem:[%s2969_s16 + $0x920] sm:$0xff]  ;;  %v492_v16 = vld [vmem:[%s2969_s16 + $0x928] sm:$0xff] }
 0x10b   : > { %v4235_v5 = vmax.f32 %v1402_v29, %v1403_v9  ;;  %v1422_v43 = vrot.slane %v1421_v48, 2  ;;  %v1453_v49 = vmax.f32 %v1451_v22, %v1452_v31  ;;  %v2547_v23 = vmax.f32 %v4213_v63, %v1456_v62  ;;  %v493_v31 = vld [vmem:[%s2969_s16 + $0x930] sm:$0xff] }
 0x10c   : > { %v1458_v7 = vsel %vm711_vm0, %v485_v59, -inf  ;;  %v1440_v24 = vmax.f32 %v1438_v58, %v1439_v12  ;;  %v1460_v6 = vsel %vm711_vm0, %v486_v51, -inf  ;;  %v1468_v25 = vsel %vm711_vm0, %v487_v35, -inf  ;;  %v494_v51 = vld [vmem:[%s2969_s16 + $0x938] sm:$0xff] }
 0x10d   : > { %5423 = vst [vmem:[#allocation3_spill] sm:$0xff] %v4235_v5  ;;  %v2610_v29 = vmax.f32 %v4215_v10, %v1458_v7  ;;  %v1423_v28 = vmax.f32 %v1421_v48, %v1422_v43  ;;  %v1455_v37 = vmax.f32 %v1453_v49, %v1454_v14  ;;  %v2673_v54 = vmax.f32 %v4222_v20, %v1460_v6 }
 0x10e   : > { %v4249_v9 = vmax.f32 %v2232_v18, %v1468_v25  ;;  %v1441_v63 = vrot.slane %v1440_v24, 4  ;;  %v1469_v59 = vsel %vm711_vm0, %v488_v56, -inf  ;;  %v1471_v12 = vsel %vm711_vm0, %v489_v41, -inf  ;;  %v495_v56 = vld [vmem:[%s2969_s16 + $0x940] sm:$0xff]  ;;  %v496_v41 = vld [vmem:[%s2969_s16 + $0x948] sm:$0xff] }
 0x10f   : > { %v1473_v10 = vsel %vm711_vm0, %v490_v2, -inf  ;;  %v1424_v35 = vrot.slane %v1423_v28, 1  ;;  %v1457_v22 = vmax.f32 %v1455_v37, %v1456_v62  ;;  %v4257_v48 = vmax.f32 %v2295_v33, %v1469_v59  ;;  %v498_v37 = vld [vmem:[%s2969_s16 + $0x958] sm:$0xff] }
 0x110   : > { %v1470_v49 = vmax.f32 %v1468_v25, %v1469_v59  ;;  %v1442_v20 = vmax.f32 %v1440_v24, %v1441_v63  ;;  %v4259_v18 = vmax.f32 %v2358_v3, %v1471_v12  ;;  %v4261_v14 = vmax.f32 %v2421_v40, %v1473_v10  ;;  %v497_v24 = vld [vmem:[%s2969_s16 + $0x950] sm:$0xff] }
 0x111   : > { %v1475_v58 = vsel %vm711_vm0, %v491_v47, -inf  ;;  %v4266_v2 = vmax.f32 %v1423_v28, %v1424_v35  ;;  %v1459_v43 = vmax.f32 %v1457_v22, %v1458_v7  ;;  %v1477_v25 = vsel %vm711_vm0, %v492_v16, -inf }
 0x112   : > { %v1472_v5 = vmax.f32 %v1470_v49, %v1471_v12  ;;  %v4268_v62 = vmax.f32 %v2484_v53, %v1475_v58  ;;  %v1443_v33 = vrot.slane %v1442_v20, 2  ;;  %v1479_v3 = vsel %vm711_vm0, %v493_v31, -inf  ;;  %v499_v31 = vld [vmem:[%s2969_s16 + $0x960] sm:$0xff]  ;;  %v501_v49 = vld [vmem:[%s2969_s16 + $0x970] sm:$0xff] }
 0x113   : > { %5424 = vst [vmem:[#allocation6_spill] sm:$0xff] %v4266_v2  ;;  %v1481_v40 = vsel %vm711_vm0, %v494_v51, -inf  ;;  %v1461_v47 = vmax.f32 %v1459_v43, %v1460_v6  ;;  %v4275_v59 = vmax.f32 %v2547_v23, %v1477_v25  ;;  %v4277_v7 = vmax.f32 %v2610_v29, %v1479_v3  ;;  %v500_v51 = vld [vmem:[%s2969_s16 + $0x968] sm:$0xff] }
 0x114   : > { %v1474_v63 = vmax.f32 %v1472_v5, %v1473_v10  ;;  %v1444_v53 = vmax.f32 %v1442_v20, %v1443_v33  ;;  %v4279_v28 = vmax.f32 %v2673_v54, %v1481_v40  ;;  %v1489_v12 = vsel %vm711_vm0, %v495_v56, -inf  ;;  %v502_v20 = vld [vmem:[%s2969_s16 + $0x978] sm:$0xff]  ;;  %v503_v56 = vld [vmem:[%s2969_s16 + $0x980] sm:$0xff] }
 0x115   : > { %v1490_v16 = vsel %vm711_vm0, %v496_v41, -inf  ;;  %v1462_v35 = vrot.slane %v1461_v47, 4  ;;  %v2234_v5 = vmax.f32 %v4249_v9, %v1489_v12  ;;  %v1492_v10 = vsel %vm711_vm0, %v497_v24, -inf }
 0x116   : > { %v1476_v22 = vmax.f32 %v1474_v63, %v1475_v58  ;;  %v2297_v23 = vmax.f32 %v4257_v48, %v1490_v16  ;;  %v1445_v29 = vrot.slane %v1444_v53, 1  ;;  %v1491_v6 = vmax.f32 %v1489_v12, %v1490_v16  ;;  %v504_v12 = vld [vmem:[%s2969_s16 + $0x988] sm:$0xff] }
 0x117   : > { %v1494_v54 = vsel %vm711_vm0, %v498_v37, -inf  ;;  %v1463_v41 = vmax.f32 %v1461_v47, %v1462_v35  ;;  %v2360_v33 = vmax.f32 %v4259_v18, %v1492_v10  ;;  %v1496_v63 = vsel %vm711_vm0, %v499_v31, -inf  ;;  %v505_v37 = vld [vmem:[%s2969_s16 + $0x990] sm:$0xff]  ;;  %v506_v31 = vld [vmem:[%s2969_s16 + $0x998] sm:$0xff] }
 0x118   : > { %v1478_v43 = vmax.f32 %v1476_v22, %v1477_v25  ;;  %v2423_v9 = vmax.f32 %v4261_v14, %v1494_v54  ;;  %v4294_v48 = vmax.f32 %v1444_v53, %v1445_v29  ;;  %v1493_v58 = vmax.f32 %v1491_v6, %v1492_v10  ;;  %v507_v22 = vld [vmem:[%s2969_s16 + $0x9a0] sm:$0xff] }
 0x119   : > { %v1498_v24 = vsel %vm711_vm0, %v500_v51, -inf  ;;  %v1464_v16 = vrot.slane %v1463_v41, 2  ;;  %v2486_v47 = vmax.f32 %v4268_v62, %v1496_v63  ;;  %v1500_v14 = vsel %vm711_vm0, %v501_v49, -inf  ;;  %v508_v49 = vld [vmem:[%s2969_s16 + $0x9a8] sm:$0xff] }
 0x11a   : > { %5425 = vst [vmem:[#allocation9_spill] sm:$0xff] %v4294_v48  ;;  %v1480_v2 = vmax.f32 %v1478_v43, %v1479_v3  ;;  %v2549_v18 = vmax.f32 %v4275_v59, %v1498_v24  ;;  %v1495_v25 = vmax.f32 %v1493_v58, %v1494_v54  ;;  %v1502_v53 = vsel %vm711_vm0, %v502_v20, -inf  ;;  %v509_v20 = vld [vmem:[%s2969_s16 + $0x9b0] sm:$0xff]  ;;  %v510_v58 = vld [vmem:[%s2969_s16 + $0x9b8] sm:$0xff] }
 0x11b   : > { %v1510_v35 = vsel %vm711_vm0, %v503_v56, -inf  ;;  %v1465_v51 = vmax.f32 %v1463_v41, %v1464_v16  ;;  %v2612_v6 = vmax.f32 %v4277_v7, %v1500_v14  ;;  %v2675_v62 = vmax.f32 %v4279_v28, %v1502_v53 }
 0x11c   : > { %v1482_v29 = vmax.f32 %v1480_v2, %v1481_v40  ;;  %v1497_v3 = vmax.f32 %v1495_v25, %v1496_v63  ;;  %v4309_v59 = vmax.f32 %v2234_v5, %v1510_v35  ;;  %v1511_v10 = vsel %vm711_vm0, %v504_v12, -inf  ;;  %v511_v63 = vld [vmem:[%s2969_s16 + $0x9c0] sm:$0xff]  ;;  %v512_v12 = vld [vmem:[%s2969_s16 + $0x9c8] sm:$0xff] }
 0x11d   : > { %v1513_v54 = vsel %vm711_vm0, %v505_v37, -inf  ;;  %v1466_v56 = vrot.slane %v1465_v51, 1  ;;  %v4315_v41 = vmax.f32 %v2297_v23, %v1511_v10  ;;  %v1512_v2 = vmax.f32 %v1510_v35, %v1511_v10 }
 0x11e   : > { %v1483_v43 = vrot.slane %v1482_v29, 4  ;;  %v1499_v40 = vmax.f32 %v1497_v3, %v1498_v24  ;;  %v4317_v7 = vmax.f32 %v2360_v33, %v1513_v54  ;;  %v1515_v28 = vsel %vm711_vm0, %v506_v31, -inf  ;;  %v513_v31 = vld [vmem:[%s2969_s16 + $0x9d0] sm:$0xff] }
 0x11f   : > { %v1517_v5 = vsel %vm711_vm0, %v507_v22, -inf  ;;  %v4324_v37 = vmax.f32 %v1465_v51, %v1466_v56  ;;  %v1514_v25 = vmax.f32 %v1512_v2, %v1513_v54  ;;  %v4326_v23 = vmax.f32 %v2423_v9, %v1515_v28 }
 0x120   : > { %v1484_v16 = vmax.f32 %v1482_v29, %v1483_v43  ;;  %v1501_v35 = vmax.f32 %v1499_v40, %v1500_v14  ;;  %v4328_v10 = vmax.f32 %v2486_v47, %v1517_v5  ;;  %v1519_v33 = vsel %vm711_vm0, %v508_v49, -inf  ;;  %v514_v29 = vld [vmem:[%s2969_s16 + $0x9d8] sm:$0xff]  ;;  %v515_v49 = vld [vmem:[%s2969_s16 + $0x9e0] sm:$0xff] }
 0x121   : > { %5426 = vst [vmem:[#allocation13_spill] sm:$0xff] %v4324_v37  ;;  %v1521_v24 = vsel %vm711_vm0, %v509_v20, -inf  ;;  %v1516_v3 = vmax.f32 %v1514_v25, %v1515_v28  ;;  %v4333_v48 = vmax.f32 %v2549_v18, %v1519_v33  ;;  %v1523_v9 = vsel %vm711_vm0, %v510_v58, -inf  ;;  %v517_v58 = vld [vmem:[%s2969_s16 + $0x9f0] sm:$0xff]  ;;  %v519_v25 = vld [vmem:[%s2969_s16 + $0xa00] sm:$0xff] }
 0x122   : > { %v1485_v22 = vrot.slane %v1484_v16, 2  ;;  %v4335_v51 = vmax.f32 %v2612_v6, %v1521_v24  ;;  %v1503_v54 = vmax.f32 %v1501_v35, %v1502_v53  ;;  %v1531_v47 = vsel %vm711_vm0, %v511_v63, -inf  ;;  %v516_v6 = vld [vmem:[%s2969_s16 + $0x9e8] sm:$0xff] }
 0x123   : > { %v1532_v14 = vsel %vm711_vm0, %v512_v12, -inf  ;;  %v1518_v56 = vmax.f32 %v1516_v3, %v1517_v5  ;;  %v4342_v43 = vmax.f32 %v2675_v62, %v1523_v9  ;;  %v2236_v18 = vmax.f32 %v4309_v59, %v1531_v47  ;;  %v518_v5 = vld [vmem:[%s2969_s16 + $0x9f8] sm:$0xff] }
 0x124   : > { %v1486_v20 = vmax.f32 %v1484_v16, %v1485_v22  ;;  %v1504_v2 = vrot.slane %v1503_v54, 4  ;;  %v2299_v40 = vmax.f32 %v4315_v41, %v1532_v14  ;;  %v1533_v53 = vmax.f32 %v1531_v47, %v1532_v14  ;;  %v520_v14 = vld [vmem:[%s2969_s16 + $0xa08] sm:$0xff] }
 0x125   : > { %v1534_v28 = vsel %vm711_vm0, %v513_v31, -inf  ;;  %v1520_v12 = vmax.f32 %v1518_v56, %v1519_v33  ;;  %v1536_v62 = vsel %vm711_vm0, %v514_v29, -inf  ;;  %v1538_v41 = vsel %vm711_vm0, %v515_v49, -inf  ;;  %v522_v56 = vld [vmem:[%s2969_s16 + $0xa18] sm:$0xff] }
 0x126   : > { %v1487_v63 = vrot.slane %v1486_v20, 1  ;;  %v2362_v16 = vmax.f32 %v4317_v7, %v1534_v28  ;;  %v1505_v59 = vmax.f32 %v1503_v54, %v1504_v2  ;;  %v1535_v35 = vmax.f32 %v1533_v53, %v1534_v28  ;;  %v521_v7 = vld [vmem:[%s2969_s16 + $0xa10] sm:$0xff] }
 0x127   : > { %v2425_v22 = vmax.f32 %v4326_v23, %v1536_v62  ;;  %v1522_v3 = vmax.f32 %v1520_v12, %v1521_v24  ;;  %v2488_v47 = vmax.f32 %v4328_v10, %v1538_v41  ;;  %v1540_v33 = vsel %vm711_vm0, %v516_v6, -inf  ;;  %v523_v6 = vld [vmem:[%s2969_s16 + $0xa20] sm:$0xff]  ;;  %v524_v12 = vld [vmem:[%s2969_s16 + $0xa28] sm:$0xff] }
 0x128   : > { %v4355_v31 = vmax.f32 %v1486_v20, %v1487_v63  ;;  %v1506_v29 = vrot.slane %v1505_v59, 2  ;;  %v1537_v37 = vmax.f32 %v1535_v35, %v1536_v62  ;;  %v2551_v54 = vmax.f32 %v4333_v48, %v1540_v33  ;;  %v525_v62 = vld [vmem:[%s2969_s16 + $0xa30] sm:$0xff] }
 0x129   : > { %v1542_v23 = vsel %vm711_vm0, %v517_v58, -inf  ;;  %v1524_v49 = vmax.f32 %v1522_v3, %v1523_v9  ;;  %v1544_v24 = vsel %vm711_vm0, %v518_v5, -inf  ;;  %v1552_v10 = vsel %vm711_vm0, %v519_v25, -inf  ;;  %v526_v5 = vld [vmem:[%s2969_s16 + $0xa38] sm:$0xff] }
 0x12a   : > { %5427 = vst [vmem:[#allocation4_spill] sm:$0xff] %v4355_v31  ;;  %v2614_v20 = vmax.f32 %v4335_v51, %v1542_v23  ;;  %v1507_v2 = vmax.f32 %v1505_v59, %v1506_v29  ;;  %v1539_v53 = vmax.f32 %v1537_v37, %v1538_v41  ;;  %v2677_v28 = vmax.f32 %v4342_v43, %v1544_v24 }
 0x12b   : > { %v4369_v63 = vmax.f32 %v2236_v18, %v1552_v10  ;;  %v1525_v48 = vrot.slane %v1524_v49, 4  ;;  %v1553_v58 = vsel %vm711_vm0, %v520_v14, -inf  ;;  %v1555_v9 = vsel %vm711_vm0, %v521_v7, -inf  ;;  %v527_v14 = vld [vmem:[%s2969_s16 + $0xa40] sm:$0xff]  ;;  %v528_v7 = vld [vmem:[%s2969_s16 + $0xa48] sm:$0xff] }
 0x12c   : > { %v1557_v51 = vsel %vm711_vm0, %v522_v56, -inf  ;;  %v1508_v25 = vrot.slane %v1507_v2, 1  ;;  %v1541_v35 = vmax.f32 %v1539_v53, %v1540_v33  ;;  %v4377_v59 = vmax.f32 %v2299_v40, %v1553_v58  ;;  %v530_v53 = vld [vmem:[%s2969_s16 + $0xa58] sm:$0xff] }
 0x12d   : > { %v1554_v37 = vmax.f32 %v1552_v10, %v1553_v58  ;;  %v1526_v43 = vmax.f32 %v1524_v49, %v1525_v48  ;;  %v4379_v18 = vmax.f32 %v2362_v16, %v1555_v9  ;;  %v4381_v41 = vmax.f32 %v2425_v22, %v1557_v51  ;;  %v529_v49 = vld [vmem:[%s2969_s16 + $0xa50] sm:$0xff] }
 0x12e   : > { %v1559_v3 = vsel %vm711_vm0, %v523_v6, -inf  ;;  %v4386_v56 = vmax.f32 %v1507_v2, %v1508_v25  ;;  %v1543_v29 = vmax.f32 %v1541_v35, %v1542_v23  ;;  %v1561_v10 = vsel %vm711_vm0, %v524_v12, -inf }
 0x12f   : > { %v1556_v31 = vmax.f32 %v1554_v37, %v1555_v9  ;;  %v4388_v33 = vmax.f32 %v2488_v47, %v1559_v3  ;;  %v1527_v40 = vrot.slane %v1526_v43, 2  ;;  %v1563_v16 = vsel %vm711_vm0, %v525_v62, -inf  ;;  %v531_v62 = vld [vmem:[%s2969_s16 + $0xa60] sm:$0xff]  ;;  %v533_v37 = vld [vmem:[%s2969_s16 + $0xa70] sm:$0xff] }
 0x130   : > { %5428 = vst [vmem:[#allocation7_spill] sm:$0xff] %v4386_v56  ;;  %v1565_v22 = vsel %vm711_vm0, %v526_v5, -inf  ;;  %v1545_v6 = vmax.f32 %v1543_v29, %v1544_v24  ;;  %v4395_v58 = vmax.f32 %v2551_v54, %v1561_v10  ;;  %v4397_v23 = vmax.f32 %v2614_v20, %v1563_v16  ;;  %v532_v5 = vld [vmem:[%s2969_s16 + $0xa68] sm:$0xff] }
 0x131   : > { %v1558_v48 = vmax.f32 %v1556_v31, %v1557_v51  ;;  %v1528_v47 = vmax.f32 %v1526_v43, %v1527_v40  ;;  %v4399_v2 = vmax.f32 %v2677_v28, %v1565_v22  ;;  %v1573_v9 = vsel %vm711_vm0, %v527_v14, -inf  ;;  %v534_v43 = vld [vmem:[%s2969_s16 + $0xa78] sm:$0xff]  ;;  %v535_v14 = vld [vmem:[%s2969_s16 + $0xa80] sm:$0xff] }
 0x132   : > { %v1574_v12 = vsel %vm711_vm0, %v528_v7, -inf  ;;  %v1546_v25 = vrot.slane %v1545_v6, 4  ;;  %v2238_v31 = vmax.f32 %v4369_v63, %v1573_v9  ;;  %v1576_v51 = vsel %vm711_vm0, %v529_v49, -inf }
 0x133   : > { %v1560_v35 = vmax.f32 %v1558_v48, %v1559_v3  ;;  %v2301_v54 = vmax.f32 %v4377_v59, %v1574_v12  ;;  %v1529_v20 = vrot.slane %v1528_v47, 1  ;;  %v1575_v24 = vmax.f32 %v1573_v9, %v1574_v12  ;;  %v536_v9 = vld [vmem:[%s2969_s16 + $0xa88] sm:$0xff] }
 0x134   : > { %v1578_v28 = vsel %vm711_vm0, %v530_v53, -inf  ;;  %v1547_v7 = vmax.f32 %v1545_v6, %v1546_v25  ;;  %v2364_v40 = vmax.f32 %v4379_v18, %v1576_v51  ;;  %v1580_v48 = vsel %vm711_vm0, %v531_v62, -inf  ;;  %v537_v53 = vld [vmem:[%s2969_s16 + $0xa90] sm:$0xff]  ;;  %v538_v62 = vld [vmem:[%s2969_s16 + $0xa98] sm:$0xff] }
 0x135   : > { %v1562_v29 = vmax.f32 %v1560_v35, %v1561_v10  ;;  %v2427_v63 = vmax.f32 %v4381_v41, %v1578_v28  ;;  %v4414_v59 = vmax.f32 %v1528_v47, %v1529_v20  ;;  %v1577_v3 = vmax.f32 %v1575_v24, %v1576_v51  ;;  %v539_v35 = vld [vmem:[%s2969_s16 + $0xaa0] sm:$0xff] }
 0x136   : > { %v1582_v49 = vsel %vm711_vm0, %v532_v5, -inf  ;;  %v1548_v12 = vrot.slane %v1547_v7, 2  ;;  %v2490_v6 = vmax.f32 %v4388_v33, %v1580_v48  ;;  %v1584_v41 = vsel %vm711_vm0, %v533_v37, -inf  ;;  %v540_v37 = vld [vmem:[%s2969_s16 + $0xaa8] sm:$0xff] }
 0x137   : > { %5429 = vst [vmem:[#allocation10_spill] sm:$0xff] %v4414_v59  ;;  %v1564_v56 = vmax.f32 %v1562_v29, %v1563_v16  ;;  %v2553_v18 = vmax.f32 %v4395_v58, %v1582_v49  ;;  %v1579_v10 = vmax.f32 %v1577_v3, %v1578_v28  ;;  %v1586_v47 = vsel %vm711_vm0, %v534_v43, -inf  ;;  %v541_v43 = vld [vmem:[%s2969_s16 + $0xab0] sm:$0xff]  ;;  %v542_v3 = vld [vmem:[%s2969_s16 + $0xab8] sm:$0xff] }
 0x138   : > { %v1594_v25 = vsel %vm711_vm0, %v535_v14, -inf  ;;  %v1549_v5 = vmax.f32 %v1547_v7, %v1548_v12  ;;  %v2616_v24 = vmax.f32 %v4397_v23, %v1584_v41  ;;  %v2679_v33 = vmax.f32 %v4399_v2, %v1586_v47 }
 0x139   : > { %v1566_v20 = vmax.f32 %v1564_v56, %v1565_v22  ;;  %v1581_v16 = vmax.f32 %v1579_v10, %v1580_v48  ;;  %v4429_v58 = vmax.f32 %v2238_v31, %v1594_v25  ;;  %v1595_v51 = vsel %vm711_vm0, %v536_v9, -inf  ;;  %v543_v48 = vld [vmem:[%s2969_s16 + $0xac0] sm:$0xff]  ;;  %v544_v9 = vld [vmem:[%s2969_s16 + $0xac8] sm:$0xff] }
 0x13a   : > { %v1597_v28 = vsel %vm711_vm0, %v537_v53, -inf  ;;  %v1550_v14 = vrot.slane %v1549_v5, 1  ;;  %v4435_v7 = vmax.f32 %v2301_v54, %v1595_v51  ;;  %v1596_v56 = vmax.f32 %v1594_v25, %v1595_v51 }
 0x13b   : > { %v1567_v29 = vrot.slane %v1566_v20, 4  ;;  %v1583_v22 = vmax.f32 %v1581_v16, %v1582_v49  ;;  %v4437_v23 = vmax.f32 %v2364_v40, %v1597_v28  ;;  %v1599_v2 = vsel %vm711_vm0, %v538_v62, -inf  ;;  %v545_v62 = vld [vmem:[%s2969_s16 + $0xad0] sm:$0xff] }
 0x13c   : > { %v1601_v31 = vsel %vm711_vm0, %v539_v35, -inf  ;;  %v4444_v53 = vmax.f32 %v1549_v5, %v1550_v14  ;;  %v1598_v10 = vmax.f32 %v1596_v56, %v1597_v28  ;;  %v4446_v54 = vmax.f32 %v2427_v63, %v1599_v2 }
 0x13d   : > { %v1568_v12 = vmax.f32 %v1566_v20, %v1567_v29  ;;  %v1585_v25 = vmax.f32 %v1583_v22, %v1584_v41  ;;  %v4448_v51 = vmax.f32 %v2490_v6, %v1601_v31  ;;  %v1603_v40 = vsel %vm711_vm0, %v540_v37, -inf  ;;  %v546_v20 = vld [vmem:[%s2969_s16 + $0xad8] sm:$0xff]  ;;  %v547_v37 = vld [vmem:[%s2969_s16 + $0xae0] sm:$0xff] }
 0x13e   : > { %5430 = vst [vmem:[#allocation14_spill] sm:$0xff] %v4444_v53  ;;  %v1605_v49 = vsel %vm711_vm0, %v541_v43, -inf  ;;  %v1600_v16 = vmax.f32 %v1598_v10, %v1599_v2  ;;  %v4453_v59 = vmax.f32 %v2553_v18, %v1603_v40  ;;  %v1607_v63 = vsel %vm711_vm0, %v542_v3, -inf  ;;  %v549_v3 = vld [vmem:[%s2969_s16 + $0xaf0] sm:$0xff]  ;;  %v551_v10 = vld [vmem:[%s2969_s16 + $0xb00] sm:$0xff] }
 0x13f   : > { %v1569_v35 = vrot.slane %v1568_v12, 2  ;;  %v4455_v5 = vmax.f32 %v2616_v24, %v1605_v49  ;;  %v1587_v28 = vmax.f32 %v1585_v25, %v1586_v47  ;;  %v1615_v6 = vsel %vm711_vm0, %v543_v48, -inf  ;;  %v548_v24 = vld [vmem:[%s2969_s16 + $0xae8] sm:$0xff] }
 0x140   : > { %v1616_v41 = vsel %vm711_vm0, %v544_v9, -inf  ;;  %v1602_v14 = vmax.f32 %v1600_v16, %v1601_v31  ;;  %v4462_v29 = vmax.f32 %v2679_v33, %v1607_v63  ;;  %v2240_v18 = vmax.f32 %v4429_v58, %v1615_v6  ;;  %v550_v31 = vld [vmem:[%s2969_s16 + $0xaf8] sm:$0xff] }
 0x141   : > { %v1570_v43 = vmax.f32 %v1568_v12, %v1569_v35  ;;  %v1588_v56 = vrot.slane %v1587_v28, 4  ;;  %v2303_v22 = vmax.f32 %v4435_v7, %v1616_v41  ;;  %v1617_v47 = vmax.f32 %v1615_v6, %v1616_v41  ;;  %v552_v41 = vld [vmem:[%s2969_s16 + $0xb08] sm:$0xff] }
 0x142   : > { %v1618_v2 = vsel %vm711_vm0, %v545_v62, -inf  ;;  %v1604_v9 = vmax.f32 %v1602_v14, %v1603_v40  ;;  %v1620_v33 = vsel %vm711_vm0, %v546_v20, -inf  ;;  %v1622_v7 = vsel %vm711_vm0, %v547_v37, -inf  ;;  %v554_v14 = vld [vmem:[%s2969_s16 + $0xb18] sm:$0xff] }
 0x143   : > { %v1571_v48 = vrot.slane %v1570_v43, 1  ;;  %v2366_v12 = vmax.f32 %v4437_v23, %v1618_v2  ;;  %v1589_v58 = vmax.f32 %v1587_v28, %v1588_v56  ;;  %v1619_v25 = vmax.f32 %v1617_v47, %v1618_v2  ;;  %v553_v23 = vld [vmem:[%s2969_s16 + $0xb10] sm:$0xff] }
 0x144   : > { %v2429_v35 = vmax.f32 %v4446_v54, %v1620_v33  ;;  %v1606_v16 = vmax.f32 %v1604_v9, %v1605_v49  ;;  %v2492_v6 = vmax.f32 %v4448_v51, %v1622_v7  ;;  %v1624_v40 = vsel %vm711_vm0, %v548_v24, -inf  ;;  %v555_v24 = vld [vmem:[%s2969_s16 + $0xb20] sm:$0xff]  ;;  %v556_v9 = vld [vmem:[%s2969_s16 + $0xb28] sm:$0xff] }
 0x145   : > { %v4475_v62 = vmax.f32 %v1570_v43, %v1571_v48  ;;  %v1590_v20 = vrot.slane %v1589_v58, 2  ;;  %v1621_v53 = vmax.f32 %v1619_v25, %v1620_v33  ;;  %v2555_v28 = vmax.f32 %v4453_v59, %v1624_v40  ;;  %v557_v33 = vld [vmem:[%s2969_s16 + $0xb30] sm:$0xff] }
 0x146   : > { %v1626_v54 = vsel %vm711_vm0, %v549_v3, -inf  ;;  %v1608_v37 = vmax.f32 %v1606_v16, %v1607_v63  ;;  %v1628_v49 = vsel %vm711_vm0, %v550_v31, -inf  ;;  %v1636_v51 = vsel %vm711_vm0, %v551_v10, -inf  ;;  %v558_v31 = vld [vmem:[%s2969_s16 + $0xb38] sm:$0xff] }
 0x147   : > { %5431 = vst [vmem:[#allocation11_spill] sm:$0xff] %v4475_v62  ;;  %v2618_v43 = vmax.f32 %v4455_v5, %v1626_v54  ;;  %v1591_v56 = vmax.f32 %v1589_v58, %v1590_v20  ;;  %v1623_v47 = vmax.f32 %v1621_v53, %v1622_v7  ;;  %v2681_v2 = vmax.f32 %v4462_v29, %v1628_v49 }
 0x148   : > { %v4489_v48 = vmax.f32 %v2240_v18, %v1636_v51  ;;  %v1609_v59 = vrot.slane %v1608_v37, 4  ;;  %v1637_v3 = vsel %vm711_vm0, %v552_v41, -inf  ;;  %v1639_v63 = vsel %vm711_vm0, %v553_v23, -inf  ;;  %v559_v41 = vld [vmem:[%s2969_s16 + $0xb40] sm:$0xff]  ;;  %v560_v23 = vld [vmem:[%s2969_s16 + $0xb48] sm:$0xff] }
 0x149   : > { %v1641_v5 = vsel %vm711_vm0, %v554_v14, -inf  ;;  %v1592_v10 = vrot.slane %v1591_v56, 1  ;;  %v1625_v25 = vmax.f32 %v1623_v47, %v1624_v40  ;;  %v4497_v58 = vmax.f32 %v2303_v22, %v1637_v3  ;;  %v562_v47 = vld [vmem:[%s2969_s16 + $0xb58] sm:$0xff] }
 0x14a   : > { %v1638_v53 = vmax.f32 %v1636_v51, %v1637_v3  ;;  %v1610_v29 = vmax.f32 %v1608_v37, %v1609_v59  ;;  %v4499_v18 = vmax.f32 %v2366_v12, %v1639_v63  ;;  %v4501_v7 = vmax.f32 %v2429_v35, %v1641_v5  ;;  %v561_v37 = vld [vmem:[%s2969_s16 + $0xb50] sm:$0xff] }
 0x14b   : > { %v1643_v16 = vsel %vm711_vm0, %v555_v24, -inf  ;;  %v4506_v14 = vmax.f32 %v1591_v56, %v1592_v10  ;;  %v1627_v20 = vmax.f32 %v1625_v25, %v1626_v54  ;;  %v1645_v51 = vsel %vm711_vm0, %v556_v9, -inf }
 0x14c   : > { %v1640_v62 = vmax.f32 %v1638_v53, %v1639_v63  ;;  %v4508_v40 = vmax.f32 %v2492_v6, %v1643_v16  ;;  %v1611_v22 = vrot.slane %v1610_v29, 2  ;;  %v1647_v12 = vsel %vm711_vm0, %v557_v33, -inf  ;;  %v563_v33 = vld [vmem:[%s2969_s16 + $0xb60] sm:$0xff]  ;;  %v565_v53 = vld [vmem:[%s2969_s16 + $0xb70] sm:$0xff] }
 0x14d   : > { %5432 = vst [vmem:[#allocation15_spill] sm:$0xff] %v4506_v14  ;;  %v1649_v35 = vsel %vm711_vm0, %v558_v31, -inf  ;;  %v1629_v24 = vmax.f32 %v1627_v20, %v1628_v49  ;;  %v4515_v3 = vmax.f32 %v2555_v28, %v1645_v51  ;;  %v4517_v54 = vmax.f32 %v2618_v43, %v1647_v12  ;;  %v564_v31 = vld [vmem:[%s2969_s16 + $0xb68] sm:$0xff] }
 0x14e   : > { %v1642_v59 = vmax.f32 %v1640_v62, %v1641_v5  ;;  %v1612_v6 = vmax.f32 %v1610_v29, %v1611_v22  ;;  %v4519_v56 = vmax.f32 %v2681_v2, %v1649_v35  ;;  %v1657_v63 = vsel %vm711_vm0, %v559_v41, -inf  ;;  %v566_v29 = vld [vmem:[%s2969_s16 + $0xb78] sm:$0xff]  ;;  %v567_v41 = vld [vmem:[%s2969_s16 + $0xb80] sm:$0xff] }
 0x14f   : > { %v1658_v9 = vsel %vm711_vm0, %v560_v23, -inf  ;;  %v1630_v10 = vrot.slane %v1629_v24, 4  ;;  %v2242_v62 = vmax.f32 %v4489_v48, %v1657_v63  ;;  %v1660_v5 = vsel %vm711_vm0, %v561_v37, -inf }
 0x150   : > { %v1644_v25 = vmax.f32 %v1642_v59, %v1643_v16  ;;  %v2305_v28 = vmax.f32 %v4497_v58, %v1658_v9  ;;  %v1613_v43 = vrot.slane %v1612_v6, 1  ;;  %v1659_v49 = vmax.f32 %v1657_v63, %v1658_v9  ;;  %v568_v63 = vld [vmem:[%s2969_s16 + $0xb88] sm:$0xff] }
 0x151   : > { %v1662_v2 = vsel %vm711_vm0, %v562_v47, -inf  ;;  %v1631_v23 = vmax.f32 %v1629_v24, %v1630_v10  ;;  %v2368_v22 = vmax.f32 %v4499_v18, %v1660_v5  ;;  %v1664_v59 = vsel %vm711_vm0, %v563_v33, -inf  ;;  %v569_v47 = vld [vmem:[%s2969_s16 + $0xb90] sm:$0xff]  ;;  %v570_v33 = vld [vmem:[%s2969_s16 + $0xb98] sm:$0xff] }
 0x152   : > { %v1646_v20 = vmax.f32 %v1644_v25, %v1645_v51  ;;  %v2431_v48 = vmax.f32 %v4501_v7, %v1662_v2  ;;  %v4534_v58 = vmax.f32 %v1612_v6, %v1613_v43  ;;  %v1661_v16 = vmax.f32 %v1659_v49, %v1660_v5  ;;  %v571_v25 = vld [vmem:[%s2969_s16 + $0xba0] sm:$0xff] }
 0x153   : > { %v1666_v37 = vsel %vm711_vm0, %v564_v31, -inf  ;;  %v1632_v9 = vrot.slane %v1631_v23, 2  ;;  %v2494_v24 = vmax.f32 %v4508_v40, %v1664_v59  ;;  %v1668_v7 = vsel %vm711_vm0, %v565_v53, -inf  ;;  %v572_v53 = vld [vmem:[%s2969_s16 + $0xba8] sm:$0xff] }
 0x154   : > { %5433 = vst [vmem:[#allocation18_spill] sm:$0xff] %v4534_v58  ;;  %v1648_v14 = vmax.f32 %v1646_v20, %v1647_v12  ;;  %v2557_v18 = vmax.f32 %v4515_v3, %v1666_v37  ;;  %v1663_v51 = vmax.f32 %v1661_v16, %v1662_v2  ;;  %v1670_v6 = vsel %vm711_vm0, %v566_v29, -inf  ;;  %v573_v29 = vld [vmem:[%s2969_s16 + $0xbb0] sm:$0xff]  ;;  %v574_v16 = vld [vmem:[%s2969_s16 + $0xbb8] sm:$0xff] }
 0x155   : > { %v1678_v10 = vsel %vm711_vm0, %v567_v41, -inf  ;;  %v1633_v31 = vmax.f32 %v1631_v23, %v1632_v9  ;;  %v2620_v49 = vmax.f32 %v4517_v54, %v1668_v7  ;;  %v2683_v40 = vmax.f32 %v4519_v56, %v1670_v6 }
 0x156   : > { %v1650_v43 = vmax.f32 %v1648_v14, %v1649_v35  ;;  %v1665_v12 = vmax.f32 %v1663_v51, %v1664_v59  ;;  %v4549_v3 = vmax.f32 %v2242_v62, %v1678_v10  ;;  %v1679_v5 = vsel %vm711_vm0, %v568_v63, -inf  ;;  %v575_v59 = vld [vmem:[%s2969_s16 + $0xbc0] sm:$0xff]  ;;  %v576_v63 = vld [vmem:[%s2969_s16 + $0xbc8] sm:$0xff] }
 0x157   : > { %v1681_v2 = vsel %vm711_vm0, %v569_v47, -inf  ;;  %v1634_v41 = vrot.slane %v1633_v31, 1  ;;  %v4555_v23 = vmax.f32 %v2305_v28, %v1679_v5  ;;  %v1680_v14 = vmax.f32 %v1678_v10, %v1679_v5 }
 0x158   : > { %v1651_v20 = vrot.slane %v1650_v43, 4  ;;  %v1667_v35 = vmax.f32 %v1665_v12, %v1666_v37  ;;  %v4557_v54 = vmax.f32 %v2368_v22, %v1681_v2  ;;  %v1683_v56 = vsel %vm711_vm0, %v570_v33, -inf  ;;  %v577_v33 = vld [vmem:[%s2969_s16 + $0xbd0] sm:$0xff] }
 0x159   : > { %v1685_v62 = vsel %vm711_vm0, %v571_v25, -inf  ;;  %v4564_v47 = vmax.f32 %v1633_v31, %v1634_v41  ;;  %v1682_v51 = vmax.f32 %v1680_v14, %v1681_v2  ;;  %v4566_v28 = vmax.f32 %v2431_v48, %v1683_v56 }
 0x15a   : > { %v1652_v9 = vmax.f32 %v1650_v43, %v1651_v20  ;;  %v1669_v10 = vmax.f32 %v1667_v35, %v1668_v7  ;;  %v4568_v5 = vmax.f32 %v2494_v24, %v1685_v62  ;;  %v1687_v22 = vsel %vm711_vm0, %v572_v53, -inf  ;;  %v578_v43 = vld [vmem:[%s2969_s16 + $0xbd8] sm:$0xff]  ;;  %v579_v53 = vld [vmem:[%s2969_s16 + $0xbe0] sm:$0xff] }
 0x15b   : > { %5434 = vst [vmem:[#allocation19_spill] sm:$0xff] %v4564_v47  ;;  %v1689_v37 = vsel %vm711_vm0, %v573_v29, -inf  ;;  %v1684_v12 = vmax.f32 %v1682_v51, %v1683_v56  ;;  %v4573_v58 = vmax.f32 %v2557_v18, %v1687_v22  ;;  %v1691_v48 = vsel %vm711_vm0, %v574_v16, -inf  ;;  %v581_v16 = vld [vmem:[%s2969_s16 + $0xbf0] sm:$0xff]  ;;  %v583_v51 = vld [vmem:[%s2969_s16 + $0xc00] sm:$0xff] }
 0x15c   : > { %v1653_v25 = vrot.slane %v1652_v9, 2  ;;  %v4575_v31 = vmax.f32 %v2620_v49, %v1689_v37  ;;  %v1671_v2 = vmax.f32 %v1669_v10, %v1670_v6  ;;  %v1699_v24 = vsel %vm711_vm0, %v575_v59, -inf  ;;  %v580_v49 = vld [vmem:[%s2969_s16 + $0xbe8] sm:$0xff] }
 0x15d   : > { %v1700_v7 = vsel %vm711_vm0, %v576_v63, -inf  ;;  %v1686_v41 = vmax.f32 %v1684_v12, %v1685_v62  ;;  %v4582_v20 = vmax.f32 %v2683_v40, %v1691_v48  ;;  %v2244_v18 = vmax.f32 %v4549_v3, %v1699_v24  ;;  %v582_v62 = vld [vmem:[%s2969_s16 + $0xbf8] sm:$0xff] }
 0x15e   : > { %v1654_v29 = vmax.f32 %v1652_v9, %v1653_v25  ;;  %v1672_v14 = vrot.slane %v1671_v2, 4  ;;  %v2307_v35 = vmax.f32 %v4555_v23, %v1700_v7  ;;  %v1701_v6 = vmax.f32 %v1699_v24, %v1700_v7  ;;  %v584_v7 = vld [vmem:[%s2969_s16 + $0xc08] sm:$0xff] }
 0x15f   : > { %v1702_v56 = vsel %vm711_vm0, %v577_v33, -inf  ;;  %v1688_v63 = vmax.f32 %v1686_v41, %v1687_v22  ;;  %v1704_v40 = vsel %vm711_vm0, %v578_v43, -inf  ;;  %v1706_v23 = vsel %vm711_vm0, %v579_v53, -inf  ;;  %v586_v41 = vld [vmem:[%s2969_s16 + $0xc18] sm:$0xff] }
 0x160   : > { %v1655_v59 = vrot.slane %v1654_v29, 1  ;;  %v2370_v9 = vmax.f32 %v4557_v54, %v1702_v56  ;;  %v1673_v3 = vmax.f32 %v1671_v2, %v1672_v14  ;;  %v1703_v10 = vmax.f32 %v1701_v6, %v1702_v56  ;;  %v585_v54 = vld [vmem:[%s2969_s16 + $0xc10] sm:$0xff] }
 0x161   : > { %v2433_v25 = vmax.f32 %v4566_v28, %v1704_v40  ;;  %v1690_v12 = vmax.f32 %v1688_v63, %v1689_v37  ;;  %v2496_v24 = vmax.f32 %v4568_v5, %v1706_v23  ;;  %v1708_v22 = vsel %vm711_vm0, %v580_v49, -inf  ;;  %v587_v49 = vld [vmem:[%s2969_s16 + $0xc20] sm:$0xff]  ;;  %v588_v63 = vld [vmem:[%s2969_s16 + $0xc28] sm:$0xff] }
 0x162   : > { %v4595_v33 = vmax.f32 %v1654_v29, %v1655_v59  ;;  %v1674_v43 = vrot.slane %v1673_v3, 2  ;;  %v1705_v47 = vmax.f32 %v1703_v10, %v1704_v40  ;;  %v2559_v2 = vmax.f32 %v4573_v58, %v1708_v22  ;;  %v589_v40 = vld [vmem:[%s2969_s16 + $0xc30] sm:$0xff] }
 0x163   : > { %v1710_v28 = vsel %vm711_vm0, %v581_v16, -inf  ;;  %v1692_v53 = vmax.f32 %v1690_v12, %v1691_v48  ;;  %v1712_v37 = vsel %vm711_vm0, %v582_v62, -inf  ;;  %v1720_v5 = vsel %vm711_vm0, %v583_v51, -inf  ;;  %v590_v62 = vld [vmem:[%s2969_s16 + $0xc38] sm:$0xff] }
 0x164   : > { %5435 = vst [vmem:[#allocation22_spill] sm:$0xff] %v4595_v33  ;;  %v2622_v29 = vmax.f32 %v4575_v31, %v1710_v28  ;;  %v1675_v14 = vmax.f32 %v1673_v3, %v1674_v43  ;;  %v1707_v6 = vmax.f32 %v1705_v47, %v1706_v23  ;;  %v2685_v56 = vmax.f32 %v4582_v20, %v1712_v37 }
 0x165   : > { %v4609_v59 = vmax.f32 %v2244_v18, %v1720_v5  ;;  %v1693_v58 = vrot.slane %v1692_v53, 4  ;;  %v1721_v16 = vsel %vm711_vm0, %v584_v7, -inf  ;;  %v1723_v48 = vsel %vm711_vm0, %v585_v54, -inf  ;;  %v591_v7 = vld [vmem:[%s2969_s16 + $0xc40] sm:$0xff]  ;;  %v592_v54 = vld [vmem:[%s2969_s16 + $0xc48] sm:$0xff] }
 0x166   : > { %v1725_v31 = vsel %vm711_vm0, %v586_v41, -inf  ;;  %v1676_v51 = vrot.slane %v1675_v14, 1  ;;  %v1709_v10 = vmax.f32 %v1707_v6, %v1708_v22  ;;  %v4617_v3 = vmax.f32 %v2307_v35, %v1721_v16  ;;  %v594_v6 = vld [vmem:[%s2969_s16 + $0xc58] sm:$0xff] }
 0x167   : > { %v1722_v47 = vmax.f32 %v1720_v5, %v1721_v16  ;;  %v1694_v20 = vmax.f32 %v1692_v53, %v1693_v58  ;;  %v4619_v18 = vmax.f32 %v2370_v9, %v1723_v48  ;;  %v4621_v23 = vmax.f32 %v2433_v25, %v1725_v31  ;;  %v593_v53 = vld [vmem:[%s2969_s16 + $0xc50] sm:$0xff] }
 0x168   : > { %v1727_v12 = vsel %vm711_vm0, %v587_v49, -inf  ;;  %v4626_v41 = vmax.f32 %v1675_v14, %v1676_v51  ;;  %v1711_v43 = vmax.f32 %v1709_v10, %v1710_v28  ;;  %v1729_v5 = vsel %vm711_vm0, %v588_v63, -inf }
 0x169   : > { %v1724_v33 = vmax.f32 %v1722_v47, %v1723_v48  ;;  %v4628_v22 = vmax.f32 %v2496_v24, %v1727_v12  ;;  %v1695_v35 = vrot.slane %v1694_v20, 2  ;;  %v1731_v9 = vsel %vm711_vm0, %v589_v40, -inf  ;;  %v595_v40 = vld [vmem:[%s2969_s16 + $0xc60] sm:$0xff]  ;;  %v597_v47 = vld [vmem:[%s2969_s16 + $0xc70] sm:$0xff] }
 0x16a   : > { %5436 = vst [vmem:[#allocation16_spill] sm:$0xff] %v4626_v41  ;;  %v1733_v25 = vsel %vm711_vm0, %v590_v62, -inf  ;;  %v1713_v49 = vmax.f32 %v1711_v43, %v1712_v37  ;;  %v4635_v16 = vmax.f32 %v2559_v2, %v1729_v5  ;;  %v4637_v28 = vmax.f32 %v2622_v29, %v1731_v9  ;;  %v596_v62 = vld [vmem:[%s2969_s16 + $0xc68] sm:$0xff] }
 0x16b   : > { %v1726_v58 = vmax.f32 %v1724_v33, %v1725_v31  ;;  %v1696_v24 = vmax.f32 %v1694_v20, %v1695_v35  ;;  %v4639_v14 = vmax.f32 %v2685_v56, %v1733_v25  ;;  %v1741_v48 = vsel %vm711_vm0, %v591_v7, -inf  ;;  %v598_v20 = vld [vmem:[%s2969_s16 + $0xc78] sm:$0xff]  ;;  %v599_v7 = vld [vmem:[%s2969_s16 + $0xc80] sm:$0xff] }
 0x16c   : > { %v1742_v63 = vsel %vm711_vm0, %v592_v54, -inf  ;;  %v1714_v51 = vrot.slane %v1713_v49, 4  ;;  %v2246_v33 = vmax.f32 %v4609_v59, %v1741_v48  ;;  %v1744_v31 = vsel %vm711_vm0, %v593_v53, -inf }
 0x16d   : > { %v1728_v10 = vmax.f32 %v1726_v58, %v1727_v12  ;;  %v2309_v2 = vmax.f32 %v4617_v3, %v1742_v63  ;;  %v1697_v29 = vrot.slane %v1696_v24, 1  ;;  %v1743_v37 = vmax.f32 %v1741_v48, %v1742_v63  ;;  %v600_v48 = vld [vmem:[%s2969_s16 + $0xc88] sm:$0xff] }
 0x16e   : > { %v1746_v56 = vsel %vm711_vm0, %v594_v6, -inf  ;;  %v1715_v54 = vmax.f32 %v1713_v49, %v1714_v51  ;;  %v2372_v35 = vmax.f32 %v4619_v18, %v1744_v31  ;;  %v1748_v58 = vsel %vm711_vm0, %v595_v40, -inf  ;;  %v601_v6 = vld [vmem:[%s2969_s16 + $0xc90] sm:$0xff]  ;;  %v602_v40 = vld [vmem:[%s2969_s16 + $0xc98] sm:$0xff] }
 0x16f   : > { %v1730_v43 = vmax.f32 %v1728_v10, %v1729_v5  ;;  %v2435_v59 = vmax.f32 %v4621_v23, %v1746_v56  ;;  %v4654_v3 = vmax.f32 %v1696_v24, %v1697_v29  ;;  %v1745_v12 = vmax.f32 %v1743_v37, %v1744_v31  ;;  %v603_v10 = vld [vmem:[%s2969_s16 + $0xca0] sm:$0xff] }
 0x170   : > { %v1750_v53 = vsel %vm711_vm0, %v596_v62, -inf  ;;  %v1716_v63 = vrot.slane %v1715_v54, 2  ;;  %v2498_v49 = vmax.f32 %v4628_v22, %v1748_v58  ;;  %v1752_v23 = vsel %vm711_vm0, %v597_v47, -inf  ;;  %v604_v47 = vld [vmem:[%s2969_s16 + $0xca8] sm:$0xff] }
 0x171   : > { %5437 = vst [vmem:[#allocation20_spill] sm:$0xff] %v4654_v3  ;;  %v1732_v41 = vmax.f32 %v1730_v43, %v1731_v9  ;;  %v2561_v18 = vmax.f32 %v4635_v16, %v1750_v53  ;;  %v1747_v5 = vmax.f32 %v1745_v12, %v1746_v56  ;;  %v1754_v24 = vsel %vm711_vm0, %v598_v20, -inf  ;;  %v605_v20 = vld [vmem:[%s2969_s16 + $0xcb0] sm:$0xff]  ;;  %v606_v12 = vld [vmem:[%s2969_s16 + $0xcb8] sm:$0xff] }
 0x172   : > { %v1762_v51 = vsel %vm711_vm0, %v599_v7, -inf  ;;  %v1717_v62 = vmax.f32 %v1715_v54, %v1716_v63  ;;  %v2624_v37 = vmax.f32 %v4637_v28, %v1752_v23  ;;  %v2687_v22 = vmax.f32 %v4639_v14, %v1754_v24 }
 0x173   : > { %v1734_v29 = vmax.f32 %v1732_v41, %v1733_v25  ;;  %v1749_v9 = vmax.f32 %v1747_v5, %v1748_v58  ;;  %v4669_v16 = vmax.f32 %v2246_v33, %v1762_v51  ;;  %v1763_v31 = vsel %vm711_vm0, %v600_v48, -inf  ;;  %v607_v58 = vld [vmem:[%s2969_s16 + $0xcc0] sm:$0xff]  ;;  %v608_v48 = vld [vmem:[%s2969_s16 + $0xcc8] sm:$0xff] }
 0x174   : > { %v1765_v56 = vsel %vm711_vm0, %v601_v6, -inf  ;;  %v1718_v7 = vrot.slane %v1717_v62, 1  ;;  %v4675_v54 = vmax.f32 %v2309_v2, %v1763_v31  ;;  %v1764_v41 = vmax.f32 %v1762_v51, %v1763_v31 }
 0x175   : > { %v1735_v43 = vrot.slane %v1734_v29, 4  ;;  %v1751_v25 = vmax.f32 %v1749_v9, %v1750_v53  ;;  %v4677_v28 = vmax.f32 %v2372_v35, %v1765_v56  ;;  %v1767_v14 = vsel %vm711_vm0, %v602_v40, -inf  ;;  %v609_v40 = vld [vmem:[%s2969_s16 + $0xcd0] sm:$0xff] }
 0x176   : > { %v1769_v33 = vsel %vm711_vm0, %v603_v10, -inf  ;;  %v4684_v6 = vmax.f32 %v1717_v62, %v1718_v7  ;;  %v1766_v5 = vmax.f32 %v1764_v41, %v1765_v56  ;;  %v4686_v2 = vmax.f32 %v2435_v59, %v1767_v14 }
 0x177   : > { %v1736_v63 = vmax.f32 %v1734_v29, %v1735_v43  ;;  %v1753_v51 = vmax.f32 %v1751_v25, %v1752_v23  ;;  %v4688_v31 = vmax.f32 %v2498_v49, %v1769_v33  ;;  %v1771_v35 = vsel %vm711_vm0, %v604_v47, -inf  ;;  %v610_v29 = vld [vmem:[%s2969_s16 + $0xcd8] sm:$0xff]  ;;  %v611_v47 = vld [vmem:[%s2969_s16 + $0xce0] sm:$0xff] }
 0x178   : > { %5438 = vst [vmem:[#allocation17_spill] sm:$0xff] %v4684_v6  ;;  %v1773_v53 = vsel %vm711_vm0, %v605_v20, -inf  ;;  %v1768_v9 = vmax.f32 %v1766_v5, %v1767_v14  ;;  %v4693_v3 = vmax.f32 %v2561_v18, %v1771_v35  ;;  %v1775_v59 = vsel %vm711_vm0, %v606_v12, -inf  ;;  %v613_v12 = vld [vmem:[%s2969_s16 + $0xcf0] sm:$0xff]  ;;  %v615_v5 = vld [vmem:[%s2969_s16 + $0xd00] sm:$0xff] }
 0x179   : > { %v1737_v10 = vrot.slane %v1736_v63, 2  ;;  %v4695_v62 = vmax.f32 %v2624_v37, %v1773_v53  ;;  %v1755_v56 = vmax.f32 %v1753_v51, %v1754_v24  ;;  %v1783_v49 = vsel %vm711_vm0, %v607_v58, -inf  ;;  %v612_v37 = vld [vmem:[%s2969_s16 + $0xce8] sm:$0xff] }
 0x17a   : > { %v1784_v23 = vsel %vm711_vm0, %v608_v48, -inf  ;;  %v1770_v7 = vmax.f32 %v1768_v9, %v1769_v33  ;;  %v4702_v43 = vmax.f32 %v2687_v22, %v1775_v59  ;;  %v2248_v18 = vmax.f32 %v4669_v16, %v1783_v49  ;;  %v614_v33 = vld [vmem:[%s2969_s16 + $0xcf8] sm:$0xff] }
 0x17b   : > { %v1738_v20 = vmax.f32 %v1736_v63, %v1737_v10  ;;  %v1756_v41 = vrot.slane %v1755_v56, 4  ;;  %v2311_v25 = vmax.f32 %v4675_v54, %v1784_v23  ;;  %v1785_v24 = vmax.f32 %v1783_v49, %v1784_v23  ;;  %v616_v23 = vld [vmem:[%s2969_s16 + $0xd08] sm:$0xff] }
 0x17c   : > { %v1786_v14 = vsel %vm711_vm0, %v609_v40, -inf  ;;  %v1772_v48 = vmax.f32 %v1770_v7, %v1771_v35  ;;  %v1788_v22 = vsel %vm711_vm0, %v610_v29, -inf  ;;  %v1790_v54 = vsel %vm711_vm0, %v611_v47, -inf  ;;  %v618_v7 = vld [vmem:[%s2969_s16 + $0xd18] sm:$0xff] }
 0x17d   : > { %v1739_v58 = vrot.slane %v1738_v20, 1  ;;  %v2374_v63 = vmax.f32 %v4677_v28, %v1786_v14  ;;  %v1757_v16 = vmax.f32 %v1755_v56, %v1756_v41  ;;  %v1787_v51 = vmax.f32 %v1785_v24, %v1786_v14  ;;  %v617_v28 = vld [vmem:[%s2969_s16 + $0xd10] sm:$0xff] }
 0x17e   : > { %v2437_v10 = vmax.f32 %v4686_v2, %v1788_v22  ;;  %v1774_v9 = vmax.f32 %v1772_v48, %v1773_v53  ;;  %v2500_v49 = vmax.f32 %v4688_v31, %v1790_v54  ;;  %v1792_v35 = vsel %vm711_vm0, %v612_v37, -inf  ;;  %v619_v37 = vld [vmem:[%s2969_s16 + $0xd20] sm:$0xff]  ;;  %v620_v48 = vld [vmem:[%s2969_s16 + $0xd28] sm:$0xff] }
 0x17f   : > { %v4715_v40 = vmax.f32 %v1738_v20, %v1739_v58  ;;  %v1758_v29 = vrot.slane %v1757_v16, 2  ;;  %v1789_v6 = vmax.f32 %v1787_v51, %v1788_v22  ;;  %v2563_v56 = vmax.f32 %v4693_v3, %v1792_v35  ;;  %v621_v22 = vld [vmem:[%s2969_s16 + $0xd30] sm:$0xff] }
 0x180   : > { %v1794_v2 = vsel %vm711_vm0, %v613_v12, -inf  ;;  %v1776_v47 = vmax.f32 %v1774_v9, %v1775_v59  ;;  %v1796_v53 = vsel %vm711_vm0, %v614_v33, -inf  ;;  %v1804_v31 = vsel %vm711_vm0, %v615_v5, -inf  ;;  %v622_v33 = vld [vmem:[%s2969_s16 + $0xd38] sm:$0xff] }
 0x181   : > { %5439 = vst [vmem:[#allocation21_spill] sm:$0xff] %v4715_v40  ;;  %v2626_v20 = vmax.f32 %v4695_v62, %v1794_v2  ;;  %v1759_v41 = vmax.f32 %v1757_v16, %v1758_v29  ;;  %v1791_v24 = vmax.f32 %v1789_v6, %v1790_v54  ;;  %v2689_v14 = vmax.f32 %v4702_v43, %v1796_v53 }
 0x182   : > { %v4729_v58 = vmax.f32 %v2248_v18, %v1804_v31  ;;  %v1777_v3 = vrot.slane %v1776_v47, 4  ;;  %v1805_v12 = vsel %vm711_vm0, %v616_v23, -inf  ;;  %v1807_v59 = vsel %vm711_vm0, %v617_v28, -inf  ;;  %v623_v23 = vld [vmem:[%s2969_s16 + $0xd40] sm:$0xff]  ;;  %v624_v28 = vld [vmem:[%s2969_s16 + $0xd48] sm:$0xff] }
 0x183   : > { %v1809_v62 = vsel %vm711_vm0, %v618_v7, -inf  ;;  %v1760_v5 = vrot.slane %v1759_v41, 1  ;;  %v1793_v51 = vmax.f32 %v1791_v24, %v1792_v35  ;;  %v4737_v16 = vmax.f32 %v2311_v25, %v1805_v12  ;;  %v626_v24 = vld [vmem:[%s2969_s16 + $0xd58] sm:$0xff] }
 0x184   : > { %v1806_v6 = vmax.f32 %v1804_v31, %v1805_v12  ;;  %v1778_v43 = vmax.f32 %v1776_v47, %v1777_v3  ;;  %v4739_v18 = vmax.f32 %v2374_v63, %v1807_v59  ;;  %v4741_v54 = vmax.f32 %v2437_v10, %v1809_v62  ;;  %v625_v47 = vld [vmem:[%s2969_s16 + $0xd50] sm:$0xff] }
 0x185   : > { %v1811_v9 = vsel %vm711_vm0, %v619_v37, -inf  ;;  %v4746_v7 = vmax.f32 %v1759_v41, %v1760_v5  ;;  %v1795_v29 = vmax.f32 %v1793_v51, %v1794_v2  ;;  %v1813_v31 = vsel %vm711_vm0, %v620_v48, -inf }
 0x186   : > { %v1808_v40 = vmax.f32 %v1806_v6, %v1807_v59  ;;  %v4748_v35 = vmax.f32 %v2500_v49, %v1811_v9  ;;  %v1779_v25 = vrot.slane %v1778_v43, 2  ;;  %v1815_v63 = vsel %vm711_vm0, %v621_v22, -inf  ;;  %v627_v22 = vld [vmem:[%s2969_s16 + $0xd60] sm:$0xff]  ;;  %v629_v6 = vld [vmem:[%s2969_s16 + $0xd70] sm:$0xff] }
 0x187   : > { %5440 = vst [vmem:[#allocation39_spill] sm:$0xff] %v4746_v7  ;;  %v1817_v10 = vsel %vm711_vm0, %v622_v33, -inf  ;;  %v1797_v37 = vmax.f32 %v1795_v29, %v1796_v53  ;;  %v4755_v12 = vmax.f32 %v2563_v56, %v1813_v31  ;;  %v4757_v2 = vmax.f32 %v2626_v20, %v1815_v63  ;;  %v628_v33 = vld [vmem:[%s2969_s16 + $0xd68] sm:$0xff] }
 0x188   : > { %v1810_v3 = vmax.f32 %v1808_v40, %v1809_v62  ;;  %v1780_v49 = vmax.f32 %v1778_v43, %v1779_v25  ;;  %v4759_v41 = vmax.f32 %v2689_v14, %v1817_v10  ;;  %v1825_v59 = vsel %vm711_vm0, %v623_v23, -inf  ;;  %v630_v43 = vld [vmem:[%s2969_s16 + $0xd78] sm:$0xff]  ;;  %v631_v23 = vld [vmem:[%s2969_s16 + $0xd80] sm:$0xff] }
 0x189   : > { %v1826_v48 = vsel %vm711_vm0, %v624_v28, -inf  ;;  %v1798_v5 = vrot.slane %v1797_v37, 4  ;;  %v2250_v40 = vmax.f32 %v4729_v58, %v1825_v59  ;;  %v1828_v62 = vsel %vm711_vm0, %v625_v47, -inf }
 0x18a   : > { %v1812_v51 = vmax.f32 %v1810_v3, %v1811_v9  ;;  %v2313_v56 = vmax.f32 %v4737_v16, %v1826_v48  ;;  %v1781_v20 = vrot.slane %v1780_v49, 1  ;;  %v1827_v53 = vmax.f32 %v1825_v59, %v1826_v48  ;;  %v632_v59 = vld [vmem:[%s2969_s16 + $0xd88] sm:$0xff] }
 0x18b   : > { %v1830_v14 = vsel %vm711_vm0, %v626_v24, -inf  ;;  %v1799_v28 = vmax.f32 %v1797_v37, %v1798_v5  ;;  %v2376_v25 = vmax.f32 %v4739_v18, %v1828_v62  ;;  %v1832_v3 = vsel %vm711_vm0, %v627_v22, -inf  ;;  %v633_v24 = vld [vmem:[%s2969_s16 + $0xd90] sm:$0xff]  ;;  %v634_v22 = vld [vmem:[%s2969_s16 + $0xd98] sm:$0xff] }
 0x18c   : > { %v1814_v29 = vmax.f32 %v1812_v51, %v1813_v31  ;;  %v2439_v58 = vmax.f32 %v4741_v54, %v1830_v14  ;;  %v4774_v16 = vmax.f32 %v1780_v49, %v1781_v20  ;;  %v1829_v9 = vmax.f32 %v1827_v53, %v1828_v62  ;;  %v635_v51 = vld [vmem:[%s2969_s16 + $0xda0] sm:$0xff] }
 0x18d   : > { %v1834_v47 = vsel %vm711_vm0, %v628_v33, -inf  ;;  %v1800_v48 = vrot.slane %v1799_v28, 2  ;;  %v2502_v37 = vmax.f32 %v4748_v35, %v1832_v3  ;;  %v1836_v54 = vsel %vm711_vm0, %v629_v6, -inf  ;;  %v636_v6 = vld [vmem:[%s2969_s16 + $0xda8] sm:$0xff] }
 0x18e   : > { %5441 = vst [vmem:[#allocation40_spill] sm:$0xff] %v4774_v16  ;;  %v1816_v7 = vmax.f32 %v1814_v29, %v1815_v63  ;;  %v2565_v18 = vmax.f32 %v4755_v12, %v1834_v47  ;;  %v1831_v31 = vmax.f32 %v1829_v9, %v1830_v14  ;;  %v1838_v49 = vsel %vm711_vm0, %v630_v43, -inf  ;;  %v637_v43 = vld [vmem:[%s2969_s16 + $0xdb0] sm:$0xff]  ;;  %v638_v9 = vld [vmem:[%s2969_s16 + $0xdb8] sm:$0xff] }
 0x18f   : > { %v1846_v5 = vsel %vm711_vm0, %v631_v23, -inf  ;;  %v1801_v33 = vmax.f32 %v1799_v28, %v1800_v48  ;;  %v2628_v53 = vmax.f32 %v4757_v2, %v1836_v54  ;;  %v2691_v35 = vmax.f32 %v4759_v41, %v1838_v49 }
 0x190   : > { %v1818_v20 = vmax.f32 %v1816_v7, %v1817_v10  ;;  %v1833_v63 = vmax.f32 %v1831_v31, %v1832_v3  ;;  %v4789_v12 = vmax.f32 %v2250_v40, %v1846_v5  ;;  %v1847_v62 = vsel %vm711_vm0, %v632_v59, -inf  ;;  %v639_v3 = vld [vmem:[%s2969_s16 + $0xdc0] sm:$0xff]  ;;  %v640_v59 = vld [vmem:[%s2969_s16 + $0xdc8] sm:$0xff] }
 0x191   : > { %v1849_v14 = vsel %vm711_vm0, %v633_v24, -inf  ;;  %v1802_v23 = vrot.slane %v1801_v33, 1  ;;  %v4795_v28 = vmax.f32 %v2313_v56, %v1847_v62  ;;  %v1848_v7 = vmax.f32 %v1846_v5, %v1847_v62 }
 0x192   : > { %v1819_v29 = vrot.slane %v1818_v20, 4  ;;  %v1835_v10 = vmax.f32 %v1833_v63, %v1834_v47  ;;  %v4797_v2 = vmax.f32 %v2376_v25, %v1849_v14  ;;  %v1851_v41 = vsel %vm711_vm0, %v634_v22, -inf  ;;  %v641_v22 = vld [vmem:[%s2969_s16 + $0xdd0] sm:$0xff] }
 0x193   : > { %v1853_v40 = vsel %vm711_vm0, %v635_v51, -inf  ;;  %v4804_v24 = vmax.f32 %v1801_v33, %v1802_v23  ;;  %v1850_v31 = vmax.f32 %v1848_v7, %v1849_v14  ;;  %v4806_v56 = vmax.f32 %v2439_v58, %v1851_v41 }
 0x194   : > { %v1820_v48 = vmax.f32 %v1818_v20, %v1819_v29  ;;  %v1837_v5 = vmax.f32 %v1835_v10, %v1836_v54  ;;  %v4808_v62 = vmax.f32 %v2502_v37, %v1853_v40  ;;  %v1855_v25 = vsel %vm711_vm0, %v636_v6, -inf  ;;  %v642_v20 = vld [vmem:[%s2969_s16 + $0xdd8] sm:$0xff]  ;;  %v643_v6 = vld [vmem:[%s2969_s16 + $0xde0] sm:$0xff] }
 0x195   : > { %5442 = vst [vmem:[#allocation41_spill] sm:$0xff] %v4804_v24  ;;  %v1857_v47 = vsel %vm711_vm0, %v637_v43, -inf  ;;  %v1852_v63 = vmax.f32 %v1850_v31, %v1851_v41  ;;  %v4813_v16 = vmax.f32 %v2565_v18, %v1855_v25  ;;  %v1859_v58 = vsel %vm711_vm0, %v638_v9, -inf  ;;  %v645_v9 = vld [vmem:[%s2969_s16 + $0xdf0] sm:$0xff]  ;;  %v647_v31 = vld [vmem:[%s2969_s16 + $0xe00] sm:$0xff] }
 0x196   : > { %v1821_v51 = vrot.slane %v1820_v48, 2  ;;  %v4815_v33 = vmax.f32 %v2628_v53, %v1857_v47  ;;  %v1839_v14 = vmax.f32 %v1837_v5, %v1838_v49  ;;  %v1867_v37 = vsel %vm711_vm0, %v639_v3, -inf  ;;  %v644_v53 = vld [vmem:[%s2969_s16 + $0xde8] sm:$0xff] }
 0x197   : > { %v1868_v54 = vsel %vm711_vm0, %v640_v59, -inf  ;;  %v1854_v23 = vmax.f32 %v1852_v63, %v1853_v40  ;;  %v4822_v29 = vmax.f32 %v2691_v35, %v1859_v58  ;;  %v2252_v18 = vmax.f32 %v4789_v12, %v1867_v37  ;;  %v646_v40 = vld [vmem:[%s2969_s16 + $0xdf8] sm:$0xff] }
 0x198   : > { %v1822_v43 = vmax.f32 %v1820_v48, %v1821_v51  ;;  %v1840_v7 = vrot.slane %v1839_v14, 4  ;;  %v2315_v10 = vmax.f32 %v4795_v28, %v1868_v54  ;;  %v1869_v49 = vmax.f32 %v1867_v37, %v1868_v54  ;;  %v648_v54 = vld [vmem:[%s2969_s16 + $0xe08] sm:$0xff] }
 0x199   : > { %v1870_v41 = vsel %vm711_vm0, %v641_v22, -inf  ;;  %v1856_v59 = vmax.f32 %v1854_v23, %v1855_v25  ;;  %v1872_v35 = vsel %vm711_vm0, %v642_v20, -inf  ;;  %v1874_v28 = vsel %vm711_vm0, %v643_v6, -inf  ;;  %v650_v23 = vld [vmem:[%s2969_s16 + $0xe18] sm:$0xff] }
 0x19a   : > { %v1823_v3 = vrot.slane %v1822_v43, 1  ;;  %v2378_v48 = vmax.f32 %v4797_v2, %v1870_v41  ;;  %v1841_v12 = vmax.f32 %v1839_v14, %v1840_v7  ;;  %v1871_v5 = vmax.f32 %v1869_v49, %v1870_v41  ;;  %v649_v2 = vld [vmem:[%s2969_s16 + $0xe10] sm:$0xff] }
 0x19b   : > { %v2441_v51 = vmax.f32 %v4806_v56, %v1872_v35  ;;  %v1858_v63 = vmax.f32 %v1856_v59, %v1857_v47  ;;  %v2504_v37 = vmax.f32 %v4808_v62, %v1874_v28  ;;  %v1876_v25 = vsel %vm711_vm0, %v644_v53, -inf  ;;  %v651_v53 = vld [vmem:[%s2969_s16 + $0xe20] sm:$0xff]  ;;  %v652_v59 = vld [vmem:[%s2969_s16 + $0xe28] sm:$0xff] }
 0x19c   : > { %v4835_v22 = vmax.f32 %v1822_v43, %v1823_v3  ;;  %v1842_v20 = vrot.slane %v1841_v12, 2  ;;  %v1873_v24 = vmax.f32 %v1871_v5, %v1872_v35  ;;  %v2567_v14 = vmax.f32 %v4813_v16, %v1876_v25  ;;  %v653_v35 = vld [vmem:[%s2969_s16 + $0xe30] sm:$0xff] }
 0x19d   : > { %v1878_v56 = vsel %vm711_vm0, %v645_v9, -inf  ;;  %v1860_v6 = vmax.f32 %v1858_v63, %v1859_v58  ;;  %v1880_v47 = vsel %vm711_vm0, %v646_v40, -inf  ;;  %v1888_v62 = vsel %vm711_vm0, %v647_v31, -inf  ;;  %v654_v40 = vld [vmem:[%s2969_s16 + $0xe38] sm:$0xff] }
 0x19e   : > { %5443 = vst [vmem:[#allocation42_spill] sm:$0xff] %v4835_v22  ;;  %v2630_v43 = vmax.f32 %v4815_v33, %v1878_v56  ;;  %v1843_v7 = vmax.f32 %v1841_v12, %v1842_v20  ;;  %v1875_v49 = vmax.f32 %v1873_v24, %v1874_v28  ;;  %v2693_v41 = vmax.f32 %v4822_v29, %v1880_v47 }
 0x19f   : > { %v4849_v3 = vmax.f32 %v2252_v18, %v1888_v62  ;;  %v1861_v16 = vrot.slane %v1860_v6, 4  ;;  %v1889_v9 = vsel %vm711_vm0, %v648_v54, -inf  ;;  %v1891_v58 = vsel %vm711_vm0, %v649_v2, -inf  ;;  %v655_v54 = vld [vmem:[%s2969_s16 + $0xe40] sm:$0xff]  ;;  %v656_v2 = vld [vmem:[%s2969_s16 + $0xe48] sm:$0xff] }
 0x1a0   : > { %v1893_v33 = vsel %vm711_vm0, %v650_v23, -inf  ;;  %v1844_v31 = vrot.slane %v1843_v7, 1  ;;  %v1877_v5 = vmax.f32 %v1875_v49, %v1876_v25  ;;  %v4857_v12 = vmax.f32 %v2315_v10, %v1889_v9  ;;  %v658_v49 = vld [vmem:[%s2969_s16 + $0xe58] sm:$0xff] }
 0x1a1   : > { %v1890_v24 = vmax.f32 %v1888_v62, %v1889_v9  ;;  %v1862_v29 = vmax.f32 %v1860_v6, %v1861_v16  ;;  %v4859_v18 = vmax.f32 %v2378_v48, %v1891_v58  ;;  %v4861_v28 = vmax.f32 %v2441_v51, %v1893_v33  ;;  %v657_v6 = vld [vmem:[%s2969_s16 + $0xe50] sm:$0xff] }
 0x1a2   : > { %v1895_v63 = vsel %vm711_vm0, %v651_v53, -inf  ;;  %v4866_v23 = vmax.f32 %v1843_v7, %v1844_v31  ;;  %v1879_v20 = vmax.f32 %v1877_v5, %v1878_v56  ;;  %v1897_v62 = vsel %vm711_vm0, %v652_v59, -inf }
 0x1a3   : > { %v1892_v22 = vmax.f32 %v1890_v24, %v1891_v58  ;;  %v4868_v25 = vmax.f32 %v2504_v37, %v1895_v63  ;;  %v1863_v10 = vrot.slane %v1862_v29, 2  ;;  %v1899_v48 = vsel %vm711_vm0, %v653_v35, -inf  ;;  %v659_v35 = vld [vmem:[%s2969_s16 + $0xe60] sm:$0xff]  ;;  %v661_v24 = vld [vmem:[%s2969_s16 + $0xe70] sm:$0xff] }
 0x1a4   : > { %5444 = vst [vmem:[#allocation43_spill] sm:$0xff] %v4866_v23  ;;  %v1901_v51 = vsel %vm711_vm0, %v654_v40, -inf  ;;  %v1881_v53 = vmax.f32 %v1879_v20, %v1880_v47  ;;  %v4875_v9 = vmax.f32 %v2567_v14, %v1897_v62  ;;  %v4877_v56 = vmax.f32 %v2630_v43, %v1899_v48  ;;  %v660_v40 = vld [vmem:[%s2969_s16 + $0xe68] sm:$0xff] }
 0x1a5   : > { %v1894_v16 = vmax.f32 %v1892_v22, %v1893_v33  ;;  %v1864_v37 = vmax.f32 %v1862_v29, %v1863_v10  ;;  %v4879_v7 = vmax.f32 %v2693_v41, %v1901_v51  ;;  %v1909_v58 = vsel %vm711_vm0, %v655_v54, -inf  ;;  %v662_v29 = vld [vmem:[%s2969_s16 + $0xe78] sm:$0xff]  ;;  %v663_v54 = vld [vmem:[%s2969_s16 + $0xe80] sm:$0xff] }
 0x1a6   : > { %v1910_v59 = vsel %vm711_vm0, %v656_v2, -inf  ;;  %v1882_v31 = vrot.slane %v1881_v53, 4  ;;  %v2254_v22 = vmax.f32 %v4849_v3, %v1909_v58  ;;  %v1912_v33 = vsel %vm711_vm0, %v657_v6, -inf }
 0x1a7   : > { %v1896_v5 = vmax.f32 %v1894_v16, %v1895_v63  ;;  %v2317_v14 = vmax.f32 %v4857_v12, %v1910_v59  ;;  %v1865_v43 = vrot.slane %v1864_v37, 1  ;;  %v1911_v47 = vmax.f32 %v1909_v58, %v1910_v59  ;;  %v664_v58 = vld [vmem:[%s2969_s16 + $0xe88] sm:$0xff] }
 0x1a8   : > { %v1914_v41 = vsel %vm711_vm0, %v658_v49, -inf  ;;  %v1883_v2 = vmax.f32 %v1881_v53, %v1882_v31  ;;  %v2380_v10 = vmax.f32 %v4859_v18, %v1912_v33  ;;  %v1916_v16 = vsel %vm711_vm0, %v659_v35, -inf  ;;  %v665_v49 = vld [vmem:[%s2969_s16 + $0xe90] sm:$0xff]  ;;  %v666_v35 = vld [vmem:[%s2969_s16 + $0xe98] sm:$0xff] }
 0x1a9   : > { %v1898_v20 = vmax.f32 %v1896_v5, %v1897_v62  ;;  %v2443_v3 = vmax.f32 %v4861_v28, %v1914_v41  ;;  %v4894_v12 = vmax.f32 %v1864_v37, %v1865_v43  ;;  %v1913_v63 = vmax.f32 %v1911_v47, %v1912_v33  ;;  %v667_v5 = vld [vmem:[%s2969_s16 + $0xea0] sm:$0xff] }
 0x1aa   : > { %v1918_v6 = vsel %vm711_vm0, %v660_v40, -inf  ;;  %v1884_v59 = vrot.slane %v1883_v2, 2  ;;  %v2506_v53 = vmax.f32 %v4868_v25, %v1916_v16  ;;  %v1920_v28 = vsel %vm711_vm0, %v661_v24, -inf  ;;  %v668_v24 = vld [vmem:[%s2969_s16 + $0xea8] sm:$0xff] }
 0x1ab   : > { %5445 = vst [vmem:[#allocation44_spill] sm:$0xff] %v4894_v12  ;;  %v1900_v23 = vmax.f32 %v1898_v20, %v1899_v48  ;;  %v2569_v18 = vmax.f32 %v4875_v9, %v1918_v6  ;;  %v1915_v62 = vmax.f32 %v1913_v63, %v1914_v41  ;;  %v1922_v37 = vsel %vm711_vm0, %v662_v29, -inf  ;;  %v669_v29 = vld [vmem:[%s2969_s16 + $0xeb0] sm:$0xff]  ;;  %v670_v63 = vld [vmem:[%s2969_s16 + $0xeb8] sm:$0xff] }
 0x1ac   : > { %v1930_v31 = vsel %vm711_vm0, %v663_v54, -inf  ;;  %v1885_v40 = vmax.f32 %v1883_v2, %v1884_v59  ;;  %v2632_v47 = vmax.f32 %v4877_v56, %v1920_v28  ;;  %v2695_v25 = vmax.f32 %v4879_v7, %v1922_v37 }
 0x1ad   : > { %v1902_v43 = vmax.f32 %v1900_v23, %v1901_v51  ;;  %v1917_v48 = vmax.f32 %v1915_v62, %v1916_v16  ;;  %v4909_v9 = vmax.f32 %v2254_v22, %v1930_v31  ;;  %v1931_v33 = vsel %vm711_vm0, %v664_v58, -inf  ;;  %v671_v16 = vld [vmem:[%s2969_s16 + $0xec0] sm:$0xff]  ;;  %v672_v58 = vld [vmem:[%s2969_s16 + $0xec8] sm:$0xff] }
 0x1ae   : > { %v1933_v41 = vsel %vm711_vm0, %v665_v49, -inf  ;;  %v1886_v54 = vrot.slane %v1885_v40, 1  ;;  %v4915_v2 = vmax.f32 %v2317_v14, %v1931_v33  ;;  %v1932_v23 = vmax.f32 %v1930_v31, %v1931_v33 }
 0x1af   : > { %v1903_v20 = vrot.slane %v1902_v43, 4  ;;  %v1919_v51 = vmax.f32 %v1917_v48, %v1918_v6  ;;  %v4917_v56 = vmax.f32 %v2380_v10, %v1933_v41  ;;  %v1935_v7 = vsel %vm711_vm0, %v666_v35, -inf  ;;  %v673_v35 = vld [vmem:[%s2969_s16 + $0xed0] sm:$0xff] }
 0x1b0   : > { %v1937_v22 = vsel %vm711_vm0, %v667_v5, -inf  ;;  %v4924_v49 = vmax.f32 %v1885_v40, %v1886_v54  ;;  %v1934_v62 = vmax.f32 %v1932_v23, %v1933_v41  ;;  %v4926_v14 = vmax.f32 %v2443_v3, %v1935_v7 }
 0x1b1   : > { %v1904_v59 = vmax.f32 %v1902_v43, %v1903_v20  ;;  %v1921_v31 = vmax.f32 %v1919_v51, %v1920_v28  ;;  %v4928_v33 = vmax.f32 %v2506_v53, %v1937_v22  ;;  %v1939_v10 = vsel %vm711_vm0, %v668_v24, -inf  ;;  %v674_v43 = vld [vmem:[%s2969_s16 + $0xed8] sm:$0xff]  ;;  %v675_v24 = vld [vmem:[%s2969_s16 + $0xee0] sm:$0xff] }
 0x1b2   : > { %5446 = vst [vmem:[#allocation45_spill] sm:$0xff] %v4924_v49  ;;  %v1941_v6 = vsel %vm711_vm0, %v669_v29, -inf  ;;  %v1936_v48 = vmax.f32 %v1934_v62, %v1935_v7  ;;  %v4933_v12 = vmax.f32 %v2569_v18, %v1939_v10  ;;  %v1943_v3 = vsel %vm711_vm0, %v670_v63, -inf  ;;  %v677_v63 = vld [vmem:[%s2969_s16 + $0xef0] sm:$0xff]  ;;  %v679_v62 = vld [vmem:[%s2969_s16 + $0xf00] sm:$0xff] }
 0x1b3   : > { %v1905_v5 = vrot.slane %v1904_v59, 2  ;;  %v4935_v40 = vmax.f32 %v2632_v47, %v1941_v6  ;;  %v1923_v41 = vmax.f32 %v1921_v31, %v1922_v37  ;;  %v1951_v53 = vsel %vm711_vm0, %v671_v16, -inf  ;;  %v676_v47 = vld [vmem:[%s2969_s16 + $0xee8] sm:$0xff] }
 0x1b4   : > { %v1952_v28 = vsel %vm711_vm0, %v672_v58, -inf  ;;  %v1938_v54 = vmax.f32 %v1936_v48, %v1937_v22  ;;  %v4942_v20 = vmax.f32 %v2695_v25, %v1943_v3  ;;  %v2256_v18 = vmax.f32 %v4909_v9, %v1951_v53  ;;  %v678_v22 = vld [vmem:[%s2969_s16 + $0xef8] sm:$0xff] }
 0x1b5   : > { %v1906_v29 = vmax.f32 %v1904_v59, %v1905_v5  ;;  %v1924_v23 = vrot.slane %v1923_v41, 4  ;;  %v2319_v51 = vmax.f32 %v4915_v2, %v1952_v28  ;;  %v1953_v37 = vmax.f32 %v1951_v53, %v1952_v28  ;;  %v680_v28 = vld [vmem:[%s2969_s16 + $0xf08] sm:$0xff] }
 0x1b6   : > { %v1954_v7 = vsel %vm711_vm0, %v673_v35, -inf  ;;  %v1940_v58 = vmax.f32 %v1938_v54, %v1939_v10  ;;  %v1956_v25 = vsel %vm711_vm0, %v674_v43, -inf  ;;  %v1958_v2 = vsel %vm711_vm0, %v675_v24, -inf  ;;  %v682_v54 = vld [vmem:[%s2969_s16 + $0xf18] sm:$0xff] }
 0x1b7   : > { %v1907_v16 = vrot.slane %v1906_v29, 1  ;;  %v2382_v59 = vmax.f32 %v4917_v56, %v1954_v7  ;;  %v1925_v9 = vmax.f32 %v1923_v41, %v1924_v23  ;;  %v1955_v31 = vmax.f32 %v1953_v37, %v1954_v7  ;;  %v681_v56 = vld [vmem:[%s2969_s16 + $0xf10] sm:$0xff] }
 0x1b8   : > { %v2445_v5 = vmax.f32 %v4926_v14, %v1956_v25  ;;  %v1942_v48 = vmax.f32 %v1940_v58, %v1941_v6  ;;  %v2508_v53 = vmax.f32 %v4928_v33, %v1958_v2  ;;  %v1960_v10 = vsel %vm711_vm0, %v676_v47, -inf  ;;  %v683_v47 = vld [vmem:[%s2969_s16 + $0xf20] sm:$0xff]  ;;  %v684_v58 = vld [vmem:[%s2969_s16 + $0xf28] sm:$0xff] }
 0x1b9   : > { %v4955_v35 = vmax.f32 %v1906_v29, %v1907_v16  ;;  %v1926_v43 = vrot.slane %v1925_v9, 2  ;;  %v1957_v49 = vmax.f32 %v1955_v31, %v1956_v25  ;;  %v2571_v41 = vmax.f32 %v4933_v12, %v1960_v10  ;;  %v685_v25 = vld [vmem:[%s2969_s16 + $0xf30] sm:$0xff] }
 0x1ba   : > { %v1962_v14 = vsel %vm711_vm0, %v677_v63, -inf  ;;  %v1944_v24 = vmax.f32 %v1942_v48, %v1943_v3  ;;  %v1964_v6 = vsel %vm711_vm0, %v678_v22, -inf  ;;  %v1972_v33 = vsel %vm711_vm0, %v679_v62, -inf  ;;  %v686_v22 = vld [vmem:[%s2969_s16 + $0xf38] sm:$0xff] }
 0x1bb   : > { %5447 = vst [vmem:[#allocation46_spill] sm:$0xff] %v4955_v35  ;;  %v2634_v29 = vmax.f32 %v4935_v40, %v1962_v14  ;;  %v1927_v23 = vmax.f32 %v1925_v9, %v1926_v43  ;;  %v1959_v37 = vmax.f32 %v1957_v49, %v1958_v2  ;;  %v2697_v7 = vmax.f32 %v4942_v20, %v1964_v6 }
 0x1bc   : > { %v4969_v16 = vmax.f32 %v2256_v18, %v1972_v33  ;;  %v1945_v12 = vrot.slane %v1944_v24, 4  ;;  %v1973_v63 = vsel %vm711_vm0, %v680_v28, -inf  ;;  %v1975_v3 = vsel %vm711_vm0, %v681_v56, -inf  ;;  %v687_v28 = vld [vmem:[%s2969_s16 + $0xf40] sm:$0xff]  ;;  %v688_v56 = vld [vmem:[%s2969_s16 + $0xf48] sm:$0xff] }
 0x1bd   : > { %v1977_v40 = vsel %vm711_vm0, %v682_v54, -inf  ;;  %v1928_v62 = vrot.slane %v1927_v23, 1  ;;  %v1961_v31 = vmax.f32 %v1959_v37, %v1960_v10  ;;  %v4977_v9 = vmax.f32 %v2319_v51, %v1973_v63  ;;  %v690_v37 = vld [vmem:[%s2969_s16 + $0xf58] sm:$0xff] }
 0x1be   : > { %v1974_v49 = vmax.f32 %v1972_v33, %v1973_v63  ;;  %v1946_v20 = vmax.f32 %v1944_v24, %v1945_v12  ;;  %v4979_v18 = vmax.f32 %v2382_v59, %v1975_v3  ;;  %v4981_v2 = vmax.f32 %v2445_v5, %v1977_v40  ;;  %v689_v24 = vld [vmem:[%s2969_s16 + $0xf50] sm:$0xff] }
 0x1bf   : > { %v1979_v48 = vsel %vm711_vm0, %v683_v47, -inf  ;;  %v4986_v54 = vmax.f32 %v1927_v23, %v1928_v62  ;;  %v1963_v43 = vmax.f32 %v1961_v31, %v1962_v14  ;;  %v1981_v33 = vsel %vm711_vm0, %v684_v58, -inf }
 0x1c0   : > { %v1976_v35 = vmax.f32 %v1974_v49, %v1975_v3  ;;  %v4988_v10 = vmax.f32 %v2508_v53, %v1979_v48  ;;  %v1947_v51 = vrot.slane %v1946_v20, 2  ;;  %v1983_v59 = vsel %vm711_vm0, %v685_v25, -inf  ;;  %v691_v25 = vld [vmem:[%s2969_s16 + $0xf60] sm:$0xff]  ;;  %v693_v49 = vld [vmem:[%s2969_s16 + $0xf70] sm:$0xff] }
 0x1c1   : > { %5448 = vst [vmem:[#allocation47_spill] sm:$0xff] %v4986_v54  ;;  %v1985_v5 = vsel %vm711_vm0, %v686_v22, -inf  ;;  %v1965_v47 = vmax.f32 %v1963_v43, %v1964_v6  ;;  %v4995_v63 = vmax.f32 %v2571_v41, %v1981_v33  ;;  %v4997_v14 = vmax.f32 %v2634_v29, %v1983_v59  ;;  %v692_v22 = vld [vmem:[%s2969_s16 + $0xf68] sm:$0xff] }
 0x1c2   : > { %v1978_v12 = vmax.f32 %v1976_v35, %v1977_v40  ;;  %v1948_v53 = vmax.f32 %v1946_v20, %v1947_v51  ;;  %v4999_v23 = vmax.f32 %v2697_v7, %v1985_v5  ;;  %v1993_v3 = vsel %vm711_vm0, %v687_v28, -inf  ;;  %v694_v20 = vld [vmem:[%s2969_s16 + $0xf78] sm:$0xff]  ;;  %v695_v28 = vld [vmem:[%s2969_s16 + $0xf80] sm:$0xff] }
 0x1c3   : > { %v1994_v58 = vsel %vm711_vm0, %v688_v56, -inf  ;;  %v1966_v62 = vrot.slane %v1965_v47, 4  ;;  %v2258_v35 = vmax.f32 %v4969_v16, %v1993_v3  ;;  %v1996_v40 = vsel %vm711_vm0, %v689_v24, -inf }
 0x1c4   : > { %v1980_v31 = vmax.f32 %v1978_v12, %v1979_v48  ;;  %v2321_v41 = vmax.f32 %v4977_v9, %v1994_v58  ;;  %v1949_v29 = vrot.slane %v1948_v53, 1  ;;  %v1995_v6 = vmax.f32 %v1993_v3, %v1994_v58  ;;  %v696_v3 = vld [vmem:[%s2969_s16 + $0xf88] sm:$0xff] }
 0x1c5   : > { %v1998_v7 = vsel %vm711_vm0, %v690_v37, -inf  ;;  %v1967_v56 = vmax.f32 %v1965_v47, %v1966_v62  ;;  %v2384_v51 = vmax.f32 %v4979_v18, %v1996_v40  ;;  %v2000_v12 = vsel %vm711_vm0, %v691_v25, -inf  ;;  %v697_v37 = vld [vmem:[%s2969_s16 + $0xf90] sm:$0xff]  ;;  %v698_v25 = vld [vmem:[%s2969_s16 + $0xf98] sm:$0xff] }
 0x1c6   : > { %v1982_v43 = vmax.f32 %v1980_v31, %v1981_v33  ;;  %v2447_v16 = vmax.f32 %v4981_v2, %v1998_v7  ;;  %v5014_v9 = vmax.f32 %v1948_v53, %v1949_v29  ;;  %v1997_v48 = vmax.f32 %v1995_v6, %v1996_v40  ;;  %v699_v31 = vld [vmem:[%s2969_s16 + $0xfa0] sm:$0xff] }
 0x1c7   : > { %v2002_v24 = vsel %vm711_vm0, %v692_v22, -inf  ;;  %v1968_v58 = vrot.slane %v1967_v56, 2  ;;  %v2510_v47 = vmax.f32 %v4988_v10, %v2000_v12  ;;  %v2004_v2 = vsel %vm711_vm0, %v693_v49, -inf  ;;  %v700_v49 = vld [vmem:[%s2969_s16 + $0xfa8] sm:$0xff] }
 0x1c8   : > { %5449 = vst [vmem:[#allocation48_spill] sm:$0xff] %v5014_v9  ;;  %v1984_v54 = vmax.f32 %v1982_v43, %v1983_v59  ;;  %v2573_v18 = vmax.f32 %v4995_v63, %v2002_v24  ;;  %v1999_v33 = vmax.f32 %v1997_v48, %v1998_v7  ;;  %v2006_v53 = vsel %vm711_vm0, %v694_v20, -inf  ;;  %v701_v20 = vld [vmem:[%s2969_s16 + $0xfb0] sm:$0xff]  ;;  %v702_v48 = vld [vmem:[%s2969_s16 + $0xfb8] sm:$0xff] }
 0x1c9   : > { %v2014_v62 = vsel %vm711_vm0, %v695_v28, -inf  ;;  %v1969_v22 = vmax.f32 %v1967_v56, %v1968_v58  ;;  %v2636_v6 = vmax.f32 %v4997_v14, %v2004_v2  ;;  %v2699_v10 = vmax.f32 %v4999_v23, %v2006_v53 }
 0x1ca   : > { %v1986_v29 = vmax.f32 %v1984_v54, %v1985_v5  ;;  %v2001_v59 = vmax.f32 %v1999_v33, %v2000_v12  ;;  %v5029_v63 = vmax.f32 %v2258_v35, %v2014_v62  ;;  %v2015_v40 = vsel %vm711_vm0, %v696_v3, -inf  ;;  %v703_v12 = vld [vmem:[%s2969_s16 + $0xfc0] sm:$0xff]  ;;  %v704_v3 = vld [vmem:[%s2969_s16 + $0xfc8] sm:$0xff] }
 0x1cb   : > { %v2017_v7 = vsel %vm711_vm0, %v697_v37, -inf  ;;  %v1970_v28 = vrot.slane %v1969_v22, 1  ;;  %v5035_v56 = vmax.f32 %v2321_v41, %v2015_v40  ;;  %v2016_v54 = vmax.f32 %v2014_v62, %v2015_v40 }
 0x1cc   : > { %v1987_v43 = vrot.slane %v1986_v29, 4  ;;  %v2003_v5 = vmax.f32 %v2001_v59, %v2002_v24  ;;  %v5037_v14 = vmax.f32 %v2384_v51, %v2017_v7  ;;  %v2019_v23 = vsel %vm711_vm0, %v698_v25, -inf  ;;  %v705_v25 = vld [vmem:[%s2969_s16 + $0xfd0] sm:$0xff] }
 0x1cd   : > { %v2021_v35 = vsel %vm711_vm0, %v699_v31, -inf  ;;  %v5044_v37 = vmax.f32 %v1969_v22, %v1970_v28  ;;  %v2018_v33 = vmax.f32 %v2016_v54, %v2017_v7  ;;  %v5046_v41 = vmax.f32 %v2447_v16, %v2019_v23 }
 0x1ce   : > { %v1988_v58 = vmax.f32 %v1986_v29, %v1987_v43  ;;  %v2005_v62 = vmax.f32 %v2003_v5, %v2004_v2  ;;  %v5048_v40 = vmax.f32 %v2510_v47, %v2021_v35  ;;  %v2023_v51 = vsel %vm711_vm0, %v700_v49, -inf  ;;  %v706_v29 = vld [vmem:[%s2969_s16 + $0xfd8] sm:$0xff]  ;;  %v707_v49 = vld [vmem:[%s2969_s16 + $0xfe0] sm:$0xff] }
 0x1cf   : > { %v2025_v24 = vsel %vm711_vm0, %v701_v20, -inf  ;;  %v2020_v59 = vmax.f32 %v2018_v33, %v2019_v23  ;;  %v5053_v9 = vmax.f32 %v2573_v18, %v2023_v51  ;;  %v2027_v16 = vsel %vm711_vm0, %v702_v48, -inf  ;;  %v709_v48 = vld [vmem:[%s2969_s16 + $0xff0] sm:$0xff] }
 0x1d0   : > { %v1989_v31 = vrot.slane %v1988_v58, 2  ;;  %v5055_v22 = vmax.f32 %v2636_v6, %v2025_v24  ;;  %v2007_v7 = vmax.f32 %v2005_v62, %v2006_v53  ;;  %v5060_v47 = vsel %vm711_vm0, %v703_v12, -inf  ;;  %v708_v6 = vld [vmem:[%s2969_s16 + $0xfe8] sm:$0xff] }
 0x1d1   : > { %v5063_v2 = vsel %vm711_vm0, %v704_v3, -inf  ;;  %v2022_v28 = vmax.f32 %v2020_v59, %v2021_v35  ;;  %v5066_v43 = vmax.f32 %v2699_v10, %v2027_v16  ;;  %v2260_v18 = vmax.f32 %v5029_v63, %v5060_v47  ;;  %v5493_v63 = vld [vmem:[#allocation33_spill] sm:$0xff] }
 0x1d2   : > { %v1990_v20 = vmax.f32 %v1988_v58, %v1989_v31  ;;  %v2008_v54 = vrot.slane %v2007_v7, 4  ;;  %v2037_v5 = vmax.f32 %v5060_v47, %v5063_v2  ;;  %v5076_v23 = vsel %vm711_vm0, %v705_v25, -inf  ;;  %v710_v58 = vld [vmem:[%s2969_s16 + $0xff8] sm:$0xff] }
 0x1d3   : > { %v2024_v3 = vmax.f32 %v2022_v28, %v2023_v51  ;;  %v2386_v10 = vmax.f32 %v5037_v14, %v5076_v23  ;;  %v5082_v35 = vsel %vm711_vm0, %v706_v29, -inf  ;;  %v5089_v59 = vsel %vm711_vm0, %v707_v49, -inf }
 0x1d4   : > { %v1991_v12 = vrot.slane %v1990_v20, 1  ;;  %v2009_v33 = vmax.f32 %v2007_v7, %v2008_v54  ;;  %v2039_v62 = vmax.f32 %v2037_v5, %v5076_v23  ;;  %v2449_v31 = vmax.f32 %v5046_v41, %v5082_v35 }
 0x1d5   : > { %v2026_v53 = vmax.f32 %v2024_v3, %v2025_v24  ;;  %v2512_v51 = vmax.f32 %v5048_v40, %v5089_v59  ;;  %v5096_v28 = vsel %vm711_vm0, %v708_v6, -inf  ;;  %v5102_v5 = vsel %vm711_vm0, %v709_v48, -inf }
 0x1d6   : > { %v5091_v25 = vmax.f32 %v1990_v20, %v1991_v12  ;;  %v2010_v29 = vrot.slane %v2009_v33, 2  ;;  %v2041_v7 = vmax.f32 %v2039_v62, %v5082_v35  ;;  %v2575_v54 = vmax.f32 %v5053_v9, %v5096_v28 }
 0x1d7   : > { %v2028_v49 = vmax.f32 %v2026_v53, %v2027_v16  ;;  %v2638_v24 = vmax.f32 %v5055_v22, %v5102_v5  ;;  %v5107_v20 = vsel %vm711_vm0, %v710_v58, -inf  ;;  %v2121_v62 = vsel %vm2120_vm1, %v3425_v13, %v3418_v46 }
 0x1d8   : > { %v2011_v6 = vmax.f32 %v2009_v33, %v2010_v29  ;;  %v2043_v12 = vmax.f32 %v2041_v7, %v5089_v59  ;;  %v2701_v3 = vmax.f32 %v5066_v43, %v5107_v20  ;;  %v2123_v58 = vsel %vm2122_vm2, %v3431_v4, %v2121_v62 }
 0x1d9   : > { %v2029_v48 = vrot.slane %v2028_v49, 4  ;;  %v2125_v29 = vsel %vm2124_vm3, %v3433_v45, %v2123_v58  ;;  %v5450_v58 = vld [vmem:[#allocation5_spill] sm:$0xff] }
 0x1da   : > { %v2012_v16 = vrot.slane %v2011_v6, 1  ;;  %v2045_v53 = vmax.f32 %v2043_v12, %v5096_v28  ;;  %v2127_v7 = vsel %vm2126_vm4, %v3439_v17, %v2125_v29  ;;  %v2134_v12 = vsel %vm2120_vm1, %v3527_v42, %v3520_v26  ;;  %v5452_v29 = vld [vmem:[#allocation6_spill] sm:$0xff] }
 0x1db   : > { %v2030_v33 = vmax.f32 %v2028_v49, %v2029_v48  ;;  %v2129_v45 = vsel %vm2128_vm5, %v3447_v1, %v2127_v7  ;;  %v2135_v49 = vsel %vm2122_vm2, %v3574_v15, %v2134_v12  ;;  %v2141_v17 = vsel %vm2120_vm1, %v3785_v19, %v3752_v52  ;;  %v5454_v7 = vld [vmem:[#allocation9_spill] sm:$0xff]  ;;  %v5455_v12 = vld [vmem:[#allocation11_spill] sm:$0xff] }
 0x1dc   : > { %v5121_v46 = vmax.f32 %v2011_v6, %v2012_v16  ;;  %v2047_v13 = vmax.f32 %v2045_v53, %v5102_v5  ;;  %v2131_v42 = vsel %vm2130_vm6, %v3449_v0, %v2129_v45  ;;  %v2136_v6 = vsel %vm2124_vm3, %v3604_v57, %v2135_v49  ;;  %v5457_v45 = vld [vmem:[#allocation12_spill] sm:$0xff] }
 0x1dd   : > { %v2031_v4 = vrot.slane %v2030_v33, 2  ;;  %v2142_v62 = vsel %vm2122_vm2, %v3816_v34, %v2141_v17  ;;  %v2133_v1 = vsel %vm2132_vm7, %v3451_v55, %v2131_v42  ;;  %v2137_v15 = vsel %vm2126_vm4, %v3636_v21, %v2136_v6  ;;  %v5458_v17 = vld [vmem:[#allocation13_spill] sm:$0xff]  ;;  %v5459_v42 = vld [vmem:[#allocation18_spill] sm:$0xff] }
 0x1de   : > { %v2049_v26 = vmax.f32 %v2047_v13, %v5107_v20  ;;  %v2143_v52 = vsel %vm2124_vm3, %v3847_v39, %v2142_v62  ;;  %v2138_v0 = vsel %vm2128_vm5, %v3663_v8, %v2137_v15  ;;  %v2148_v34 = vsel %vm2120_vm1, %v4026_v32, %v3995_v38  ;;  %2191 = vst.msk [vmem:[%s5134_s20] sm:$0xff] %vm711_vm0, %v2133_v1  ;;  %v5453_v13 = vld [vmem:[#allocation8_spill] sm:$0xff]  ;;  %v5460_v62 = vld [vmem:[#allocation21_spill] sm:$0xff] }
 0x1df   : > { %v2032_v48 = vmax.f32 %v2030_v33, %v2031_v4  ;;  %v2144_v57 = vsel %vm2126_vm4, %v3875_v61, %v2143_v52  ;;  %v2139_v21 = vsel %vm2130_vm6, %v3695_v60, %v2138_v0  ;;  %v2149_v8 = vsel %vm2122_vm2, %v4054_v27, %v2148_v34  ;;  %v5451_v33 = vld [vmem:[#allocation3_spill] sm:$0xff]  ;;  %v5462_v52 = vld [vmem:[#allocation2_spill] sm:$0xff]  ;;  %v5463_v0 = vld [vmem:[#allocation4_spill] sm:$0xff] }
 0x1e0   : > { %v2050_v19 = vrot.slane %v2049_v26, 4  ;;  %v2145_v39 = vsel %vm2128_vm5, %v3906_v11, %v2144_v57  ;;  %v2140_v61 = vsel %vm2132_vm7, %v3721_v50, %v2139_v21  ;;  %v2150_v32 = vsel %vm2124_vm3, %v4084_v30, %v2149_v8  ;;  %v5456_v4 = vld [vmem:[#allocation15_spill] sm:$0xff]  ;;  %v5466_v8 = vld [vmem:[#allocation22_spill] sm:$0xff] }
 0x1e1   : > { %v2033_v55 = vrot.slane %v2032_v48, 1  ;;  %v2146_v38 = vsel %vm2130_vm6, %v3934_v44, %v2145_v39  ;;  %v2151_v11 = vsel %vm2126_vm4, %v5450_v58, %v2150_v32  ;;  %v2155_v27 = vsel %vm2120_vm1, %v5452_v29, %v5451_v33  ;;  %2192 = vst.msk [vmem:[%s5134_s20 + $0x8] sm:$0xff] %vm711_vm0, %v2140_v61  ;;  %v5464_v34 = vld [vmem:[#allocation19_spill] sm:$0xff]  ;;  %v5470_v33 = vld [vmem:[#allocation10_spill] sm:$0xff] }
 0x1e2   : > { %v2051_v16 = vmax.f32 %v2049_v26, %v2050_v19  ;;  %v2147_v60 = vsel %vm2132_vm7, %v3964_v36, %v2146_v38  ;;  %v2152_v44 = vsel %vm2128_vm5, %v5453_v13, %v2151_v11  ;;  %v2156_v30 = vsel %vm2122_vm2, %v5454_v7, %v2155_v27  ;;  %v5465_v21 = vld [vmem:[#allocation7_spill] sm:$0xff]  ;;  %v5467_v38 = vld [vmem:[#allocation40_spill] sm:$0xff]  ;;  %v5472_v13 = vld [vmem:[#allocation41_spill] sm:$0xff] }
 0x1e3   : > { %v2034_v53 = vmax.f32 %v2032_v48, %v2033_v55  ;;  %v2162_v36 = vsel %vm2120_vm1, %v5456_v4, %v5455_v12  ;;  %2193 = vst.msk [vmem:[%s5134_s20 + $0x10] sm:$0xff] %vm711_vm0, %v2147_v60  ;;  %v2153_v49 = vsel %vm2130_vm6, %v5457_v45, %v2152_v44  ;;  %v2157_v26 = vsel %vm2124_vm3, %v5458_v17, %v2156_v30  ;;  %v5461_v48 = vld [vmem:[#allocation39_spill] sm:$0xff]  ;;  %v5471_v27 = vld [vmem:[#allocation16_spill] sm:$0xff]  ;;  %v5473_v7 = vld [vmem:[#allocation14_spill] sm:$0xff] }
 0x1e4   : > { %v2052_v50 = vrot.slane %v2051_v16, 2  ;;  %v2163_v6 = vsel %vm2122_vm2, %v5459_v42, %v2162_v36  ;;  %v2169_v1 = vsel %vm2120_vm1, %v5461_v48, %v5460_v62  ;;  %v2154_v19 = vsel %vm2132_vm7, %v5462_v52, %v2153_v49  ;;  %v5469_v60 = vld [vmem:[#allocation47_spill] sm:$0xff]  ;;  %v5474_v12 = vld [vmem:[#allocation20_spill] sm:$0xff]  ;;  %v5475_v36 = vld [vmem:[#allocation42_spill] sm:$0xff] }
 0x1e5   : > { %v2158_v57 = vsel %vm2126_vm4, %v5463_v0, %v2157_v26  ;;  %v2164_v55 = vsel %vm2124_vm3, %v5464_v34, %v2163_v6  ;;  %v2170_v32 = vsel %vm2122_vm2, %v5467_v38, %v2169_v1  ;;  %2194 = vst.msk [vmem:[%s5134_s20 + $0x18] sm:$0xff] %vm711_vm0, %v2154_v19  ;;  %v5476_v49 = vld [vmem:[#allocation48_spill] sm:$0xff]  ;;  %v5477_v42 = vld [vmem:[#allocation17_spill] sm:$0xff]  ;;  %v5478_v62 = vld [vmem:[#allocation43_spill] sm:$0xff] }
 0x1e6   : > { %v2053_v15 = vmax.f32 %v2051_v16, %v2052_v50  ;;  %v2159_v39 = vsel %vm2128_vm5, %v5465_v21, %v2158_v57  ;;  %v2165_v61 = vsel %vm2126_vm4, %v5466_v8, %v2164_v55  ;;  %v5468_v16 = vld [vmem:[#allocation46_spill] sm:$0xff]  ;;  %v2171_v44 = vsel %vm2124_vm3, %v5472_v13, %v2170_v32  ;;  %v5479_v52 = vld [vmem:[#allocation44_spill] sm:$0xff]  ;;  %v5481_v57 = vld [vmem:[#allocation23_spill] sm:$0xff] }
 0x1e7   : > { %v2176_v58 = vsel %vm2120_vm1, %v5469_v60, %v5468_v16  ;;  %v2160_v29 = vsel %vm2130_vm6, %v5470_v33, %v2159_v39  ;;  %v2166_v50 = vsel %vm2128_vm5, %v5471_v27, %v2165_v61  ;;  %v2172_v45 = vsel %vm2126_vm4, %v5475_v36, %v2171_v44  ;;  %v5482_v55 = vld [vmem:[#allocation26_spill] sm:$0xff]  ;;  %v5483_v21 = vld [vmem:[#allocation24_spill] sm:$0xff]  ;;  %v5486_v38 = vld [vmem:[#allocation27_spill] sm:$0xff] }
 0x1e8   : > { %v2054_v11 = vrot.slane %v2053_v15, 1  ;;  %v2161_v30 = vsel %vm2132_vm7, %v5473_v7, %v2160_v29  ;;  %v2167_v4 = vsel %vm2130_vm6, %v5474_v12, %v2166_v50  ;;  %v2177_v17 = vsel %vm2122_vm2, %v5476_v49, %v2176_v58  ;;  %v5485_v61 = vld [vmem:[#allocation28_spill] sm:$0xff]  ;;  %v5487_v16 = vld [vmem:[#allocation30_spill] sm:$0xff]  ;;  %v5488_v60 = vld [vmem:[#allocation29_spill] sm:$0xff] }
 0x1e9   : > { %v2168_v6 = vsel %vm2132_vm7, %v5477_v42, %v2167_v4  ;;  %v2173_v48 = vsel %vm2128_vm5, %v5478_v62, %v2172_v45  ;;  %v2178_v1 = vsel %vm2124_vm3, %v5044_v37, %v2177_v17  ;;  %2195 = vst.msk [vmem:[%s5134_s20 + $0x20] sm:$0xff] %vm711_vm0, %v2161_v30  ;;  %v2262_v39 = vmax.f32 %v5483_v21, %v5482_v55  ;;  %v5484_v37 = vld [vmem:[#allocation45_spill] sm:$0xff]  ;;  %v5490_v50 = vld [vmem:[#allocation32_spill] sm:$0xff]  ;;  %v5496_v4 = vld [vmem:[#allocation38_spill] sm:$0xff] }
 0x1ea   : > { %v2055_v26 = vmax.f32 %v2053_v15, %v2054_v11  ;;  %v2174_v19 = vsel %vm2130_vm6, %v5479_v52, %v2173_v48  ;;  %v2179_v0 = vsel %vm2126_vm4, %v5091_v25, %v2178_v1  ;;  %2196 = vst.msk [vmem:[%s5134_s20 + $0x28] sm:$0xff] %vm711_vm0, %v2168_v6  ;;  %v5480_v15 = vld [vmem:[#allocation25_spill] sm:$0xff]  ;;  %v2325_v32 = vmax.f32 %v5486_v38, %v5485_v61  ;;  %v5492_v30 = vld [vmem:[#allocation36_spill] sm:$0xff]  ;;  %v5497_v36 = vld [vmem:[#allocation35_spill] sm:$0xff] }
 0x1eb   : > { %v2199_v34 = vmax.f32 %v5481_v57, %v5480_v15  ;;  %v2175_v8 = vsel %vm2132_vm7, %v5484_v37, %v2174_v19  ;;  %v2180_v25 = vsel %vm2128_vm5, %v5121_v46, %v2179_v0  ;;  %v2388_v58 = vmax.f32 %v5488_v60, %v5487_v16  ;;  %v5491_v46 = vld [vmem:[#allocation31_spill] sm:$0xff] }
 0x1ec   : > { %v2181_v11 = vsel %vm2130_vm6, %v2034_v53, %v2180_v25  ;;  %2197 = vst.msk [vmem:[%s5134_s20 + $0x30] sm:$0xff] %vm711_vm0, %v2175_v8  ;;  %v5489_v29 = vmax.f32 %v5035_v56, %v5063_v2  ;;  %v2451_v13 = vmax.f32 %v5491_v46, %v5490_v50  ;;  %v2387_v7 = vmax.f32 %v2386_v10, %v2325_v32  ;;  %v5494_v2 = vld [vmem:[#allocation37_spill] sm:$0xff] }
 0x1ed   : > { %v2261_v33 = vmax.f32 %v2260_v18, %v2199_v34  ;;  %v2182_v44 = vsel %vm2132_vm7, %v2055_v26, %v2181_v11  ;;  %v2450_v53 = vmax.f32 %v2449_v31, %v2388_v58  ;;  %v2514_v47 = vmax.f32 %v5493_v63, %v5492_v30  ;;  %v5495_v18 = vld [vmem:[#allocation34_spill] sm:$0xff] }
 0x1ee   : > { %v2324_v27 = vmax.f32 %v5489_v29, %v2262_v39  ;;  %2198 = vst.msk [vmem:[%s5134_s20 + $0x38] sm:$0xff] %vm711_vm0, %v2182_v44  ;;  %v2513_v56 = vmax.f32 %v2512_v51, %v2451_v13  ;;  %v2577_v12 = vmax.f32 %v5495_v18, %v5494_v2  ;;  %v2640_v14 = vmax.f32 %v5497_v36, %v5496_v4 }
 0x1ef   : > { %2707 = vst.msk [vmem:[%s188_s23] sm:$0xff] %vm711_vm0, %v2261_v33  ;;  %v2576_v41 = vmax.f32 %v2575_v54, %v2514_v47  ;;  %2709 = vst.msk [vmem:[%s188_s23 + $0x10] sm:$0xff] %vm711_vm0, %v2387_v7 }
 0x1f0   : > { %2708 = vst.msk [vmem:[%s188_s23 + $0x8] sm:$0xff] %vm711_vm0, %v2324_v27  ;;  %2710 = vst.msk [vmem:[%s188_s23 + $0x18] sm:$0xff] %vm711_vm0, %v2450_v53  ;;  %v2639_v40 = vmax.f32 %v2638_v24, %v2577_v12  ;;  %v2702_v23 = vmax.f32 %v2701_v3, %v2640_v14 }
 0x1f1   : > { %2711 = vst.msk [vmem:[%s188_s23 + $0x20] sm:$0xff] %vm711_vm0, %v2513_v56  ;;  %2712 = vst.msk [vmem:[%s188_s23 + $0x28] sm:$0xff] %vm711_vm0, %v2576_v41 }
 0x1f2   : > { %2713 = vst.msk [vmem:[%s188_s23 + $0x30] sm:$0xff] %vm711_vm0, %v2639_v40  ;;  %2714 = vst.msk [vmem:[%s188_s23 + $0x38] sm:$0xff] %vm711_vm0, %v2702_v23 }
 0x1f3 PF: > { %s13_s11 = sadd.s32 1, %s2928_s11   ;;  %s5498_s9 = smov %s2924_s10 }
 0x1f4   : > { %p10_p5 = scmp.ge.s32.totalorder %s13_s11, 4   ;;  %s5499_s10 = smov %s5501_s12 }
 0x1f6   :  { %12 = sbr.rel (!%p10_p5) target bundleno = 2 (0x2), region = 74 }

</bundles_post_ra>
